<compile_context>
chip_gen: v5e
topology: v5e:2x2
jax: 0.10.0
libtpu: 0.0.40
codegen_flags: <defaults>
</compile_context>

<pallas_src>
import jax
import jax.numpy as jnp
from jax.experimental import pallas as pl
from jax.experimental.pallas import tpu as pltpu

TM_MAX = 2048                      # row (lane) tile for all Pallas kernels


# --------------------------------------------------------------------------
# Small host-side helpers
# --------------------------------------------------------------------------
def _cdiv(a, b):
    return -(-a // b)


def _pick_tm(r):
    # Full row extent when it fits (block == full dim is always legal);
    # otherwise a 128-multiple tile with a masked ragged tail.
    return r if r <= TM_MAX else TM_MAX


# --------------------------------------------------------------------------
# In-kernel math helpers
# --------------------------------------------------------------------------
def _gelu(x):
    # tanh approximation: goes to the otherwise idle EUP slot instead of a VPU
    # erf polynomial.  TODO(synk): ~1e-3 deviation from torch's exact erf GELU.
    return 0.5 * x * (1.0 + jnp.tanh(0.7978845608028654 * (x + 0.044715 * x * x * x)))


def _sigmoid(x):
    return 1.0 / (1.0 + jnp.exp(-x))


# --------------------------------------------------------------------------
# Fused matmul kernels (conv = im2col + matmul; bias / act / GN-stats fused)
# Layout: weights (N, K), input patches (K, tm rows-on-lanes), output (N, tm).
# --------------------------------------------------------------------------
def _build_mm_plain(act):
    def kernel(x_ref, w_ref, b_ref, o_ref):
        y = jnp.dot(w_ref[...], x_ref[0],
                    preferred_element_type=jnp.float32) + b_ref[...]
        if act == "gelu":
            y = _gelu(y)
        o_ref[0] = y.astype(o_ref.dtype)
    return kernel


def _build_mm_stats(r_total, tm):
    masked = (r_total % tm) != 0

    def kernel(x_ref, w_ref, b_ref, o_ref, sum_ref, ssq_ref):
        i = pl.program_id(1)
        y = jnp.dot(w_ref[...], x_ref[0],
                    preferred_element_type=jnp.float32) + b_ref[...]
        o_ref[0] = y.astype(o_ref.dtype)           # bf16 store, f32 stats below
        if masked:                                  # ragged tail: zero pad cols
            col = jax.lax.broadcasted_iota(jnp.int32, y.shape, 1) + i * tm
            y = jnp.where(col < r_total, y, 0.0)
        s = jnp.sum(y, axis=1, keepdims=True)
        q = jnp.sum(y * y, axis=1, keepdims=True)

        @pl.when(i == 0)
        def _():
            sum_ref[0] = s
            ssq_ref[0] = q

        @pl.when(i > 0)
        def _():
            sum_ref[0] = sum_ref[0] + s
            ssq_ref[0] = ssq_ref[0] + q
    return kernel


def _build_mm_glu(has_add):
    if has_add:
        def kernel(x_ref, wa_ref, wg_ref, ba_ref, bg_ref, e_ref, o_ref):
            x = x_ref[0]
            a = jnp.dot(wa_ref[...], x, preferred_element_type=jnp.float32) + ba_ref[...]
            g = jnp.dot(wg_ref[...], x, preferred_element_type=jnp.float32) + bg_ref[...]
            o_ref[0] = (a * _sigmoid(g) + e_ref[...]).astype(o_ref.dtype)
    else:
        def kernel(x_ref, wa_ref, wg_ref, ba_ref, bg_ref, o_ref):
            x = x_ref[0]
            a = jnp.dot(wa_ref[...], x, preferred_element_type=jnp.float32) + ba_ref[...]
            g = jnp.dot(wg_ref[...], x, preferred_element_type=jnp.float32) + bg_ref[...]
            o_ref[0] = (a * _sigmoid(g)).astype(o_ref.dtype)
    return kernel


def _mm_call(x3, weights, biases, n_out, *, act="none", out_dtype=jnp.bfloat16,
             stats=False, add=None):
    """x3 (B, K, R) bf16; each weight (Ni, K) bf16; bias (Ni, 1) f32."""
    B, K, R = x3.shape
    tm = _pick_tm(R)
    nsteps = _cdiv(R, tm)
    grid = (B, nsteps)

    in_specs = [pl.BlockSpec((1, K, tm), lambda b, i: (b, 0, i))]
    args = [x3]
    for w in weights:
        n = w.shape[0]
        in_specs.append(pl.BlockSpec((n, K), lambda b, i: (0, 0)))
        args.append(w)
    for bb in biases:
        n = bb.shape[0]
        in_specs.append(pl.BlockSpec((n, 1), lambda b, i: (0, 0)))
        args.append(bb)
    if add is not None:
        in_specs.append(pl.BlockSpec((n_out, tm), lambda b, i: (0, i)))
        args.append(add.astype(jnp.float32))

    y_shape = jax.ShapeDtypeStruct((B, n_out, R), out_dtype)
    y_spec = pl.BlockSpec((1, n_out, tm), lambda b, i: (b, 0, i))

    if act == "glu":
        assert not stats
        kernel = _build_mm_glu(add is not None)
        out_shape, out_specs = y_shape, y_spec
        sem = ("parallel", "parallel")
    elif stats:
        assert act == "none" and add is None
        kernel = _build_mm_stats(R, tm)
        st_shape = jax.ShapeDtypeStruct((B, n_out, 1), jnp.float32)
        st_spec = pl.BlockSpec((1, n_out, 1), lambda b, i: (b, 0, 0))
        out_shape = (y_shape, st_shape, st_shape)
        out_specs = (y_spec, st_spec, st_spec)
        sem = ("parallel", "arbitrary")            # stats block accumulates over i
    else:
        assert add is None
        kernel = _build_mm_plain(act)
        out_shape, out_specs = y_shape, y_spec
        sem = ("parallel", "parallel")

    return pl.pallas_call(
        kernel,
        out_shape=out_shape,
        grid_spec=pltpu.PrefetchScalarGridSpec(
            num_scalar_prefetch=0, grid=grid,
            in_specs=in_specs, out_specs=out_specs),
        compiler_params=pltpu.CompilerParams(dimension_semantics=sem),
    )(*args)


# --------------------------------------------------------------------------
# Fused GroupNorm-affine (+ GELU / GLU) application kernels
# --------------------------------------------------------------------------
def _build_ss(act, glu, c):
    def kernel(x_ref, s_ref, t_ref, o_ref):
        y = x_ref[0].astype(jnp.float32) * s_ref[0] + t_ref[0]
        if glu:
            y = y[:c] * _sigmoid(y[c:])            # sublane halves (c multiple of 8)
        elif act == "gelu":
            y = _gelu(y)
        o_ref[0] = y.astype(o_ref.dtype)
    return kernel


def _ss_call(x3, scale, shift, *, act="none", glu=False, out_dtype=jnp.bfloat16):
    """x3 (B, N, R); scale/shift (B, N, 1) f32; output (B, N or N//2, R)."""
    B, N, R = x3.shape
    tm = _pick_tm(R)
    nsteps = _cdiv(R, tm)
    n_out = N // 2 if glu else N
    return pl.pallas_call(
        _build_ss(act, glu, n_out),
        out_shape=jax.ShapeDtypeStruct((B, n_out, R), out_dtype),
        grid_spec=pltpu.PrefetchScalarGridSpec(
            num_scalar_prefetch=0, grid=(B, nsteps),
            in_specs=[pl.BlockSpec((1, N, tm), lambda b, i: (b, 0, i)),
                      pl.BlockSpec((1, N, 1), lambda b, i: (b, 0, 0)),
                      pl.BlockSpec((1, N, 1), lambda b, i: (b, 0, 0))],
            out_specs=pl.BlockSpec((1, n_out, tm), lambda b, i: (b, 0, i))),
        compiler_params=pltpu.CompilerParams(
            dimension_semantics=("parallel", "parallel")),
    )(x3, scale.astype(jnp.float32), shift.astype(jnp.float32))


def _gn_scale_shift(ssum, ssq, count, gamma, beta, groups, phases=1, eps=1e-5):
    """Finish GroupNorm from fused per-channel sum / sum-of-squares (tiny, JAX)."""
    B, N, _ = ssum.shape
    C = N // phases
    s = ssum.reshape(B, phases, C).sum(axis=1)
    q = ssq.reshape(B, phases, C).sum(axis=1)
    G = groups
    n = float(count * phases * (C // G))
    gs = s.reshape(B, G, C // G).sum(axis=-1)
    gq = q.reshape(B, G, C // G).sum(axis=-1)
    mean = gs / n
    var = gq / n - mean * mean
    rstd = jax.lax.rsqrt(jnp.maximum(var, 0.0) + eps)
    mean_c = jnp.repeat(mean, C // G, axis=1)
    rstd_c = jnp.repeat(rstd, C // G, axis=1)
    scale = gamma[None, :] * rstd_c
    shift = beta[None, :] - mean_c * scale
    if phases > 1:                                  # expand per-co -> per-(phase, co)
        scale = jnp.tile(scale, (1, phases))
        shift = jnp.tile(shift, (1, phases))
    return scale[:, :, None], shift[:, :, None]


# --------------------------------------------------------------------------
# Conv wrappers (channel-major im2col glue + fused Pallas matmul)
# --------------------------------------------------------------------------
def _im2col_cm(x, kh, kw, stride, padding):
    B, Ci, F, T = x.shape
    sh, sw = stride
    ph, pw = padding
    x = x.astype(jnp.bfloat16)                     # patches materialize at half bytes
    if kh == 1 and kw == 1 and sh == 1 and sw == 1 and ph == 0 and pw == 0:
        return x.reshape(B, Ci, F * T), F, T       # 1x1: no materialization
    xp = jnp.pad(x, ((0, 0), (0, 0), (ph, ph), (pw, pw)))
    Fo = (F + 2 * ph - kh) // sh + 1
    To = (T + 2 * pw - kw) // sw + 1
    taps = [xp[:, :, i:i + sh * (Fo - 1) + 1:sh, j:j + sw * (To - 1) + 1:sw]
            for i in range(kh) for j in range(kw)]
    # TODO(synk): taps still materialize in HBM (kh*kw/stride x input bytes); an
    # in-kernel tap accumulation over a halo'd F window would remove this.
    patches = jnp.stack(taps, axis=2).reshape(B, Ci * kh * kw, Fo * To)
    return patches, Fo, To


def conv2d(x, prep, stride, padding, *, act="none", stats=False, add=None,
           out_dtype=jnp.bfloat16):
    B = x.shape[0]
    kh, kw = prep["ksize"]
    patches, Fo, To = _im2col_cm(x, kh, kw, stride, padding)
    if act == "glu":
        weights, biases = prep["wmats"], prep["biases"]
    else:
        weights, biases = [prep["wmat"]], [prep["bias"]]
    n_out = weights[0].shape[0]
    outs = _mm_call(patches, weights, biases, n_out, act=act,
                    out_dtype=out_dtype, stats=stats, add=add)
    if stats:
        y, ssum, ssq = outs
        return y.reshape(B, n_out, Fo, To), ssum, ssq
    return outs.reshape(B, n_out, Fo, To)


def conv_transpose_freq(x, prep, *, act="none", stats=False,
                        out_dtype=jnp.bfloat16):
    """ConvTranspose2d (K,1)/(s,1) as one fused matmul producing s interleaved
    output phases; returns the un-deinterleaved (B, s*Co, Fr, T) buffer."""
    B, Ci, F, T = x.shape
    Q, s, Co = prep["Q"], prep["s"], prep["Co"]
    xb = x.astype(jnp.bfloat16)
    if Q == 1:
        Fr = F
        patches = xb.reshape(B, Ci, F * T)
    else:
        xp = jnp.pad(xb, ((0, 0), (0, 0), (Q - 1, Q - 1), (0, 0)))
        Fr = F + Q - 1
        taps = [xp[:, :, j:j + Fr, :] for j in range(Q)]
        patches = jnp.stack(taps, axis=1).reshape(B, Q * Ci, Fr * T)
    outs = _mm_call(patches, [prep["wmat"]], [prep["bias"]], s * Co,
                    act=act, out_dtype=out_dtype, stats=stats)
    if stats:
        y, ssum, ssq = outs
        return y.reshape(B, s * Co, Fr, T), ssum, ssq
    return outs.reshape(B, s * Co, Fr, T)


def _deinterleave_crop(y, s, Co, lout, pad):
    # Single fused XLA transpose+slice (no separate compute pass).
    B, _, Fr, T = y.shape
    y = y.reshape(B, s, Co, Fr, T)
    y = jnp.transpose(y, (0, 2, 3, 1, 4)).reshape(B, Co, Fr * s, T)
    return y[:, :, pad:lout - pad, :]


# --------------------------------------------------------------------------
# STFT / ISTFT glue (torch.stft / torch.istft equivalents)
# TODO(synk): FFT has no Pallas primitive; spectral transforms stay in jnp.fft.
# --------------------------------------------------------------------------
def _hann(n):
    return 0.5 - 0.5 * jnp.cos(2.0 * jnp.pi * jnp.arange(n) / n)


def stft(x, n_fft, hop, win_length):
    win = _hann(win_length)
    lpad = (n_fft - win_length) // 2
    win_full = jnp.pad(win, (lpad, n_fft - win_length - lpad))
    xp = jnp.pad(x, ((0, 0), (n_fft // 2, n_fft // 2)), mode="reflect")
    L = x.shape[-1]
    n_frames = 1 + L // hop
    idx = jnp.arange(n_frames)[:, None] * hop + jnp.arange(n_fft)[None, :]
    frames = xp[:, idx] * win_full[None, None, :]
    spec = jnp.fft.rfft(frames, axis=-1) / jnp.sqrt(float(n_fft))
    return jnp.transpose(spec, (0, 2, 1))


def istft(z, n_fft, hop, win_length):
    N, Fr, T = z.shape
    win = _hann(win_length)
    lpad = (n_fft - win_length) // 2
    win_full = jnp.pad(win, (lpad, n_fft - win_length - lpad))
    frames = jnp.fft.irfft(jnp.transpose(z, (0, 2, 1)), n=n_fft, axis=-1)
    frames = frames * (jnp.sqrt(float(n_fft)) * win_full)[None, None, :]
    out_len = n_fft + hop * (T - 1)
    idx = jnp.arange(T)[:, None] * hop + jnp.arange(n_fft)[None, :]
    y = jnp.zeros((N, out_len), jnp.float32).at[:, idx].add(frames)
    wsq = jnp.zeros((out_len,), jnp.float32).at[idx].add(
        jnp.broadcast_to(win_full ** 2, (T, n_fft)))
    y = y / jnp.where(wsq > 1e-11, wsq, 1.0)
    half = n_fft // 2
    return y[:, half:out_len - half]


# --------------------------------------------------------------------------
# Parameter construction + one-time kernel-ready preparation (hoisted)
# --------------------------------------------------------------------------
class KeyGen:
    def __init__(self, key):
        self.key = key

    def __call__(self):
        self.key, sub = jax.random.split(self.key)
        return sub


def conv_init(kg, ci, co, kh, kw):
    fan = ci * kh * kw
    w = jax.random.normal(kg(), (co, ci, kh, kw), jnp.float32) / (fan ** 0.5)
    b = 0.01 * jax.random.normal(kg(), (co,), jnp.float32)
    return w, b


def convtr_init(kg, ci, co, k):
    fan = ci * k
    w = jax.random.normal(kg(), (ci, co, k, 1), jnp.float32) / (fan ** 0.5)
    b = 0.01 * jax.random.normal(kg(), (co,), jnp.float32)
    return w, b


def gn_params(c):
    return jnp.ones((c,), jnp.float32), jnp.zeros((c,), jnp.float32)


def prep_conv(w, b, glu=False):
    """(Co, Ci, kh, kw) -> kernel-ready bf16 (Co, Ci*kh*kw) matrices + f32 bias."""
    Co, Ci, kh, kw = w.shape
    wm = w.reshape(Co, Ci * kh * kw)
    p = dict(ksize=(kh, kw), glu=glu)
    if glu:
        C = Co // 2
        p["wmats"] = [wm[:C].astype(jnp.bfloat16), wm[C:].astype(jnp.bfloat16)]
        p["biases"] = [b[:C].reshape(C, 1).astype(jnp.float32),
                       b[C:].reshape(C, 1).astype(jnp.float32)]
    else:
        p["wmat"] = wm.astype(jnp.bfloat16)
        p["bias"] = b.reshape(Co, 1).astype(jnp.float32)
    return p


def prep_convtr(w, b, stride):
    """ConvTranspose2d (Ci, Co, K, 1) -> (s*Co, Q*Ci) phase-interleaved matrix."""
    Ci, Co, K, _ = w.shape
    s = stride
    Q = _cdiv(K, s)
    Kp = Q * s
    wt = jnp.pad(w[:, :, :, 0], ((0, 0), (0, 0), (0, Kp - K)))
    wt = wt.reshape(Ci, Co, Q, s)[:, :, ::-1, :]          # [ci, co, j, r]
    wmat = jnp.transpose(wt, (3, 1, 2, 0)).reshape(s * Co, Q * Ci)
    bias = jnp.tile(b, (s,)).reshape(s * Co, 1)
    return dict(wmat=wmat.astype(jnp.bfloat16), bias=bias.astype(jnp.float32),
                Q=Q, K=K, Kp=Kp, Co=Co, s=s)


def build_aero_params(kg, *, in_channels=1, out_channels=1, channels=8,
                      growth=2, nfft=64, hop_length=16, lr_sr=4000,
                      hr_sr=16000, kernel_size=8, strides=(4, 2), context=1,
                      context_enc=0, norm_starts=1, norm_groups=2,
                      freq_emb=0.2, emb_scale=10, emb_smooth=True,
                      cac=True, rewrite=True):
    scale = hr_sr / lr_sr
    hp = dict(nfft=nfft, hop=int(hop_length // scale),
              win_length=int(nfft // scale), scale=scale,
              out_channels=out_channels, norm_groups=norm_groups)
    enc_layers, dec_layers = [], []
    freq_emb_prep = None
    chin_z = in_channels * (2 if cac else 1)
    chout_z = channels
    freqs = nfft // 2
    for index in range(len(strides)):
        norm = index >= norm_starts
        stri = strides[index]
        ker = freqs if freqs < kernel_size else kernel_size
        pad = (ker - stri) // 2
        # ---- encoder layer (HEncLayer, frequency branch) ----
        enc = dict(stride=stri, pad=pad, pre_conv=None, rewrite=None,
                   norm1=None, norm2=None)
        chin_cur = chin_z
        if index == 0:
            w, b = conv_init(kg, chin_cur, chout_z, 1, 1)
            enc["pre_conv"] = prep_conv(w, b)
            chin_cur = chout_z
        w, b = conv_init(kg, chin_cur, chout_z, ker, 1)
        enc["conv"] = prep_conv(w, b)
        if norm:
            enc["norm1"] = gn_params(chout_z)
        if rewrite:
            kr = 1 + 2 * context_enc
            w, b = conv_init(kg, chout_z, 2 * chout_z, kr, kr)
            enc["rewrite_ctx"] = context_enc
            if norm:
                enc["rewrite"] = prep_conv(w, b)              # pre-norm path
                enc["norm2"] = gn_params(2 * chout_z)
            else:
                enc["rewrite"] = prep_conv(w, b, glu=True)    # fused GLU path
        enc_layers.append(enc)
        # ---- decoder layer (HDecLayer), inserted at front ----
        dec_chout = out_channels * (2 if cac else 1) if index == 0 else chin_z
        dec_chin = 2 * chout_z
        dec = dict(last=(index == 0), stride=stri, pad=pad, rewrite=None,
                   norm1=None, norm2=None)
        if rewrite:
            kr = 1 + 2 * context
            w, b = conv_init(kg, dec_chin, 2 * dec_chin, kr, kr)
            dec["rewrite_ctx"] = context
            if norm:
                dec["rewrite"] = prep_conv(w, b)
                dec["norm1"] = gn_params(2 * dec_chin)
            else:
                dec["rewrite"] = prep_conv(w, b, glu=True)
        w, b = convtr_init(kg, dec_chin, dec_chout, ker)
        dec["conv_tr"] = prep_convtr(w, b, stri)
        if norm:
            dec["norm2"] = gn_params(dec_chout)
        dec_layers.insert(0, dec)
        # ---- bookkeeping (same order as Aero.__init__) ----
        chin_z = chout_z
        chout_z = int(growth * chout_z)
        freqs //= stri
        if index == 0 and freq_emb:
            w = jax.random.normal(kg(), (freqs, chin_z), jnp.float32)
            if emb_smooth:
                w = jnp.cumsum(w, axis=0) / jnp.sqrt(
                    jnp.arange(1, freqs + 1, dtype=jnp.float32))[:, None]
            # Hoisted: effective additive term (weight_scale * emb), channel-major.
            freq_emb_prep = (freq_emb * w).T.astype(jnp.float32)   # (C, F0)
    # TODO(synk): rescale_module only touches Conv1d/ConvTranspose1d; this
    # frequency-only model has none, so it is a structural no-op and skipped.
    return dict(enc=enc_layers, dec=dec_layers, freq_emb=freq_emb_prep, hp=hp)


# --------------------------------------------------------------------------
# Layer forwards (channel-major)
# --------------------------------------------------------------------------
def henc_forward(x, p, groups, emb_add=None):
    B = x.shape[0]
    if p["pre_conv"] is not None:
        x = conv2d(x, p["pre_conv"], (1, 1), (0, 0))
    # TODO(synk): FTB freq-attention never instantiated (enc_freq_attn >= depth).
    st, pd = (p["stride"], 1), (p["pad"], 0)
    if p["norm1"] is None:
        x = conv2d(x, p["conv"], st, pd, act="gelu")          # GELU in epilogue
    else:
        y, ssum, ssq = conv2d(x, p["conv"], st, pd, stats=True)
        _, C, Fo, To = y.shape
        sc, sh = _gn_scale_shift(ssum, ssq, Fo * To, *p["norm1"], groups)
        x = _ss_call(y.reshape(B, C, Fo * To), sc, sh, act="gelu")
        x = x.reshape(B, C, Fo, To)
    # TODO(synk): DConv residual branch omitted (model built with dconv_mode=0).
    if p["rewrite"] is not None:
        c = p["rewrite_ctx"]
        if p["norm2"] is None:
            x = conv2d(x, p["rewrite"], (1, 1), (c, c), act="glu", add=emb_add)
            emb_add = None                                    # consumed (fused)
        else:
            y, ssum, ssq = conv2d(x, p["rewrite"], (1, 1), (c, c), stats=True)
            _, N, Fo, To = y.shape
            sc, sh = _gn_scale_shift(ssum, ssq, Fo * To, *p["norm2"], groups)
            x = _ss_call(y.reshape(B, N, Fo * To), sc, sh, glu=True)
            x = x.reshape(B, N // 2, Fo, To)
    if emb_add is not None:
        Cc, _ = emb_add.shape
        x = x + emb_add.reshape(1, Cc, x.shape[2], x.shape[3]).astype(x.dtype)
    return x


def hdec_forward(x, skip, p, groups):
    x = jnp.concatenate([x, skip], axis=1)
    B = x.shape[0]
    if p["rewrite"] is not None:
        c = p["rewrite_ctx"]
        if p["norm1"] is not None:
            y, ssum, ssq = conv2d(x, p["rewrite"], (1, 1), (c, c), stats=True)
            _, N, Fo, To = y.shape
            sc, sh = _gn_scale_shift(ssum, ssq, Fo * To, *p["norm1"], groups)
            y = _ss_call(y.reshape(B, N, Fo * To), sc, sh, glu=True)
            y = y.reshape(B, N // 2, Fo, To)
        else:
            y = conv2d(x, p["rewrite"], (1, 1), (c, c), act="glu")
    else:
        y = x
    # TODO(synk): DConv residual branch omitted (dconv_mode & 2 == 0 here).
    prep = p["conv_tr"]
    s, Co, K = prep["s"], prep["Co"], prep["K"]
    Fin, T = y.shape[2], y.shape[3]
    lout = (Fin - 1) * s + K
    last = p["last"]
    act = "none" if last else "gelu"
    out_dt = jnp.float32 if last else jnp.bfloat16
    if p["norm2"] is not None:
        # Fused GN stats over the pre-deinterleave conv_tr output (exact when
        # K % stride == 0).  TODO(synk): K % stride != 0 needs a JAX-stats fallback.
        assert prep["Kp"] == K
        z, ssum, ssq = conv_transpose_freq(y, prep, act="none", stats=True)
        Fr = z.shape[2]
        sc, sh = _gn_scale_shift(ssum, ssq, Fr * T, *p["norm2"], groups, phases=s)
        z = _ss_call(z.reshape(B, s * Co, Fr * T), sc, sh, act=act, out_dtype=out_dt)
        z = z.reshape(B, s * Co, Fr, T)
    else:
        z = conv_transpose_freq(y, prep, act=act, out_dtype=out_dt)
    return _deinterleave_crop(z, s, Co, lout, p["pad"])


# --------------------------------------------------------------------------
# Full Aero forward
# --------------------------------------------------------------------------
def aero_forward(mix, params):
    hp = params["hp"]
    B, Cin, L = mix.shape
    hop, nfft, win_length, scale = hp["hop"], hp["nfft"], hp["win_length"], hp["scale"]

    # ----- _spec -----
    rem = L % hop
    xpad = jnp.pad(mix, ((0, 0), (0, 0), (0, (hop - rem) % hop)))
    z = stft(xpad.reshape(B * Cin, -1), nfft, hop, win_length)
    z = z[:, :-1, :].reshape(B, Cin, nfft // 2, -1)            # drop Nyquist bin
    Fq, T = z.shape[2], z.shape[3]

    # ----- complex -> channels (native channel-major, no layout transpose) -----
    x = jnp.stack([z.real, z.imag], axis=2).reshape(B, Cin * 2, Fq, T)
    x = x.astype(jnp.float32)
    mean = jnp.mean(x, axis=(1, 2, 3), keepdims=True)
    std = jnp.std(x, axis=(1, 2, 3), ddof=1, keepdims=True)    # torch unbiased std
    x = (x - mean) / (1e-5 + std)

    # ----- encoder -----
    saved = []
    for idx, enc in enumerate(params["enc"]):
        emb_add = None
        if idx == 0 and params["freq_emb"] is not None:
            emb = params["freq_emb"]                           # (C, F0)
            Cc, F0 = emb.shape
            emb_add = jnp.broadcast_to(emb[:, :, None], (Cc, F0, T)).reshape(Cc, F0 * T)
        x = henc_forward(x, enc, hp["norm_groups"], emb_add=emb_add)
        saved.append(x)

    # ----- decoder (reference seeds it with zeros; skips carry the encodings) -----
    x = jnp.zeros_like(x)
    for dec in params["dec"]:
        skip = saved.pop(-1)
        x = hdec_forward(x, skip, dec, hp["norm_groups"])

    # ----- de-normalize, back to complex spectrogram -----
    out_ch = hp["out_channels"]
    xc = x.astype(jnp.float32).reshape(B, out_ch, 2, Fq, T)
    xc = xc * std[:, None] + mean[:, None]
    zc = xc[:, :, 0] + 1j * xc[:, :, 1]

    # ----- _ispec -----
    zc = jnp.pad(zc, ((0, 0), (0, 0), (0, 1), (0, 0)))         # re-add Nyquist
    hl = int(hop * scale)
    wl = int(win_length * scale)
    n_fft_i = 2 * zc.shape[2] - 2
    y = istft(zc.reshape(B * out_ch, zc.shape[2], T), n_fft_i, hl, wl)
    y = y.reshape(B, out_ch, -1)
    return y[..., : int(L * scale)]


# --------------------------------------------------------------------------
if __name__ == "__main__":
    root = jax.random.PRNGKey(0)
    kparams, kdata = jax.random.split(root)
    params = build_aero_params(KeyGen(kparams))

    B, C, L = 2, 1, 64
    mix = jax.random.normal(kdata, (B, C, L), jnp.float32)

    fwd = jax.jit(lambda m: aero_forward(m, params))
    out = jax.block_until_ready(fwd(mix))

    expected_len = int(L * params["hp"]["scale"])              # 4x super-resolution
    assert out.shape == (B, 1, expected_len), out.shape
    assert bool(jnp.all(jnp.isfinite(out)))
    print("KERNEL_OK")
</pallas_src>

<mosaic_0001>
module attributes {stable_mosaic.version = 11 : i64} {
  func.func @kernel(%arg0: i32, %arg1: i32, %arg2: memref<1x2x544xbf16, #tpu.memory_space<vmem>>, %arg3: memref<8x2xbf16, #tpu.memory_space<vmem>>, %arg4: memref<8x1xf32, #tpu.memory_space<vmem>>, %arg5: memref<1x8x544xbf16, #tpu.memory_space<vmem>>) attributes {dimension_semantics = [#tpu.dimension_semantics<parallel>, #tpu.dimension_semantics<parallel>], iteration_bounds = array<i64: 2, 1>, scalar_prefetch = 0 : i64, scratch_operands = 0 : i64, tpu.core_type = #tpu.core_type<tc>, window_params = [{transform_indices = @transform_0, window_bounds = array<i64: 1, 2, 544>}, {pipeline_mode = #tpu.pipeline_mode<synchronous>, transform_indices = @transform_1, window_bounds = array<i64: 8, 2>}, {pipeline_mode = #tpu.pipeline_mode<synchronous>, transform_indices = @transform_2, window_bounds = array<i64: 8, 1>}, {transform_indices = @transform_3, window_bounds = array<i64: 1, 8, 544>}]} {
    %c0 = arith.constant 0 : index
    %c0_0 = arith.constant 0 : index
    %0 = vector.load %arg3[%c0, %c0_0] : memref<8x2xbf16, #tpu.memory_space<vmem>>, vector<8x2xbf16>
    %c0_1 = arith.constant 0 : index
    %c0_2 = arith.constant 0 : index
    %c0_3 = arith.constant 0 : index
    %1 = vector.load %arg2[%c0_1, %c0_2, %c0_3] : memref<1x2x544xbf16, #tpu.memory_space<vmem>>, vector<1x2x544xbf16>
    %2 = vector.shape_cast %1 : vector<1x2x544xbf16> to vector<2x544xbf16>
    %cst = arith.constant dense<0.000000e+00> : vector<8x544xf32>
    %3 = tpu.matmul %0, %2, %cst {dimension_numbers = #tpu.dot_dimension_numbers<[1], [0], [0], [1], [0, 0, 1, 1], [], []>} : vector<8x2xbf16>, vector<2x544xbf16>, vector<8x544xf32> -> vector<8x544xf32>
    %c0_4 = arith.constant 0 : index
    %c0_5 = arith.constant 0 : index
    %4 = vector.load %arg4[%c0_4, %c0_5] : memref<8x1xf32, #tpu.memory_space<vmem>>, vector<8x1xf32>
    %5 = vector.broadcast %4 : vector<8x1xf32> to vector<8x544xf32>
    %6 = arith.addf %3, %5 : vector<8x544xf32>
    %7 = arith.truncf %6 : vector<8x544xf32> to vector<8x544xbf16>
    %c0_6 = arith.constant 0 : index
    %c0_7 = arith.constant 0 : index
    %c0_8 = arith.constant 0 : index
    %8 = vector.load %arg5[%c0_6, %c0_7, %c0_8] : memref<1x8x544xbf16, #tpu.memory_space<vmem>>, vector<1x8x544xbf16>
    %9 = vector.shape_cast %8 : vector<1x8x544xbf16> to vector<8x544xbf16>
    %10 = vector.shape_cast %7 : vector<8x544xbf16> to vector<1x8x544xbf16>
    tpu.vector_store %arg5[%c0_6, %c0_7, %c0_8], %10 {strides = array<i32>} : memref<1x8x544xbf16, #tpu.memory_space<vmem>>, vector<1x8x544xbf16>,
    return
  }
  func.func @transform_0(%arg0: i32, %arg1: i32) -> (i32, i32, i32) {
    %c0_i32 = arith.constant 0 : i32
    %c0_i32_0 = arith.constant 0 : i32
    return %arg0, %c0_i32, %arg1 : i32, i32, i32
  }
  func.func @transform_1(%arg0: i32, %arg1: i32) -> (i32, i32) {
    %c0_i32 = arith.constant 0 : i32
    %c0_i32_0 = arith.constant 0 : i32
    %c0_i32_1 = arith.constant 0 : i32
    return %c0_i32, %c0_i32_0 : i32, i32
  }
  func.func @transform_2(%arg0: i32, %arg1: i32) -> (i32, i32) {
    %c0_i32 = arith.constant 0 : i32
    %c0_i32_0 = arith.constant 0 : i32
    %c0_i32_1 = arith.constant 0 : i32
    return %c0_i32, %c0_i32_0 : i32, i32
  }
  func.func @transform_3(%arg0: i32, %arg1: i32) -> (i32, i32, i32) {
    %c0_i32 = arith.constant 0 : i32
    %c0_i32_0 = arith.constant 0 : i32
    return %arg0, %c0_i32, %arg1 : i32, i32, i32
  }
}

module attributes {stable_mosaic.version = 11 : i64} {
  func.func @kernel(%arg0: i32, %arg1: i32, %arg2: memref<1x64x136xbf16, #tpu.memory_space<vmem>>, %arg3: memref<8x64xbf16, #tpu.memory_space<vmem>>, %arg4: memref<8x1xf32, #tpu.memory_space<vmem>>, %arg5: memref<1x8x136xbf16, #tpu.memory_space<vmem>>) attributes {dimension_semantics = [#tpu.dimension_semantics<parallel>, #tpu.dimension_semantics<parallel>], iteration_bounds = array<i64: 2, 1>, scalar_prefetch = 0 : i64, scratch_operands = 0 : i64, tpu.core_type = #tpu.core_type<tc>, window_params = [{transform_indices = @transform_0, window_bounds = array<i64: 1, 64, 136>}, {pipeline_mode = #tpu.pipeline_mode<synchronous>, transform_indices = @transform_1, window_bounds = array<i64: 8, 64>}, {pipeline_mode = #tpu.pipeline_mode<synchronous>, transform_indices = @transform_2, window_bounds = array<i64: 8, 1>}, {transform_indices = @transform_3, window_bounds = array<i64: 1, 8, 136>}]} {
    %c0 = arith.constant 0 : index
    %c0_0 = arith.constant 0 : index
    %0 = vector.load %arg3[%c0, %c0_0] : memref<8x64xbf16, #tpu.memory_space<vmem>>, vector<8x64xbf16>
    %c0_1 = arith.constant 0 : index
    %c0_2 = arith.constant 0 : index
    %c0_3 = arith.constant 0 : index
    %1 = vector.load %arg2[%c0_1, %c0_2, %c0_3] : memref<1x64x136xbf16, #tpu.memory_space<vmem>>, vector<1x64x136xbf16>
    %2 = vector.shape_cast %1 : vector<1x64x136xbf16> to vector<64x136xbf16>
    %cst = arith.constant dense<0.000000e+00> : vector<8x136xf32>
    %3 = tpu.matmul %0, %2, %cst {dimension_numbers = #tpu.dot_dimension_numbers<[1], [0], [0], [1], [0, 0, 1, 1], [], []>} : vector<8x64xbf16>, vector<64x136xbf16>, vector<8x136xf32> -> vector<8x136xf32>
    %c0_4 = arith.constant 0 : index
    %c0_5 = arith.constant 0 : index
    %4 = vector.load %arg4[%c0_4, %c0_5] : memref<8x1xf32, #tpu.memory_space<vmem>>, vector<8x1xf32>
    %5 = vector.broadcast %4 : vector<8x1xf32> to vector<8x136xf32>
    %6 = arith.addf %3, %5 : vector<8x136xf32>
    %cst_6 = arith.constant 5.000000e-01 : f32
    %7 = vector.broadcast %cst_6 : f32 to vector<8x136xf32>
    %8 = arith.mulf %7, %6 : vector<8x136xf32>
    %cst_7 = arith.constant 4.471500e-02 : f32
    %9 = vector.broadcast %cst_7 : f32 to vector<8x136xf32>
    %10 = arith.mulf %9, %6 : vector<8x136xf32>
    %11 = arith.mulf %10, %6 : vector<8x136xf32>
    %12 = arith.mulf %11, %6 : vector<8x136xf32>
    %13 = arith.addf %6, %12 : vector<8x136xf32>
    %cst_8 = arith.constant 0.797884583 : f32
    %14 = vector.broadcast %cst_8 : f32 to vector<8x136xf32>
    %15 = arith.mulf %14, %13 : vector<8x136xf32>
    %16 = math.tanh %15 : vector<8x136xf32>
    %cst_9 = arith.constant 1.000000e+00 : f32
    %17 = vector.broadcast %cst_9 : f32 to vector<8x136xf32>
    %18 = arith.addf %17, %16 : vector<8x136xf32>
    %19 = arith.mulf %8, %18 : vector<8x136xf32>
    %20 = arith.truncf %19 : vector<8x136xf32> to vector<8x136xbf16>
    %c0_10 = arith.constant 0 : index
    %c0_11 = arith.constant 0 : index
    %c0_12 = arith.constant 0 : index
    %21 = vector.load %arg5[%c0_10, %c0_11, %c0_12] : memref<1x8x136xbf16, #tpu.memory_space<vmem>>, vector<1x8x136xbf16>
    %22 = vector.shape_cast %21 : vector<1x8x136xbf16> to vector<8x136xbf16>
    %23 = vector.shape_cast %20 : vector<8x136xbf16> to vector<1x8x136xbf16>
    tpu.vector_store %arg5[%c0_10, %c0_11, %c0_12], %23 {strides = array<i32>} : memref<1x8x136xbf16, #tpu.memory_space<vmem>>, vector<1x8x136xbf16>,
    return
  }
  func.func @transform_0(%arg0: i32, %arg1: i32) -> (i32, i32, i32) {
    %c0_i32 = arith.constant 0 : i32
    %c0_i32_0 = arith.constant 0 : i32
    return %arg0, %c0_i32, %arg1 : i32, i32, i32
  }
  func.func @transform_1(%arg0: i32, %arg1: i32) -> (i32, i32) {
    %c0_i32 = arith.constant 0 : i32
    %c0_i32_0 = arith.constant 0 : i32
    %c0_i32_1 = arith.constant 0 : i32
    return %c0_i32, %c0_i32_0 : i32, i32
  }
  func.func @transform_2(%arg0: i32, %arg1: i32) -> (i32, i32) {
    %c0_i32 = arith.constant 0 : i32
    %c0_i32_0 = arith.constant 0 : i32
    %c0_i32_1 = arith.constant 0 : i32
    return %c0_i32, %c0_i32_0 : i32, i32
  }
  func.func @transform_3(%arg0: i32, %arg1: i32) -> (i32, i32, i32) {
    %c0_i32 = arith.constant 0 : i32
    %c0_i32_0 = arith.constant 0 : i32
    return %arg0, %c0_i32, %arg1 : i32, i32, i32
  }
}

module attributes {stable_mosaic.version = 11 : i64} {
  func.func @kernel(%arg0: i32, %arg1: i32, %arg2: memref<1x8x136xbf16, #tpu.memory_space<vmem>>, %arg3: memref<8x8xbf16, #tpu.memory_space<vmem>>, %arg4: memref<8x8xbf16, #tpu.memory_space<vmem>>, %arg5: memref<8x1xf32, #tpu.memory_space<vmem>>, %arg6: memref<8x1xf32, #tpu.memory_space<vmem>>, %arg7: memref<8x136xf32, #tpu.memory_space<vmem>>, %arg8: memref<1x8x136xbf16, #tpu.memory_space<vmem>>) attributes {dimension_semantics = [#tpu.dimension_semantics<parallel>, #tpu.dimension_semantics<parallel>], iteration_bounds = array<i64: 2, 1>, scalar_prefetch = 0 : i64, scratch_operands = 0 : i64, tpu.core_type = #tpu.core_type<tc>, window_params = [{transform_indices = @transform_0, window_bounds = array<i64: 1, 8, 136>}, {pipeline_mode = #tpu.pipeline_mode<synchronous>, transform_indices = @transform_1, window_bounds = array<i64: 8, 8>}, {pipeline_mode = #tpu.pipeline_mode<synchronous>, transform_indices = @transform_2, window_bounds = array<i64: 8, 8>}, {pipeline_mode = #tpu.pipeline_mode<synchronous>, transform_indices = @transform_3, window_bounds = array<i64: 8, 1>}, {pipeline_mode = #tpu.pipeline_mode<synchronous>, transform_indices = @transform_4, window_bounds = array<i64: 8, 1>}, {transform_indices = @transform_5, window_bounds = array<i64: 8, 136>}, {transform_indices = @transform_6, window_bounds = array<i64: 1, 8, 136>}]} {
    %c0 = arith.constant 0 : index
    %c0_0 = arith.constant 0 : index
    %c0_1 = arith.constant 0 : index
    %0 = vector.load %arg2[%c0, %c0_0, %c0_1] : memref<1x8x136xbf16, #tpu.memory_space<vmem>>, vector<1x8x136xbf16>
    %1 = vector.shape_cast %0 : vector<1x8x136xbf16> to vector<8x136xbf16>
    %c0_2 = arith.constant 0 : index
    %c0_3 = arith.constant 0 : index
    %2 = vector.load %arg3[%c0_2, %c0_3] : memref<8x8xbf16, #tpu.memory_space<vmem>>, vector<8x8xbf16>
    %cst = arith.constant dense<0.000000e+00> : vector<8x136xf32>
    %3 = tpu.matmul %2, %1, %cst {dimension_numbers = #tpu.dot_dimension_numbers<[1], [0], [0], [1], [0, 0, 1, 1], [], []>} : vector<8x8xbf16>, vector<8x136xbf16>, vector<8x136xf32> -> vector<8x136xf32>
    %c0_4 = arith.constant 0 : index
    %c0_5 = arith.constant 0 : index
    %4 = vector.load %arg5[%c0_4, %c0_5] : memref<8x1xf32, #tpu.memory_space<vmem>>, vector<8x1xf32>
    %5 = vector.broadcast %4 : vector<8x1xf32> to vector<8x136xf32>
    %6 = arith.addf %3, %5 : vector<8x136xf32>
    %c0_6 = arith.constant 0 : index
    %c0_7 = arith.constant 0 : index
    %7 = vector.load %arg4[%c0_6, %c0_7] : memref<8x8xbf16, #tpu.memory_space<vmem>>, vector<8x8xbf16>
    %cst_8 = arith.constant dense<0.000000e+00> : vector<8x136xf32>
    %8 = tpu.matmul %7, %1, %cst_8 {dimension_numbers = #tpu.dot_dimension_numbers<[1], [0], [0], [1], [0, 0, 1, 1], [], []>} : vector<8x8xbf16>, vector<8x136xbf16>, vector<8x136xf32> -> vector<8x136xf32>
    %c0_9 = arith.constant 0 : index
    %c0_10 = arith.constant 0 : index
    %9 = vector.load %arg6[%c0_9, %c0_10] : memref<8x1xf32, #tpu.memory_space<vmem>>, vector<8x1xf32>
    %10 = vector.broadcast %9 : vector<8x1xf32> to vector<8x136xf32>
    %11 = arith.addf %8, %10 : vector<8x136xf32>
    %cst_11 = arith.constant 0.000000e+00 : f32
    %12 = vector.broadcast %cst_11 : f32 to vector<8x136xf32>
    %13 = arith.subf %12, %11 : vector<8x136xf32>
    %14 = math.exp %13 : vector<8x136xf32>
    %cst_12 = arith.constant 1.000000e+00 : f32
    %15 = vector.broadcast %cst_12 : f32 to vector<8x136xf32>
    %16 = arith.addf %15, %14 : vector<8x136xf32>
    %cst_13 = arith.constant 1.000000e+00 : f32
    %17 = vector.broadcast %cst_13 : f32 to vector<8x136xf32>
    %18 = arith.divf %17, %16 : vector<8x136xf32>
    %19 = arith.mulf %6, %18 : vector<8x136xf32>
    %c0_14 = arith.constant 0 : index
    %c0_15 = arith.constant 0 : index
    %20 = vector.load %arg7[%c0_14, %c0_15] : memref<8x136xf32, #tpu.memory_space<vmem>>, vector<8x136xf32>
    %21 = arith.addf %19, %20 : vector<8x136xf32>
    %22 = arith.truncf %21 : vector<8x136xf32> to vector<8x136xbf16>
    %c0_16 = arith.constant 0 : index
    %c0_17 = arith.constant 0 : index
    %c0_18 = arith.constant 0 : index
    %23 = vector.load %arg8[%c0_16, %c0_17, %c0_18] : memref<1x8x136xbf16, #tpu.memory_space<vmem>>, vector<1x8x136xbf16>
    %24 = vector.shape_cast %23 : vector<1x8x136xbf16> to vector<8x136xbf16>
    %25 = vector.shape_cast %22 : vector<8x136xbf16> to vector<1x8x136xbf16>
    tpu.vector_store %arg8[%c0_16, %c0_17, %c0_18], %25 {strides = array<i32>} : memref<1x8x136xbf16, #tpu.memory_space<vmem>>, vector<1x8x136xbf16>,
    return
  }
  func.func @transform_0(%arg0: i32, %arg1: i32) -> (i32, i32, i32) {
    %c0_i32 = arith.constant 0 : i32
    %c0_i32_0 = arith.constant 0 : i32
    return %arg0, %c0_i32, %arg1 : i32, i32, i32
  }
  func.func @transform_1(%arg0: i32, %arg1: i32) -> (i32, i32) {
    %c0_i32 = arith.constant 0 : i32
    %c0_i32_0 = arith.constant 0 : i32
    %c0_i32_1 = arith.constant 0 : i32
    return %c0_i32, %c0_i32_0 : i32, i32
  }
  func.func @transform_2(%arg0: i32, %arg1: i32) -> (i32, i32) {
    %c0_i32 = arith.constant 0 : i32
    %c0_i32_0 = arith.constant 0 : i32
    %c0_i32_1 = arith.constant 0 : i32
    return %c0_i32, %c0_i32_0 : i32, i32
  }
  func.func @transform_3(%arg0: i32, %arg1: i32) -> (i32, i32) {
    %c0_i32 = arith.constant 0 : i32
    %c0_i32_0 = arith.constant 0 : i32
    %c0_i32_1 = arith.constant 0 : i32
    return %c0_i32, %c0_i32_0 : i32, i32
  }
  func.func @transform_4(%arg0: i32, %arg1: i32) -> (i32, i32) {
    %c0_i32 = arith.constant 0 : i32
    %c0_i32_0 = arith.constant 0 : i32
    %c0_i32_1 = arith.constant 0 : i32
    return %c0_i32, %c0_i32_0 : i32, i32
  }
  func.func @transform_5(%arg0: i32, %arg1: i32) -> (i32, i32) {
    %c0_i32 = arith.constant 0 : i32
    %c0_i32_0 = arith.constant 0 : i32
    return %c0_i32, %arg1 : i32, i32
  }
  func.func @transform_6(%arg0: i32, %arg1: i32) -> (i32, i32, i32) {
    %c0_i32 = arith.constant 0 : i32
    %c0_i32_0 = arith.constant 0 : i32
    return %arg0, %c0_i32, %arg1 : i32, i32, i32
  }
}

module attributes {stable_mosaic.version = 11 : i64} {
  func.func @kernel(%arg0: i32, %arg1: i32, %arg2: memref<1x64x68xbf16, #tpu.memory_space<vmem>>, %arg3: memref<16x64xbf16, #tpu.memory_space<vmem>>, %arg4: memref<16x1xf32, #tpu.memory_space<vmem>>, %arg5: memref<1x16x68xbf16, #tpu.memory_space<vmem>>, %arg6: memref<1x16x1xf32, #tpu.memory_space<vmem>>, %arg7: memref<1x16x1xf32, #tpu.memory_space<vmem>>) attributes {dimension_semantics = [#tpu.dimension_semantics<parallel>, #tpu.dimension_semantics<arbitrary>], iteration_bounds = array<i64: 2, 1>, scalar_prefetch = 0 : i64, scratch_operands = 0 : i64, tpu.core_type = #tpu.core_type<tc>, window_params = [{transform_indices = @transform_0, window_bounds = array<i64: 1, 64, 68>}, {pipeline_mode = #tpu.pipeline_mode<synchronous>, transform_indices = @transform_1, window_bounds = array<i64: 16, 64>}, {pipeline_mode = #tpu.pipeline_mode<synchronous>, transform_indices = @transform_2, window_bounds = array<i64: 16, 1>}, {transform_indices = @transform_3, window_bounds = array<i64: 1, 16, 68>}, {transform_indices = @transform_4, window_bounds = array<i64: 1, 16, 1>}, {transform_indices = @transform_5, window_bounds = array<i64: 1, 16, 1>}]} {
    %c0 = arith.constant 0 : index
    %c0_0 = arith.constant 0 : index
    %0 = vector.load %arg3[%c0, %c0_0] : memref<16x64xbf16, #tpu.memory_space<vmem>>, vector<16x64xbf16>
    %c0_1 = arith.constant 0 : index
    %c0_2 = arith.constant 0 : index
    %c0_3 = arith.constant 0 : index
    %1 = vector.load %arg2[%c0_1, %c0_2, %c0_3] : memref<1x64x68xbf16, #tpu.memory_space<vmem>>, vector<1x64x68xbf16>
    %2 = vector.shape_cast %1 : vector<1x64x68xbf16> to vector<64x68xbf16>
    %cst = arith.constant dense<0.000000e+00> : vector<16x68xf32>
    %3 = tpu.matmul %0, %2, %cst {dimension_numbers = #tpu.dot_dimension_numbers<[1], [0], [0], [1], [0, 0, 1, 1], [], []>} : vector<16x64xbf16>, vector<64x68xbf16>, vector<16x68xf32> -> vector<16x68xf32>
    %c0_4 = arith.constant 0 : index
    %c0_5 = arith.constant 0 : index
    %4 = vector.load %arg4[%c0_4, %c0_5] : memref<16x1xf32, #tpu.memory_space<vmem>>, vector<16x1xf32>
    %5 = vector.broadcast %4 : vector<16x1xf32> to vector<16x68xf32>
    %6 = arith.addf %3, %5 : vector<16x68xf32>
    %7 = arith.truncf %6 : vector<16x68xf32> to vector<16x68xbf16>
    %c0_6 = arith.constant 0 : index
    %c0_7 = arith.constant 0 : index
    %c0_8 = arith.constant 0 : index
    %8 = vector.load %arg5[%c0_6, %c0_7, %c0_8] : memref<1x16x68xbf16, #tpu.memory_space<vmem>>, vector<1x16x68xbf16>
    %9 = vector.shape_cast %8 : vector<1x16x68xbf16> to vector<16x68xbf16>
    %10 = vector.shape_cast %7 : vector<16x68xbf16> to vector<1x16x68xbf16>
    tpu.vector_store %arg5[%c0_6, %c0_7, %c0_8], %10 {strides = array<i32>} : memref<1x16x68xbf16, #tpu.memory_space<vmem>>, vector<1x16x68xbf16>,
    %cst_9 = arith.constant dense<0.000000e+00> : vector<16xf32>
    %11 = vector.multi_reduction <add>, %6, %cst_9 [1] : vector<16x68xf32> to vector<16xf32>
    %12 = vector.shape_cast %11 : vector<16xf32> to vector<16x1xf32>
    %13 = arith.mulf %6, %6 : vector<16x68xf32>
    %cst_10 = arith.constant dense<0.000000e+00> : vector<16xf32>
    %14 = vector.multi_reduction <add>, %13, %cst_10 [1] : vector<16x68xf32> to vector<16xf32>
    %15 = vector.shape_cast %14 : vector<16xf32> to vector<16x1xf32>
    %c0_i32 = arith.constant 0 : i32
    %16 = arith.cmpi eq, %arg1, %c0_i32 : i32
    %17 = arith.extui %16 : i1 to i32
    %c0_i32_11 = arith.constant 0 : i32
    %18 = arith.cmpi ne, %17, %c0_i32_11 : i32
    scf.if %18 {
      %c0_14 = arith.constant 0 : index
      %c0_15 = arith.constant 0 : index
      %c0_16 = arith.constant 0 : index
      %22 = vector.load %arg6[%c0_14, %c0_15, %c0_16] : memref<1x16x1xf32, #tpu.memory_space<vmem>>, vector<1x16x1xf32>
      %23 = vector.shape_cast %22 : vector<1x16x1xf32> to vector<16x1xf32>
      %24 = vector.shape_cast %12 : vector<16x1xf32> to vector<1x16x1xf32>
      tpu.vector_store %arg6[%c0_14, %c0_15, %c0_16], %24 {strides = array<i32>} : memref<1x16x1xf32, #tpu.memory_space<vmem>>, vector<1x16x1xf32>,
      %c0_17 = arith.constant 0 : index
      %c0_18 = arith.constant 0 : index
      %c0_19 = arith.constant 0 : index
      %25 = vector.load %arg7[%c0_17, %c0_18, %c0_19] : memref<1x16x1xf32, #tpu.memory_space<vmem>>, vector<1x16x1xf32>
      %26 = vector.shape_cast %25 : vector<1x16x1xf32> to vector<16x1xf32>
      %27 = vector.shape_cast %15 : vector<16x1xf32> to vector<1x16x1xf32>
      tpu.vector_store %arg7[%c0_17, %c0_18, %c0_19], %27 {strides = array<i32>} : memref<1x16x1xf32, #tpu.memory_space<vmem>>, vector<1x16x1xf32>,
    } else {
    }
    %c0_i32_12 = arith.constant 0 : i32
    %19 = arith.cmpi sgt, %arg1, %c0_i32_12 : i32
    %20 = arith.extui %19 : i1 to i32
    %c0_i32_13 = arith.constant 0 : i32
    %21 = arith.cmpi ne, %20, %c0_i32_13 : i32
    scf.if %21 {
      %c0_14 = arith.constant 0 : index
      %c0_15 = arith.constant 0 : index
      %c0_16 = arith.constant 0 : index
      %22 = vector.load %arg6[%c0_14, %c0_15, %c0_16] : memref<1x16x1xf32, #tpu.memory_space<vmem>>, vector<1x16x1xf32>
      %23 = vector.shape_cast %22 : vector<1x16x1xf32> to vector<16x1xf32>
      %24 = arith.addf %23, %12 : vector<16x1xf32>
      %c0_17 = arith.constant 0 : index
      %c0_18 = arith.constant 0 : index
      %c0_19 = arith.constant 0 : index
      %25 = vector.load %arg6[%c0_17, %c0_18, %c0_19] : memref<1x16x1xf32, #tpu.memory_space<vmem>>, vector<1x16x1xf32>
      %26 = vector.shape_cast %25 : vector<1x16x1xf32> to vector<16x1xf32>
      %27 = vector.shape_cast %24 : vector<16x1xf32> to vector<1x16x1xf32>
      tpu.vector_store %arg6[%c0_17, %c0_18, %c0_19], %27 {strides = array<i32>} : memref<1x16x1xf32, #tpu.memory_space<vmem>>, vector<1x16x1xf32>,
      %c0_20 = arith.constant 0 : index
      %c0_21 = arith.constant 0 : index
      %c0_22 = arith.constant 0 : index
      %28 = vector.load %arg7[%c0_20, %c0_21, %c0_22] : memref<1x16x1xf32, #tpu.memory_space<vmem>>, vector<1x16x1xf32>
      %29 = vector.shape_cast %28 : vector<1x16x1xf32> to vector<16x1xf32>
      %30 = arith.addf %29, %15 : vector<16x1xf32>
      %c0_23 = arith.constant 0 : index
      %c0_24 = arith.constant 0 : index
      %c0_25 = arith.constant 0 : index
      %31 = vector.load %arg7[%c0_23, %c0_24, %c0_25] : memref<1x16x1xf32, #tpu.memory_space<vmem>>, vector<1x16x1xf32>
      %32 = vector.shape_cast %31 : vector<1x16x1xf32> to vector<16x1xf32>
      %33 = vector.shape_cast %30 : vector<16x1xf32> to vector<1x16x1xf32>
      tpu.vector_store %arg7[%c0_23, %c0_24, %c0_25], %33 {strides = array<i32>} : memref<1x16x1xf32, #tpu.memory_space<vmem>>, vector<1x16x1xf32>,
    } else {
    }
    return
  }
  func.func @transform_0(%arg0: i32, %arg1: i32) -> (i32, i32, i32) {
    %c0_i32 = arith.constant 0 : i32
    %c0_i32_0 = arith.constant 0 : i32
    return %arg0, %c0_i32, %arg1 : i32, i32, i32
  }
  func.func @transform_1(%arg0: i32, %arg1: i32) -> (i32, i32) {
    %c0_i32 = arith.constant 0 : i32
    %c0_i32_0 = arith.constant 0 : i32
    %c0_i32_1 = arith.constant 0 : i32
    return %c0_i32, %c0_i32_0 : i32, i32
  }
  func.func @transform_2(%arg0: i32, %arg1: i32) -> (i32, i32) {
    %c0_i32 = arith.constant 0 : i32
    %c0_i32_0 = arith.constant 0 : i32
    %c0_i32_1 = arith.constant 0 : i32
    return %c0_i32, %c0_i32_0 : i32, i32
  }
  func.func @transform_3(%arg0: i32, %arg1: i32) -> (i32, i32, i32) {
    %c0_i32 = arith.constant 0 : i32
    %c0_i32_0 = arith.constant 0 : i32
    return %arg0, %c0_i32, %arg1 : i32, i32, i32
  }
  func.func @transform_4(%arg0: i32, %arg1: i32) -> (i32, i32, i32) {
    %c0_i32 = arith.constant 0 : i32
    %c0_i32_0 = arith.constant 0 : i32
    %c0_i32_1 = arith.constant 0 : i32
    return %arg0, %c0_i32, %c0_i32_0 : i32, i32, i32
  }
  func.func @transform_5(%arg0: i32, %arg1: i32) -> (i32, i32, i32) {
    %c0_i32 = arith.constant 0 : i32
    %c0_i32_0 = arith.constant 0 : i32
    %c0_i32_1 = arith.constant 0 : i32
    return %arg0, %c0_i32, %c0_i32_0 : i32, i32, i32
  }
}

module attributes {stable_mosaic.version = 11 : i64} {
  func.func @kernel(%arg0: i32, %arg1: i32, %arg2: memref<1x16x68xbf16, #tpu.memory_space<vmem>>, %arg3: memref<32x16xbf16, #tpu.memory_space<vmem>>, %arg4: memref<32x1xf32, #tpu.memory_space<vmem>>, %arg5: memref<1x32x68xbf16, #tpu.memory_space<vmem>>, %arg6: memref<1x32x1xf32, #tpu.memory_space<vmem>>, %arg7: memref<1x32x1xf32, #tpu.memory_space<vmem>>) attributes {dimension_semantics = [#tpu.dimension_semantics<parallel>, #tpu.dimension_semantics<arbitrary>], iteration_bounds = array<i64: 2, 1>, scalar_prefetch = 0 : i64, scratch_operands = 0 : i64, tpu.core_type = #tpu.core_type<tc>, window_params = [{transform_indices = @transform_0, window_bounds = array<i64: 1, 16, 68>}, {pipeline_mode = #tpu.pipeline_mode<synchronous>, transform_indices = @transform_1, window_bounds = array<i64: 32, 16>}, {pipeline_mode = #tpu.pipeline_mode<synchronous>, transform_indices = @transform_2, window_bounds = array<i64: 32, 1>}, {transform_indices = @transform_3, window_bounds = array<i64: 1, 32, 68>}, {transform_indices = @transform_4, window_bounds = array<i64: 1, 32, 1>}, {transform_indices = @transform_5, window_bounds = array<i64: 1, 32, 1>}]} {
    %c0 = arith.constant 0 : index
    %c0_0 = arith.constant 0 : index
    %0 = vector.load %arg3[%c0, %c0_0] : memref<32x16xbf16, #tpu.memory_space<vmem>>, vector<32x16xbf16>
    %c0_1 = arith.constant 0 : index
    %c0_2 = arith.constant 0 : index
    %c0_3 = arith.constant 0 : index
    %1 = vector.load %arg2[%c0_1, %c0_2, %c0_3] : memref<1x16x68xbf16, #tpu.memory_space<vmem>>, vector<1x16x68xbf16>
    %2 = vector.shape_cast %1 : vector<1x16x68xbf16> to vector<16x68xbf16>
    %cst = arith.constant dense<0.000000e+00> : vector<32x68xf32>
    %3 = tpu.matmul %0, %2, %cst {dimension_numbers = #tpu.dot_dimension_numbers<[1], [0], [0], [1], [0, 0, 1, 1], [], []>} : vector<32x16xbf16>, vector<16x68xbf16>, vector<32x68xf32> -> vector<32x68xf32>
    %c0_4 = arith.constant 0 : index
    %c0_5 = arith.constant 0 : index
    %4 = vector.load %arg4[%c0_4, %c0_5] : memref<32x1xf32, #tpu.memory_space<vmem>>, vector<32x1xf32>
    %5 = vector.broadcast %4 : vector<32x1xf32> to vector<32x68xf32>
    %6 = arith.addf %3, %5 : vector<32x68xf32>
    %7 = arith.truncf %6 : vector<32x68xf32> to vector<32x68xbf16>
    %c0_6 = arith.constant 0 : index
    %c0_7 = arith.constant 0 : index
    %c0_8 = arith.constant 0 : index
    %8 = vector.load %arg5[%c0_6, %c0_7, %c0_8] : memref<1x32x68xbf16, #tpu.memory_space<vmem>>, vector<1x32x68xbf16>
    %9 = vector.shape_cast %8 : vector<1x32x68xbf16> to vector<32x68xbf16>
    %10 = vector.shape_cast %7 : vector<32x68xbf16> to vector<1x32x68xbf16>
    tpu.vector_store %arg5[%c0_6, %c0_7, %c0_8], %10 {strides = array<i32>} : memref<1x32x68xbf16, #tpu.memory_space<vmem>>, vector<1x32x68xbf16>,
    %cst_9 = arith.constant dense<0.000000e+00> : vector<32xf32>
    %11 = vector.multi_reduction <add>, %6, %cst_9 [1] : vector<32x68xf32> to vector<32xf32>
    %12 = vector.shape_cast %11 : vector<32xf32> to vector<32x1xf32>
    %13 = arith.mulf %6, %6 : vector<32x68xf32>
    %cst_10 = arith.constant dense<0.000000e+00> : vector<32xf32>
    %14 = vector.multi_reduction <add>, %13, %cst_10 [1] : vector<32x68xf32> to vector<32xf32>
    %15 = vector.shape_cast %14 : vector<32xf32> to vector<32x1xf32>
    %c0_i32 = arith.constant 0 : i32
    %16 = arith.cmpi eq, %arg1, %c0_i32 : i32
    %17 = arith.extui %16 : i1 to i32
    %c0_i32_11 = arith.constant 0 : i32
    %18 = arith.cmpi ne, %17, %c0_i32_11 : i32
    scf.if %18 {
      %c0_14 = arith.constant 0 : index
      %c0_15 = arith.constant 0 : index
      %c0_16 = arith.constant 0 : index
      %22 = vector.load %arg6[%c0_14, %c0_15, %c0_16] : memref<1x32x1xf32, #tpu.memory_space<vmem>>, vector<1x32x1xf32>
      %23 = vector.shape_cast %22 : vector<1x32x1xf32> to vector<32x1xf32>
      %24 = vector.shape_cast %12 : vector<32x1xf32> to vector<1x32x1xf32>
      tpu.vector_store %arg6[%c0_14, %c0_15, %c0_16], %24 {strides = array<i32>} : memref<1x32x1xf32, #tpu.memory_space<vmem>>, vector<1x32x1xf32>,
      %c0_17 = arith.constant 0 : index
      %c0_18 = arith.constant 0 : index
      %c0_19 = arith.constant 0 : index
      %25 = vector.load %arg7[%c0_17, %c0_18, %c0_19] : memref<1x32x1xf32, #tpu.memory_space<vmem>>, vector<1x32x1xf32>
      %26 = vector.shape_cast %25 : vector<1x32x1xf32> to vector<32x1xf32>
      %27 = vector.shape_cast %15 : vector<32x1xf32> to vector<1x32x1xf32>
      tpu.vector_store %arg7[%c0_17, %c0_18, %c0_19], %27 {strides = array<i32>} : memref<1x32x1xf32, #tpu.memory_space<vmem>>, vector<1x32x1xf32>,
    } else {
    }
    %c0_i32_12 = arith.constant 0 : i32
    %19 = arith.cmpi sgt, %arg1, %c0_i32_12 : i32
    %20 = arith.extui %19 : i1 to i32
    %c0_i32_13 = arith.constant 0 : i32
    %21 = arith.cmpi ne, %20, %c0_i32_13 : i32
    scf.if %21 {
      %c0_14 = arith.constant 0 : index
      %c0_15 = arith.constant 0 : index
      %c0_16 = arith.constant 0 : index
      %22 = vector.load %arg6[%c0_14, %c0_15, %c0_16] : memref<1x32x1xf32, #tpu.memory_space<vmem>>, vector<1x32x1xf32>
      %23 = vector.shape_cast %22 : vector<1x32x1xf32> to vector<32x1xf32>
      %24 = arith.addf %23, %12 : vector<32x1xf32>
      %c0_17 = arith.constant 0 : index
      %c0_18 = arith.constant 0 : index
      %c0_19 = arith.constant 0 : index
      %25 = vector.load %arg6[%c0_17, %c0_18, %c0_19] : memref<1x32x1xf32, #tpu.memory_space<vmem>>, vector<1x32x1xf32>
      %26 = vector.shape_cast %25 : vector<1x32x1xf32> to vector<32x1xf32>
      %27 = vector.shape_cast %24 : vector<32x1xf32> to vector<1x32x1xf32>
      tpu.vector_store %arg6[%c0_17, %c0_18, %c0_19], %27 {strides = array<i32>} : memref<1x32x1xf32, #tpu.memory_space<vmem>>, vector<1x32x1xf32>,
      %c0_20 = arith.constant 0 : index
      %c0_21 = arith.constant 0 : index
      %c0_22 = arith.constant 0 : index
      %28 = vector.load %arg7[%c0_20, %c0_21, %c0_22] : memref<1x32x1xf32, #tpu.memory_space<vmem>>, vector<1x32x1xf32>
      %29 = vector.shape_cast %28 : vector<1x32x1xf32> to vector<32x1xf32>
      %30 = arith.addf %29, %15 : vector<32x1xf32>
      %c0_23 = arith.constant 0 : index
      %c0_24 = arith.constant 0 : index
      %c0_25 = arith.constant 0 : index
      %31 = vector.load %arg7[%c0_23, %c0_24, %c0_25] : memref<1x32x1xf32, #tpu.memory_space<vmem>>, vector<1x32x1xf32>
      %32 = vector.shape_cast %31 : vector<1x32x1xf32> to vector<32x1xf32>
      %33 = vector.shape_cast %30 : vector<32x1xf32> to vector<1x32x1xf32>
      tpu.vector_store %arg7[%c0_23, %c0_24, %c0_25], %33 {strides = array<i32>} : memref<1x32x1xf32, #tpu.memory_space<vmem>>, vector<1x32x1xf32>,
    } else {
    }
    return
  }
  func.func @transform_0(%arg0: i32, %arg1: i32) -> (i32, i32, i32) {
    %c0_i32 = arith.constant 0 : i32
    %c0_i32_0 = arith.constant 0 : i32
    return %arg0, %c0_i32, %arg1 : i32, i32, i32
  }
  func.func @transform_1(%arg0: i32, %arg1: i32) -> (i32, i32) {
    %c0_i32 = arith.constant 0 : i32
    %c0_i32_0 = arith.constant 0 : i32
    %c0_i32_1 = arith.constant 0 : i32
    return %c0_i32, %c0_i32_0 : i32, i32
  }
  func.func @transform_2(%arg0: i32, %arg1: i32) -> (i32, i32) {
    %c0_i32 = arith.constant 0 : i32
    %c0_i32_0 = arith.constant 0 : i32
    %c0_i32_1 = arith.constant 0 : i32
    return %c0_i32, %c0_i32_0 : i32, i32
  }
  func.func @transform_3(%arg0: i32, %arg1: i32) -> (i32, i32, i32) {
    %c0_i32 = arith.constant 0 : i32
    %c0_i32_0 = arith.constant 0 : i32
    return %arg0, %c0_i32, %arg1 : i32, i32, i32
  }
  func.func @transform_4(%arg0: i32, %arg1: i32) -> (i32, i32, i32) {
    %c0_i32 = arith.constant 0 : i32
    %c0_i32_0 = arith.constant 0 : i32
    %c0_i32_1 = arith.constant 0 : i32
    return %arg0, %c0_i32, %c0_i32_0 : i32, i32, i32
  }
  func.func @transform_5(%arg0: i32, %arg1: i32) -> (i32, i32, i32) {
    %c0_i32 = arith.constant 0 : i32
    %c0_i32_0 = arith.constant 0 : i32
    %c0_i32_1 = arith.constant 0 : i32
    return %arg0, %c0_i32, %c0_i32_0 : i32, i32, i32
  }
}

module attributes {stable_mosaic.version = 11 : i64} {
  func.func @kernel(%arg0: i32, %arg1: i32, %arg2: memref<1x16x68xbf16, #tpu.memory_space<vmem>>, %arg3: memref<1x16x1xf32, #tpu.memory_space<vmem>>, %arg4: memref<1x16x1xf32, #tpu.memory_space<vmem>>, %arg5: memref<1x16x68xbf16, #tpu.memory_space<vmem>>) attributes {dimension_semantics = [#tpu.dimension_semantics<parallel>, #tpu.dimension_semantics<parallel>], iteration_bounds = array<i64: 2, 1>, scalar_prefetch = 0 : i64, scratch_operands = 0 : i64, tpu.core_type = #tpu.core_type<tc>, window_params = [{transform_indices = @transform_0, window_bounds = array<i64: 1, 16, 68>}, {transform_indices = @transform_1, window_bounds = array<i64: 1, 16, 1>}, {transform_indices = @transform_2, window_bounds = array<i64: 1, 16, 1>}, {transform_indices = @transform_3, window_bounds = array<i64: 1, 16, 68>}]} {
    %c0 = arith.constant 0 : index
    %c0_0 = arith.constant 0 : index
    %c0_1 = arith.constant 0 : index
    %0 = vector.load %arg2[%c0, %c0_0, %c0_1] : memref<1x16x68xbf16, #tpu.memory_space<vmem>>, vector<1x16x68xbf16>
    %1 = vector.shape_cast %0 : vector<1x16x68xbf16> to vector<16x68xbf16>
    %2 = arith.extf %1 : vector<16x68xbf16> to vector<16x68xf32>
    %c0_2 = arith.constant 0 : index
    %c0_3 = arith.constant 0 : index
    %c0_4 = arith.constant 0 : index
    %3 = vector.load %arg3[%c0_2, %c0_3, %c0_4] : memref<1x16x1xf32, #tpu.memory_space<vmem>>, vector<1x16x1xf32>
    %4 = vector.shape_cast %3 : vector<1x16x1xf32> to vector<16x1xf32>
    %5 = vector.broadcast %4 : vector<16x1xf32> to vector<16x68xf32>
    %6 = arith.mulf %2, %5 : vector<16x68xf32>
    %c0_5 = arith.constant 0 : index
    %c0_6 = arith.constant 0 : index
    %c0_7 = arith.constant 0 : index
    %7 = vector.load %arg4[%c0_5, %c0_6, %c0_7] : memref<1x16x1xf32, #tpu.memory_space<vmem>>, vector<1x16x1xf32>
    %8 = vector.shape_cast %7 : vector<1x16x1xf32> to vector<16x1xf32>
    %9 = vector.broadcast %8 : vector<16x1xf32> to vector<16x68xf32>
    %10 = arith.addf %6, %9 : vector<16x68xf32>
    %cst = arith.constant 5.000000e-01 : f32
    %11 = vector.broadcast %cst : f32 to vector<16x68xf32>
    %12 = arith.mulf %11, %10 : vector<16x68xf32>
    %cst_8 = arith.constant 4.471500e-02 : f32
    %13 = vector.broadcast %cst_8 : f32 to vector<16x68xf32>
    %14 = arith.mulf %13, %10 : vector<16x68xf32>
    %15 = arith.mulf %14, %10 : vector<16x68xf32>
    %16 = arith.mulf %15, %10 : vector<16x68xf32>
    %17 = arith.addf %10, %16 : vector<16x68xf32>
    %cst_9 = arith.constant 0.797884583 : f32
    %18 = vector.broadcast %cst_9 : f32 to vector<16x68xf32>
    %19 = arith.mulf %18, %17 : vector<16x68xf32>
    %20 = math.tanh %19 : vector<16x68xf32>
    %cst_10 = arith.constant 1.000000e+00 : f32
    %21 = vector.broadcast %cst_10 : f32 to vector<16x68xf32>
    %22 = arith.addf %21, %20 : vector<16x68xf32>
    %23 = arith.mulf %12, %22 : vector<16x68xf32>
    %24 = arith.truncf %23 : vector<16x68xf32> to vector<16x68xbf16>
    %c0_11 = arith.constant 0 : index
    %c0_12 = arith.constant 0 : index
    %c0_13 = arith.constant 0 : index
    %25 = vector.load %arg5[%c0_11, %c0_12, %c0_13] : memref<1x16x68xbf16, #tpu.memory_space<vmem>>, vector<1x16x68xbf16>
    %26 = vector.shape_cast %25 : vector<1x16x68xbf16> to vector<16x68xbf16>
    %27 = vector.shape_cast %24 : vector<16x68xbf16> to vector<1x16x68xbf16>
    tpu.vector_store %arg5[%c0_11, %c0_12, %c0_13], %27 {strides = array<i32>} : memref<1x16x68xbf16, #tpu.memory_space<vmem>>, vector<1x16x68xbf16>,
    return
  }
  func.func @transform_0(%arg0: i32, %arg1: i32) -> (i32, i32, i32) {
    %c0_i32 = arith.constant 0 : i32
    %c0_i32_0 = arith.constant 0 : i32
    return %arg0, %c0_i32, %arg1 : i32, i32, i32
  }
  func.func @transform_1(%arg0: i32, %arg1: i32) -> (i32, i32, i32) {
    %c0_i32 = arith.constant 0 : i32
    %c0_i32_0 = arith.constant 0 : i32
    %c0_i32_1 = arith.constant 0 : i32
    return %arg0, %c0_i32, %c0_i32_0 : i32, i32, i32
  }
  func.func @transform_2(%arg0: i32, %arg1: i32) -> (i32, i32, i32) {
    %c0_i32 = arith.constant 0 : i32
    %c0_i32_0 = arith.constant 0 : i32
    %c0_i32_1 = arith.constant 0 : i32
    return %arg0, %c0_i32, %c0_i32_0 : i32, i32, i32
  }
  func.func @transform_3(%arg0: i32, %arg1: i32) -> (i32, i32, i32) {
    %c0_i32 = arith.constant 0 : i32
    %c0_i32_0 = arith.constant 0 : i32
    return %arg0, %c0_i32, %arg1 : i32, i32, i32
  }
}

module attributes {stable_mosaic.version = 11 : i64} {
  func.func @kernel(%arg0: i32, %arg1: i32, %arg2: memref<1x32x68xbf16, #tpu.memory_space<vmem>>, %arg3: memref<1x32x1xf32, #tpu.memory_space<vmem>>, %arg4: memref<1x32x1xf32, #tpu.memory_space<vmem>>, %arg5: memref<1x16x68xbf16, #tpu.memory_space<vmem>>) attributes {dimension_semantics = [#tpu.dimension_semantics<parallel>, #tpu.dimension_semantics<parallel>], iteration_bounds = array<i64: 2, 1>, scalar_prefetch = 0 : i64, scratch_operands = 0 : i64, tpu.core_type = #tpu.core_type<tc>, window_params = [{transform_indices = @transform_0, window_bounds = array<i64: 1, 32, 68>}, {transform_indices = @transform_1, window_bounds = array<i64: 1, 32, 1>}, {transform_indices = @transform_2, window_bounds = array<i64: 1, 32, 1>}, {transform_indices = @transform_3, window_bounds = array<i64: 1, 16, 68>}]} {
    %c0 = arith.constant 0 : index
    %c0_0 = arith.constant 0 : index
    %c0_1 = arith.constant 0 : index
    %0 = vector.load %arg2[%c0, %c0_0, %c0_1] : memref<1x32x68xbf16, #tpu.memory_space<vmem>>, vector<1x32x68xbf16>
    %1 = vector.shape_cast %0 : vector<1x32x68xbf16> to vector<32x68xbf16>
    %2 = arith.extf %1 : vector<32x68xbf16> to vector<32x68xf32>
    %c0_2 = arith.constant 0 : index
    %c0_3 = arith.constant 0 : index
    %c0_4 = arith.constant 0 : index
    %3 = vector.load %arg3[%c0_2, %c0_3, %c0_4] : memref<1x32x1xf32, #tpu.memory_space<vmem>>, vector<1x32x1xf32>
    %4 = vector.shape_cast %3 : vector<1x32x1xf32> to vector<32x1xf32>
    %5 = vector.broadcast %4 : vector<32x1xf32> to vector<32x68xf32>
    %6 = arith.mulf %2, %5 : vector<32x68xf32>
    %c0_5 = arith.constant 0 : index
    %c0_6 = arith.constant 0 : index
    %c0_7 = arith.constant 0 : index
    %7 = vector.load %arg4[%c0_5, %c0_6, %c0_7] : memref<1x32x1xf32, #tpu.memory_space<vmem>>, vector<1x32x1xf32>
    %8 = vector.shape_cast %7 : vector<1x32x1xf32> to vector<32x1xf32>
    %9 = vector.broadcast %8 : vector<32x1xf32> to vector<32x68xf32>
    %10 = arith.addf %6, %9 : vector<32x68xf32>
    %11 = vector.extract_strided_slice %10 {offsets = [0, 0], sizes = [16, 68], strides = [1, 1]} : vector<32x68xf32> to vector<16x68xf32>
    %12 = vector.extract_strided_slice %10 {offsets = [16, 0], sizes = [16, 68], strides = [1, 1]} : vector<32x68xf32> to vector<16x68xf32>
    %cst = arith.constant 0.000000e+00 : f32
    %13 = vector.broadcast %cst : f32 to vector<16x68xf32>
    %14 = arith.subf %13, %12 : vector<16x68xf32>
    %15 = math.exp %14 : vector<16x68xf32>
    %cst_8 = arith.constant 1.000000e+00 : f32
    %16 = vector.broadcast %cst_8 : f32 to vector<16x68xf32>
    %17 = arith.addf %16, %15 : vector<16x68xf32>
    %cst_9 = arith.constant 1.000000e+00 : f32
    %18 = vector.broadcast %cst_9 : f32 to vector<16x68xf32>
    %19 = arith.divf %18, %17 : vector<16x68xf32>
    %20 = arith.mulf %11, %19 : vector<16x68xf32>
    %21 = arith.truncf %20 : vector<16x68xf32> to vector<16x68xbf16>
    %c0_10 = arith.constant 0 : index
    %c0_11 = arith.constant 0 : index
    %c0_12 = arith.constant 0 : index
    %22 = vector.load %arg5[%c0_10, %c0_11, %c0_12] : memref<1x16x68xbf16, #tpu.memory_space<vmem>>, vector<1x16x68xbf16>
    %23 = vector.shape_cast %22 : vector<1x16x68xbf16> to vector<16x68xbf16>
    %24 = vector.shape_cast %21 : vector<16x68xbf16> to vector<1x16x68xbf16>
    tpu.vector_store %arg5[%c0_10, %c0_11, %c0_12], %24 {strides = array<i32>} : memref<1x16x68xbf16, #tpu.memory_space<vmem>>, vector<1x16x68xbf16>,
    return
  }
  func.func @transform_0(%arg0: i32, %arg1: i32) -> (i32, i32, i32) {
    %c0_i32 = arith.constant 0 : i32
    %c0_i32_0 = arith.constant 0 : i32
    return %arg0, %c0_i32, %arg1 : i32, i32, i32
  }
  func.func @transform_1(%arg0: i32, %arg1: i32) -> (i32, i32, i32) {
    %c0_i32 = arith.constant 0 : i32
    %c0_i32_0 = arith.constant 0 : i32
    %c0_i32_1 = arith.constant 0 : i32
    return %arg0, %c0_i32, %c0_i32_0 : i32, i32, i32
  }
  func.func @transform_2(%arg0: i32, %arg1: i32) -> (i32, i32, i32) {
    %c0_i32 = arith.constant 0 : i32
    %c0_i32_0 = arith.constant 0 : i32
    %c0_i32_1 = arith.constant 0 : i32
    return %arg0, %c0_i32, %c0_i32_0 : i32, i32, i32
  }
  func.func @transform_3(%arg0: i32, %arg1: i32) -> (i32, i32, i32) {
    %c0_i32 = arith.constant 0 : i32
    %c0_i32_0 = arith.constant 0 : i32
    return %arg0, %c0_i32, %arg1 : i32, i32, i32
  }
}

module attributes {stable_mosaic.version = 11 : i64} {
  func.func @kernel(%arg0: i32, %arg1: i32, %arg2: memref<1x288x68xbf16, #tpu.memory_space<vmem>>, %arg3: memref<64x288xbf16, #tpu.memory_space<vmem>>, %arg4: memref<64x1xf32, #tpu.memory_space<vmem>>, %arg5: memref<1x64x68xbf16, #tpu.memory_space<vmem>>, %arg6: memref<1x64x1xf32, #tpu.memory_space<vmem>>, %arg7: memref<1x64x1xf32, #tpu.memory_space<vmem>>) attributes {dimension_semantics = [#tpu.dimension_semantics<parallel>, #tpu.dimension_semantics<arbitrary>], iteration_bounds = array<i64: 2, 1>, scalar_prefetch = 0 : i64, scratch_operands = 0 : i64, tpu.core_type = #tpu.core_type<tc>, window_params = [{transform_indices = @transform_0, window_bounds = array<i64: 1, 288, 68>}, {pipeline_mode = #tpu.pipeline_mode<synchronous>, transform_indices = @transform_1, window_bounds = array<i64: 64, 288>}, {pipeline_mode = #tpu.pipeline_mode<synchronous>, transform_indices = @transform_2, window_bounds = array<i64: 64, 1>}, {transform_indices = @transform_3, window_bounds = array<i64: 1, 64, 68>}, {transform_indices = @transform_4, window_bounds = array<i64: 1, 64, 1>}, {transform_indices = @transform_5, window_bounds = array<i64: 1, 64, 1>}]} {
    %c0 = arith.constant 0 : index
    %c0_0 = arith.constant 0 : index
    %0 = vector.load %arg3[%c0, %c0_0] : memref<64x288xbf16, #tpu.memory_space<vmem>>, vector<64x288xbf16>
    %c0_1 = arith.constant 0 : index
    %c0_2 = arith.constant 0 : index
    %c0_3 = arith.constant 0 : index
    %1 = vector.load %arg2[%c0_1, %c0_2, %c0_3] : memref<1x288x68xbf16, #tpu.memory_space<vmem>>, vector<1x288x68xbf16>
    %2 = vector.shape_cast %1 : vector<1x288x68xbf16> to vector<288x68xbf16>
    %cst = arith.constant dense<0.000000e+00> : vector<64x68xf32>
    %3 = tpu.matmul %0, %2, %cst {dimension_numbers = #tpu.dot_dimension_numbers<[1], [0], [0], [1], [0, 0, 1, 1], [], []>} : vector<64x288xbf16>, vector<288x68xbf16>, vector<64x68xf32> -> vector<64x68xf32>
    %c0_4 = arith.constant 0 : index
    %c0_5 = arith.constant 0 : index
    %4 = vector.load %arg4[%c0_4, %c0_5] : memref<64x1xf32, #tpu.memory_space<vmem>>, vector<64x1xf32>
    %5 = vector.broadcast %4 : vector<64x1xf32> to vector<64x68xf32>
    %6 = arith.addf %3, %5 : vector<64x68xf32>
    %7 = arith.truncf %6 : vector<64x68xf32> to vector<64x68xbf16>
    %c0_6 = arith.constant 0 : index
    %c0_7 = arith.constant 0 : index
    %c0_8 = arith.constant 0 : index
    %8 = vector.load %arg5[%c0_6, %c0_7, %c0_8] : memref<1x64x68xbf16, #tpu.memory_space<vmem>>, vector<1x64x68xbf16>
    %9 = vector.shape_cast %8 : vector<1x64x68xbf16> to vector<64x68xbf16>
    %10 = vector.shape_cast %7 : vector<64x68xbf16> to vector<1x64x68xbf16>
    tpu.vector_store %arg5[%c0_6, %c0_7, %c0_8], %10 {strides = array<i32>} : memref<1x64x68xbf16, #tpu.memory_space<vmem>>, vector<1x64x68xbf16>,
    %cst_9 = arith.constant dense<0.000000e+00> : vector<64xf32>
    %11 = vector.multi_reduction <add>, %6, %cst_9 [1] : vector<64x68xf32> to vector<64xf32>
    %12 = vector.shape_cast %11 : vector<64xf32> to vector<64x1xf32>
    %13 = arith.mulf %6, %6 : vector<64x68xf32>
    %cst_10 = arith.constant dense<0.000000e+00> : vector<64xf32>
    %14 = vector.multi_reduction <add>, %13, %cst_10 [1] : vector<64x68xf32> to vector<64xf32>
    %15 = vector.shape_cast %14 : vector<64xf32> to vector<64x1xf32>
    %c0_i32 = arith.constant 0 : i32
    %16 = arith.cmpi eq, %arg1, %c0_i32 : i32
    %17 = arith.extui %16 : i1 to i32
    %c0_i32_11 = arith.constant 0 : i32
    %18 = arith.cmpi ne, %17, %c0_i32_11 : i32
    scf.if %18 {
      %c0_14 = arith.constant 0 : index
      %c0_15 = arith.constant 0 : index
      %c0_16 = arith.constant 0 : index
      %22 = vector.load %arg6[%c0_14, %c0_15, %c0_16] : memref<1x64x1xf32, #tpu.memory_space<vmem>>, vector<1x64x1xf32>
      %23 = vector.shape_cast %22 : vector<1x64x1xf32> to vector<64x1xf32>
      %24 = vector.shape_cast %12 : vector<64x1xf32> to vector<1x64x1xf32>
      tpu.vector_store %arg6[%c0_14, %c0_15, %c0_16], %24 {strides = array<i32>} : memref<1x64x1xf32, #tpu.memory_space<vmem>>, vector<1x64x1xf32>,
      %c0_17 = arith.constant 0 : index
      %c0_18 = arith.constant 0 : index
      %c0_19 = arith.constant 0 : index
      %25 = vector.load %arg7[%c0_17, %c0_18, %c0_19] : memref<1x64x1xf32, #tpu.memory_space<vmem>>, vector<1x64x1xf32>
      %26 = vector.shape_cast %25 : vector<1x64x1xf32> to vector<64x1xf32>
      %27 = vector.shape_cast %15 : vector<64x1xf32> to vector<1x64x1xf32>
      tpu.vector_store %arg7[%c0_17, %c0_18, %c0_19], %27 {strides = array<i32>} : memref<1x64x1xf32, #tpu.memory_space<vmem>>, vector<1x64x1xf32>,
    } else {
    }
    %c0_i32_12 = arith.constant 0 : i32
    %19 = arith.cmpi sgt, %arg1, %c0_i32_12 : i32
    %20 = arith.extui %19 : i1 to i32
    %c0_i32_13 = arith.constant 0 : i32
    %21 = arith.cmpi ne, %20, %c0_i32_13 : i32
    scf.if %21 {
      %c0_14 = arith.constant 0 : index
      %c0_15 = arith.constant 0 : index
      %c0_16 = arith.constant 0 : index
      %22 = vector.load %arg6[%c0_14, %c0_15, %c0_16] : memref<1x64x1xf32, #tpu.memory_space<vmem>>, vector<1x64x1xf32>
      %23 = vector.shape_cast %22 : vector<1x64x1xf32> to vector<64x1xf32>
      %24 = arith.addf %23, %12 : vector<64x1xf32>
      %c0_17 = arith.constant 0 : index
      %c0_18 = arith.constant 0 : index
      %c0_19 = arith.constant 0 : index
      %25 = vector.load %arg6[%c0_17, %c0_18, %c0_19] : memref<1x64x1xf32, #tpu.memory_space<vmem>>, vector<1x64x1xf32>
      %26 = vector.shape_cast %25 : vector<1x64x1xf32> to vector<64x1xf32>
      %27 = vector.shape_cast %24 : vector<64x1xf32> to vector<1x64x1xf32>
      tpu.vector_store %arg6[%c0_17, %c0_18, %c0_19], %27 {strides = array<i32>} : memref<1x64x1xf32, #tpu.memory_space<vmem>>, vector<1x64x1xf32>,
      %c0_20 = arith.constant 0 : index
      %c0_21 = arith.constant 0 : index
      %c0_22 = arith.constant 0 : index
      %28 = vector.load %arg7[%c0_20, %c0_21, %c0_22] : memref<1x64x1xf32, #tpu.memory_space<vmem>>, vector<1x64x1xf32>
      %29 = vector.shape_cast %28 : vector<1x64x1xf32> to vector<64x1xf32>
      %30 = arith.addf %29, %15 : vector<64x1xf32>
      %c0_23 = arith.constant 0 : index
      %c0_24 = arith.constant 0 : index
      %c0_25 = arith.constant 0 : index
      %31 = vector.load %arg7[%c0_23, %c0_24, %c0_25] : memref<1x64x1xf32, #tpu.memory_space<vmem>>, vector<1x64x1xf32>
      %32 = vector.shape_cast %31 : vector<1x64x1xf32> to vector<64x1xf32>
      %33 = vector.shape_cast %30 : vector<64x1xf32> to vector<1x64x1xf32>
      tpu.vector_store %arg7[%c0_23, %c0_24, %c0_25], %33 {strides = array<i32>} : memref<1x64x1xf32, #tpu.memory_space<vmem>>, vector<1x64x1xf32>,
    } else {
    }
    return
  }
  func.func @transform_0(%arg0: i32, %arg1: i32) -> (i32, i32, i32) {
    %c0_i32 = arith.constant 0 : i32
    %c0_i32_0 = arith.constant 0 : i32
    return %arg0, %c0_i32, %arg1 : i32, i32, i32
  }
  func.func @transform_1(%arg0: i32, %arg1: i32) -> (i32, i32) {
    %c0_i32 = arith.constant 0 : i32
    %c0_i32_0 = arith.constant 0 : i32
    %c0_i32_1 = arith.constant 0 : i32
    return %c0_i32, %c0_i32_0 : i32, i32
  }
  func.func @transform_2(%arg0: i32, %arg1: i32) -> (i32, i32) {
    %c0_i32 = arith.constant 0 : i32
    %c0_i32_0 = arith.constant 0 : i32
    %c0_i32_1 = arith.constant 0 : i32
    return %c0_i32, %c0_i32_0 : i32, i32
  }
  func.func @transform_3(%arg0: i32, %arg1: i32) -> (i32, i32, i32) {
    %c0_i32 = arith.constant 0 : i32
    %c0_i32_0 = arith.constant 0 : i32
    return %arg0, %c0_i32, %arg1 : i32, i32, i32
  }
  func.func @transform_4(%arg0: i32, %arg1: i32) -> (i32, i32, i32) {
    %c0_i32 = arith.constant 0 : i32
    %c0_i32_0 = arith.constant 0 : i32
    %c0_i32_1 = arith.constant 0 : i32
    return %arg0, %c0_i32, %c0_i32_0 : i32, i32, i32
  }
  func.func @transform_5(%arg0: i32, %arg1: i32) -> (i32, i32, i32) {
    %c0_i32 = arith.constant 0 : i32
    %c0_i32_0 = arith.constant 0 : i32
    %c0_i32_1 = arith.constant 0 : i32
    return %arg0, %c0_i32, %c0_i32_0 : i32, i32, i32
  }
}

module attributes {stable_mosaic.version = 11 : i64} {
  func.func @kernel(%arg0: i32, %arg1: i32, %arg2: memref<1x64x68xbf16, #tpu.memory_space<vmem>>, %arg3: memref<1x64x1xf32, #tpu.memory_space<vmem>>, %arg4: memref<1x64x1xf32, #tpu.memory_space<vmem>>, %arg5: memref<1x32x68xbf16, #tpu.memory_space<vmem>>) attributes {dimension_semantics = [#tpu.dimension_semantics<parallel>, #tpu.dimension_semantics<parallel>], iteration_bounds = array<i64: 2, 1>, scalar_prefetch = 0 : i64, scratch_operands = 0 : i64, tpu.core_type = #tpu.core_type<tc>, window_params = [{transform_indices = @transform_0, window_bounds = array<i64: 1, 64, 68>}, {transform_indices = @transform_1, window_bounds = array<i64: 1, 64, 1>}, {transform_indices = @transform_2, window_bounds = array<i64: 1, 64, 1>}, {transform_indices = @transform_3, window_bounds = array<i64: 1, 32, 68>}]} {
    %c0 = arith.constant 0 : index
    %c0_0 = arith.constant 0 : index
    %c0_1 = arith.constant 0 : index
    %0 = vector.load %arg2[%c0, %c0_0, %c0_1] : memref<1x64x68xbf16, #tpu.memory_space<vmem>>, vector<1x64x68xbf16>
    %1 = vector.shape_cast %0 : vector<1x64x68xbf16> to vector<64x68xbf16>
    %2 = arith.extf %1 : vector<64x68xbf16> to vector<64x68xf32>
    %c0_2 = arith.constant 0 : index
    %c0_3 = arith.constant 0 : index
    %c0_4 = arith.constant 0 : index
    %3 = vector.load %arg3[%c0_2, %c0_3, %c0_4] : memref<1x64x1xf32, #tpu.memory_space<vmem>>, vector<1x64x1xf32>
    %4 = vector.shape_cast %3 : vector<1x64x1xf32> to vector<64x1xf32>
    %5 = vector.broadcast %4 : vector<64x1xf32> to vector<64x68xf32>
    %6 = arith.mulf %2, %5 : vector<64x68xf32>
    %c0_5 = arith.constant 0 : index
    %c0_6 = arith.constant 0 : index
    %c0_7 = arith.constant 0 : index
    %7 = vector.load %arg4[%c0_5, %c0_6, %c0_7] : memref<1x64x1xf32, #tpu.memory_space<vmem>>, vector<1x64x1xf32>
    %8 = vector.shape_cast %7 : vector<1x64x1xf32> to vector<64x1xf32>
    %9 = vector.broadcast %8 : vector<64x1xf32> to vector<64x68xf32>
    %10 = arith.addf %6, %9 : vector<64x68xf32>
    %11 = vector.extract_strided_slice %10 {offsets = [0, 0], sizes = [32, 68], strides = [1, 1]} : vector<64x68xf32> to vector<32x68xf32>
    %12 = vector.extract_strided_slice %10 {offsets = [32, 0], sizes = [32, 68], strides = [1, 1]} : vector<64x68xf32> to vector<32x68xf32>
    %cst = arith.constant 0.000000e+00 : f32
    %13 = vector.broadcast %cst : f32 to vector<32x68xf32>
    %14 = arith.subf %13, %12 : vector<32x68xf32>
    %15 = math.exp %14 : vector<32x68xf32>
    %cst_8 = arith.constant 1.000000e+00 : f32
    %16 = vector.broadcast %cst_8 : f32 to vector<32x68xf32>
    %17 = arith.addf %16, %15 : vector<32x68xf32>
    %cst_9 = arith.constant 1.000000e+00 : f32
    %18 = vector.broadcast %cst_9 : f32 to vector<32x68xf32>
    %19 = arith.divf %18, %17 : vector<32x68xf32>
    %20 = arith.mulf %11, %19 : vector<32x68xf32>
    %21 = arith.truncf %20 : vector<32x68xf32> to vector<32x68xbf16>
    %c0_10 = arith.constant 0 : index
    %c0_11 = arith.constant 0 : index
    %c0_12 = arith.constant 0 : index
    %22 = vector.load %arg5[%c0_10, %c0_11, %c0_12] : memref<1x32x68xbf16, #tpu.memory_space<vmem>>, vector<1x32x68xbf16>
    %23 = vector.shape_cast %22 : vector<1x32x68xbf16> to vector<32x68xbf16>
    %24 = vector.shape_cast %21 : vector<32x68xbf16> to vector<1x32x68xbf16>
    tpu.vector_store %arg5[%c0_10, %c0_11, %c0_12], %24 {strides = array<i32>} : memref<1x32x68xbf16, #tpu.memory_space<vmem>>, vector<1x32x68xbf16>,
    return
  }
  func.func @transform_0(%arg0: i32, %arg1: i32) -> (i32, i32, i32) {
    %c0_i32 = arith.constant 0 : i32
    %c0_i32_0 = arith.constant 0 : i32
    return %arg0, %c0_i32, %arg1 : i32, i32, i32
  }
  func.func @transform_1(%arg0: i32, %arg1: i32) -> (i32, i32, i32) {
    %c0_i32 = arith.constant 0 : i32
    %c0_i32_0 = arith.constant 0 : i32
    %c0_i32_1 = arith.constant 0 : i32
    return %arg0, %c0_i32, %c0_i32_0 : i32, i32, i32
  }
  func.func @transform_2(%arg0: i32, %arg1: i32) -> (i32, i32, i32) {
    %c0_i32 = arith.constant 0 : i32
    %c0_i32_0 = arith.constant 0 : i32
    %c0_i32_1 = arith.constant 0 : i32
    return %arg0, %c0_i32, %c0_i32_0 : i32, i32, i32
  }
  func.func @transform_3(%arg0: i32, %arg1: i32) -> (i32, i32, i32) {
    %c0_i32 = arith.constant 0 : i32
    %c0_i32_0 = arith.constant 0 : i32
    return %arg0, %c0_i32, %arg1 : i32, i32, i32
  }
}

module attributes {stable_mosaic.version = 11 : i64} {
  func.func @kernel(%arg0: i32, %arg1: i32, %arg2: memref<1x128x119xbf16, #tpu.memory_space<vmem>>, %arg3: memref<16x128xbf16, #tpu.memory_space<vmem>>, %arg4: memref<16x1xf32, #tpu.memory_space<vmem>>, %arg5: memref<1x16x119xbf16, #tpu.memory_space<vmem>>, %arg6: memref<1x16x1xf32, #tpu.memory_space<vmem>>, %arg7: memref<1x16x1xf32, #tpu.memory_space<vmem>>) attributes {dimension_semantics = [#tpu.dimension_semantics<parallel>, #tpu.dimension_semantics<arbitrary>], iteration_bounds = array<i64: 2, 1>, scalar_prefetch = 0 : i64, scratch_operands = 0 : i64, tpu.core_type = #tpu.core_type<tc>, window_params = [{transform_indices = @transform_0, window_bounds = array<i64: 1, 128, 119>}, {pipeline_mode = #tpu.pipeline_mode<synchronous>, transform_indices = @transform_1, window_bounds = array<i64: 16, 128>}, {pipeline_mode = #tpu.pipeline_mode<synchronous>, transform_indices = @transform_2, window_bounds = array<i64: 16, 1>}, {transform_indices = @transform_3, window_bounds = array<i64: 1, 16, 119>}, {transform_indices = @transform_4, window_bounds = array<i64: 1, 16, 1>}, {transform_indices = @transform_5, window_bounds = array<i64: 1, 16, 1>}]} {
    %c0 = arith.constant 0 : index
    %c0_0 = arith.constant 0 : index
    %0 = vector.load %arg3[%c0, %c0_0] : memref<16x128xbf16, #tpu.memory_space<vmem>>, vector<16x128xbf16>
    %c0_1 = arith.constant 0 : index
    %c0_2 = arith.constant 0 : index
    %c0_3 = arith.constant 0 : index
    %1 = vector.load %arg2[%c0_1, %c0_2, %c0_3] : memref<1x128x119xbf16, #tpu.memory_space<vmem>>, vector<1x128x119xbf16>
    %2 = vector.shape_cast %1 : vector<1x128x119xbf16> to vector<128x119xbf16>
    %cst = arith.constant dense<0.000000e+00> : vector<16x119xf32>
    %3 = tpu.matmul %0, %2, %cst {dimension_numbers = #tpu.dot_dimension_numbers<[1], [0], [0], [1], [0, 0, 1, 1], [], []>} : vector<16x128xbf16>, vector<128x119xbf16>, vector<16x119xf32> -> vector<16x119xf32>
    %c0_4 = arith.constant 0 : index
    %c0_5 = arith.constant 0 : index
    %4 = vector.load %arg4[%c0_4, %c0_5] : memref<16x1xf32, #tpu.memory_space<vmem>>, vector<16x1xf32>
    %5 = vector.broadcast %4 : vector<16x1xf32> to vector<16x119xf32>
    %6 = arith.addf %3, %5 : vector<16x119xf32>
    %7 = arith.truncf %6 : vector<16x119xf32> to vector<16x119xbf16>
    %c0_6 = arith.constant 0 : index
    %c0_7 = arith.constant 0 : index
    %c0_8 = arith.constant 0 : index
    %8 = vector.load %arg5[%c0_6, %c0_7, %c0_8] : memref<1x16x119xbf16, #tpu.memory_space<vmem>>, vector<1x16x119xbf16>
    %9 = vector.shape_cast %8 : vector<1x16x119xbf16> to vector<16x119xbf16>
    %10 = vector.shape_cast %7 : vector<16x119xbf16> to vector<1x16x119xbf16>
    tpu.vector_store %arg5[%c0_6, %c0_7, %c0_8], %10 {strides = array<i32>} : memref<1x16x119xbf16, #tpu.memory_space<vmem>>, vector<1x16x119xbf16>,
    %cst_9 = arith.constant dense<0.000000e+00> : vector<16xf32>
    %11 = vector.multi_reduction <add>, %6, %cst_9 [1] : vector<16x119xf32> to vector<16xf32>
    %12 = vector.shape_cast %11 : vector<16xf32> to vector<16x1xf32>
    %13 = arith.mulf %6, %6 : vector<16x119xf32>
    %cst_10 = arith.constant dense<0.000000e+00> : vector<16xf32>
    %14 = vector.multi_reduction <add>, %13, %cst_10 [1] : vector<16x119xf32> to vector<16xf32>
    %15 = vector.shape_cast %14 : vector<16xf32> to vector<16x1xf32>
    %c0_i32 = arith.constant 0 : i32
    %16 = arith.cmpi eq, %arg1, %c0_i32 : i32
    %17 = arith.extui %16 : i1 to i32
    %c0_i32_11 = arith.constant 0 : i32
    %18 = arith.cmpi ne, %17, %c0_i32_11 : i32
    scf.if %18 {
      %c0_14 = arith.constant 0 : index
      %c0_15 = arith.constant 0 : index
      %c0_16 = arith.constant 0 : index
      %22 = vector.load %arg6[%c0_14, %c0_15, %c0_16] : memref<1x16x1xf32, #tpu.memory_space<vmem>>, vector<1x16x1xf32>
      %23 = vector.shape_cast %22 : vector<1x16x1xf32> to vector<16x1xf32>
      %24 = vector.shape_cast %12 : vector<16x1xf32> to vector<1x16x1xf32>
      tpu.vector_store %arg6[%c0_14, %c0_15, %c0_16], %24 {strides = array<i32>} : memref<1x16x1xf32, #tpu.memory_space<vmem>>, vector<1x16x1xf32>,
      %c0_17 = arith.constant 0 : index
      %c0_18 = arith.constant 0 : index
      %c0_19 = arith.constant 0 : index
      %25 = vector.load %arg7[%c0_17, %c0_18, %c0_19] : memref<1x16x1xf32, #tpu.memory_space<vmem>>, vector<1x16x1xf32>
      %26 = vector.shape_cast %25 : vector<1x16x1xf32> to vector<16x1xf32>
      %27 = vector.shape_cast %15 : vector<16x1xf32> to vector<1x16x1xf32>
      tpu.vector_store %arg7[%c0_17, %c0_18, %c0_19], %27 {strides = array<i32>} : memref<1x16x1xf32, #tpu.memory_space<vmem>>, vector<1x16x1xf32>,
    } else {
    }
    %c0_i32_12 = arith.constant 0 : i32
    %19 = arith.cmpi sgt, %arg1, %c0_i32_12 : i32
    %20 = arith.extui %19 : i1 to i32
    %c0_i32_13 = arith.constant 0 : i32
    %21 = arith.cmpi ne, %20, %c0_i32_13 : i32
    scf.if %21 {
      %c0_14 = arith.constant 0 : index
      %c0_15 = arith.constant 0 : index
      %c0_16 = arith.constant 0 : index
      %22 = vector.load %arg6[%c0_14, %c0_15, %c0_16] : memref<1x16x1xf32, #tpu.memory_space<vmem>>, vector<1x16x1xf32>
      %23 = vector.shape_cast %22 : vector<1x16x1xf32> to vector<16x1xf32>
      %24 = arith.addf %23, %12 : vector<16x1xf32>
      %c0_17 = arith.constant 0 : index
      %c0_18 = arith.constant 0 : index
      %c0_19 = arith.constant 0 : index
      %25 = vector.load %arg6[%c0_17, %c0_18, %c0_19] : memref<1x16x1xf32, #tpu.memory_space<vmem>>, vector<1x16x1xf32>
      %26 = vector.shape_cast %25 : vector<1x16x1xf32> to vector<16x1xf32>
      %27 = vector.shape_cast %24 : vector<16x1xf32> to vector<1x16x1xf32>
      tpu.vector_store %arg6[%c0_17, %c0_18, %c0_19], %27 {strides = array<i32>} : memref<1x16x1xf32, #tpu.memory_space<vmem>>, vector<1x16x1xf32>,
      %c0_20 = arith.constant 0 : index
      %c0_21 = arith.constant 0 : index
      %c0_22 = arith.constant 0 : index
      %28 = vector.load %arg7[%c0_20, %c0_21, %c0_22] : memref<1x16x1xf32, #tpu.memory_space<vmem>>, vector<1x16x1xf32>
      %29 = vector.shape_cast %28 : vector<1x16x1xf32> to vector<16x1xf32>
      %30 = arith.addf %29, %15 : vector<16x1xf32>
      %c0_23 = arith.constant 0 : index
      %c0_24 = arith.constant 0 : index
      %c0_25 = arith.constant 0 : index
      %31 = vector.load %arg7[%c0_23, %c0_24, %c0_25] : memref<1x16x1xf32, #tpu.memory_space<vmem>>, vector<1x16x1xf32>
      %32 = vector.shape_cast %31 : vector<1x16x1xf32> to vector<16x1xf32>
      %33 = vector.shape_cast %30 : vector<16x1xf32> to vector<1x16x1xf32>
      tpu.vector_store %arg7[%c0_23, %c0_24, %c0_25], %33 {strides = array<i32>} : memref<1x16x1xf32, #tpu.memory_space<vmem>>, vector<1x16x1xf32>,
    } else {
    }
    return
  }
  func.func @transform_0(%arg0: i32, %arg1: i32) -> (i32, i32, i32) {
    %c0_i32 = arith.constant 0 : i32
    %c0_i32_0 = arith.constant 0 : i32
    return %arg0, %c0_i32, %arg1 : i32, i32, i32
  }
  func.func @transform_1(%arg0: i32, %arg1: i32) -> (i32, i32) {
    %c0_i32 = arith.constant 0 : i32
    %c0_i32_0 = arith.constant 0 : i32
    %c0_i32_1 = arith.constant 0 : i32
    return %c0_i32, %c0_i32_0 : i32, i32
  }
  func.func @transform_2(%arg0: i32, %arg1: i32) -> (i32, i32) {
    %c0_i32 = arith.constant 0 : i32
    %c0_i32_0 = arith.constant 0 : i32
    %c0_i32_1 = arith.constant 0 : i32
    return %c0_i32, %c0_i32_0 : i32, i32
  }
  func.func @transform_3(%arg0: i32, %arg1: i32) -> (i32, i32, i32) {
    %c0_i32 = arith.constant 0 : i32
    %c0_i32_0 = arith.constant 0 : i32
    return %arg0, %c0_i32, %arg1 : i32, i32, i32
  }
  func.func @transform_4(%arg0: i32, %arg1: i32) -> (i32, i32, i32) {
    %c0_i32 = arith.constant 0 : i32
    %c0_i32_0 = arith.constant 0 : i32
    %c0_i32_1 = arith.constant 0 : i32
    return %arg0, %c0_i32, %c0_i32_0 : i32, i32, i32
  }
  func.func @transform_5(%arg0: i32, %arg1: i32) -> (i32, i32, i32) {
    %c0_i32 = arith.constant 0 : i32
    %c0_i32_0 = arith.constant 0 : i32
    %c0_i32_1 = arith.constant 0 : i32
    return %arg0, %c0_i32, %c0_i32_0 : i32, i32, i32
  }
}

module attributes {stable_mosaic.version = 11 : i64} {
  func.func @kernel(%arg0: i32, %arg1: i32, %arg2: memref<1x16x119xbf16, #tpu.memory_space<vmem>>, %arg3: memref<1x16x1xf32, #tpu.memory_space<vmem>>, %arg4: memref<1x16x1xf32, #tpu.memory_space<vmem>>, %arg5: memref<1x16x119xbf16, #tpu.memory_space<vmem>>) attributes {dimension_semantics = [#tpu.dimension_semantics<parallel>, #tpu.dimension_semantics<parallel>], iteration_bounds = array<i64: 2, 1>, scalar_prefetch = 0 : i64, scratch_operands = 0 : i64, tpu.core_type = #tpu.core_type<tc>, window_params = [{transform_indices = @transform_0, window_bounds = array<i64: 1, 16, 119>}, {transform_indices = @transform_1, window_bounds = array<i64: 1, 16, 1>}, {transform_indices = @transform_2, window_bounds = array<i64: 1, 16, 1>}, {transform_indices = @transform_3, window_bounds = array<i64: 1, 16, 119>}]} {
    %c0 = arith.constant 0 : index
    %c0_0 = arith.constant 0 : index
    %c0_1 = arith.constant 0 : index
    %0 = vector.load %arg2[%c0, %c0_0, %c0_1] : memref<1x16x119xbf16, #tpu.memory_space<vmem>>, vector<1x16x119xbf16>
    %1 = vector.shape_cast %0 : vector<1x16x119xbf16> to vector<16x119xbf16>
    %2 = arith.extf %1 : vector<16x119xbf16> to vector<16x119xf32>
    %c0_2 = arith.constant 0 : index
    %c0_3 = arith.constant 0 : index
    %c0_4 = arith.constant 0 : index
    %3 = vector.load %arg3[%c0_2, %c0_3, %c0_4] : memref<1x16x1xf32, #tpu.memory_space<vmem>>, vector<1x16x1xf32>
    %4 = vector.shape_cast %3 : vector<1x16x1xf32> to vector<16x1xf32>
    %5 = vector.broadcast %4 : vector<16x1xf32> to vector<16x119xf32>
    %6 = arith.mulf %2, %5 : vector<16x119xf32>
    %c0_5 = arith.constant 0 : index
    %c0_6 = arith.constant 0 : index
    %c0_7 = arith.constant 0 : index
    %7 = vector.load %arg4[%c0_5, %c0_6, %c0_7] : memref<1x16x1xf32, #tpu.memory_space<vmem>>, vector<1x16x1xf32>
    %8 = vector.shape_cast %7 : vector<1x16x1xf32> to vector<16x1xf32>
    %9 = vector.broadcast %8 : vector<16x1xf32> to vector<16x119xf32>
    %10 = arith.addf %6, %9 : vector<16x119xf32>
    %cst = arith.constant 5.000000e-01 : f32
    %11 = vector.broadcast %cst : f32 to vector<16x119xf32>
    %12 = arith.mulf %11, %10 : vector<16x119xf32>
    %cst_8 = arith.constant 4.471500e-02 : f32
    %13 = vector.broadcast %cst_8 : f32 to vector<16x119xf32>
    %14 = arith.mulf %13, %10 : vector<16x119xf32>
    %15 = arith.mulf %14, %10 : vector<16x119xf32>
    %16 = arith.mulf %15, %10 : vector<16x119xf32>
    %17 = arith.addf %10, %16 : vector<16x119xf32>
    %cst_9 = arith.constant 0.797884583 : f32
    %18 = vector.broadcast %cst_9 : f32 to vector<16x119xf32>
    %19 = arith.mulf %18, %17 : vector<16x119xf32>
    %20 = math.tanh %19 : vector<16x119xf32>
    %cst_10 = arith.constant 1.000000e+00 : f32
    %21 = vector.broadcast %cst_10 : f32 to vector<16x119xf32>
    %22 = arith.addf %21, %20 : vector<16x119xf32>
    %23 = arith.mulf %12, %22 : vector<16x119xf32>
    %24 = arith.truncf %23 : vector<16x119xf32> to vector<16x119xbf16>
    %c0_11 = arith.constant 0 : index
    %c0_12 = arith.constant 0 : index
    %c0_13 = arith.constant 0 : index
    %25 = vector.load %arg5[%c0_11, %c0_12, %c0_13] : memref<1x16x119xbf16, #tpu.memory_space<vmem>>, vector<1x16x119xbf16>
    %26 = vector.shape_cast %25 : vector<1x16x119xbf16> to vector<16x119xbf16>
    %27 = vector.shape_cast %24 : vector<16x119xbf16> to vector<1x16x119xbf16>
    tpu.vector_store %arg5[%c0_11, %c0_12, %c0_13], %27 {strides = array<i32>} : memref<1x16x119xbf16, #tpu.memory_space<vmem>>, vector<1x16x119xbf16>,
    return
  }
  func.func @transform_0(%arg0: i32, %arg1: i32) -> (i32, i32, i32) {
    %c0_i32 = arith.constant 0 : i32
    %c0_i32_0 = arith.constant 0 : i32
    return %arg0, %c0_i32, %arg1 : i32, i32, i32
  }
  func.func @transform_1(%arg0: i32, %arg1: i32) -> (i32, i32, i32) {
    %c0_i32 = arith.constant 0 : i32
    %c0_i32_0 = arith.constant 0 : i32
    %c0_i32_1 = arith.constant 0 : i32
    return %arg0, %c0_i32, %c0_i32_0 : i32, i32, i32
  }
  func.func @transform_2(%arg0: i32, %arg1: i32) -> (i32, i32, i32) {
    %c0_i32 = arith.constant 0 : i32
    %c0_i32_0 = arith.constant 0 : i32
    %c0_i32_1 = arith.constant 0 : i32
    return %arg0, %c0_i32, %c0_i32_0 : i32, i32, i32
  }
  func.func @transform_3(%arg0: i32, %arg1: i32) -> (i32, i32, i32) {
    %c0_i32 = arith.constant 0 : i32
    %c0_i32_0 = arith.constant 0 : i32
    return %arg0, %c0_i32, %arg1 : i32, i32, i32
  }
}

module attributes {stable_mosaic.version = 11 : i64} {
  func.func @kernel(%arg0: i32, %arg1: i32, %arg2: memref<1x144x136xbf16, #tpu.memory_space<vmem>>, %arg3: memref<16x144xbf16, #tpu.memory_space<vmem>>, %arg4: memref<16x144xbf16, #tpu.memory_space<vmem>>, %arg5: memref<16x1xf32, #tpu.memory_space<vmem>>, %arg6: memref<16x1xf32, #tpu.memory_space<vmem>>, %arg7: memref<1x16x136xbf16, #tpu.memory_space<vmem>>) attributes {dimension_semantics = [#tpu.dimension_semantics<parallel>, #tpu.dimension_semantics<parallel>], iteration_bounds = array<i64: 2, 1>, scalar_prefetch = 0 : i64, scratch_operands = 0 : i64, tpu.core_type = #tpu.core_type<tc>, window_params = [{transform_indices = @transform_0, window_bounds = array<i64: 1, 144, 136>}, {pipeline_mode = #tpu.pipeline_mode<synchronous>, transform_indices = @transform_1, window_bounds = array<i64: 16, 144>}, {pipeline_mode = #tpu.pipeline_mode<synchronous>, transform_indices = @transform_2, window_bounds = array<i64: 16, 144>}, {pipeline_mode = #tpu.pipeline_mode<synchronous>, transform_indices = @transform_3, window_bounds = array<i64: 16, 1>}, {pipeline_mode = #tpu.pipeline_mode<synchronous>, transform_indices = @transform_4, window_bounds = array<i64: 16, 1>}, {transform_indices = @transform_5, window_bounds = array<i64: 1, 16, 136>}]} {
    %c0 = arith.constant 0 : index
    %c0_0 = arith.constant 0 : index
    %c0_1 = arith.constant 0 : index
    %0 = vector.load %arg2[%c0, %c0_0, %c0_1] : memref<1x144x136xbf16, #tpu.memory_space<vmem>>, vector<1x144x136xbf16>
    %1 = vector.shape_cast %0 : vector<1x144x136xbf16> to vector<144x136xbf16>
    %c0_2 = arith.constant 0 : index
    %c0_3 = arith.constant 0 : index
    %2 = vector.load %arg3[%c0_2, %c0_3] : memref<16x144xbf16, #tpu.memory_space<vmem>>, vector<16x144xbf16>
    %cst = arith.constant dense<0.000000e+00> : vector<16x136xf32>
    %3 = tpu.matmul %2, %1, %cst {dimension_numbers = #tpu.dot_dimension_numbers<[1], [0], [0], [1], [0, 0, 1, 1], [], []>} : vector<16x144xbf16>, vector<144x136xbf16>, vector<16x136xf32> -> vector<16x136xf32>
    %c0_4 = arith.constant 0 : index
    %c0_5 = arith.constant 0 : index
    %4 = vector.load %arg5[%c0_4, %c0_5] : memref<16x1xf32, #tpu.memory_space<vmem>>, vector<16x1xf32>
    %5 = vector.broadcast %4 : vector<16x1xf32> to vector<16x136xf32>
    %6 = arith.addf %3, %5 : vector<16x136xf32>
    %c0_6 = arith.constant 0 : index
    %c0_7 = arith.constant 0 : index
    %7 = vector.load %arg4[%c0_6, %c0_7] : memref<16x144xbf16, #tpu.memory_space<vmem>>, vector<16x144xbf16>
    %cst_8 = arith.constant dense<0.000000e+00> : vector<16x136xf32>
    %8 = tpu.matmul %7, %1, %cst_8 {dimension_numbers = #tpu.dot_dimension_numbers<[1], [0], [0], [1], [0, 0, 1, 1], [], []>} : vector<16x144xbf16>, vector<144x136xbf16>, vector<16x136xf32> -> vector<16x136xf32>
    %c0_9 = arith.constant 0 : index
    %c0_10 = arith.constant 0 : index
    %9 = vector.load %arg6[%c0_9, %c0_10] : memref<16x1xf32, #tpu.memory_space<vmem>>, vector<16x1xf32>
    %10 = vector.broadcast %9 : vector<16x1xf32> to vector<16x136xf32>
    %11 = arith.addf %8, %10 : vector<16x136xf32>
    %cst_11 = arith.constant 0.000000e+00 : f32
    %12 = vector.broadcast %cst_11 : f32 to vector<16x136xf32>
    %13 = arith.subf %12, %11 : vector<16x136xf32>
    %14 = math.exp %13 : vector<16x136xf32>
    %cst_12 = arith.constant 1.000000e+00 : f32
    %15 = vector.broadcast %cst_12 : f32 to vector<16x136xf32>
    %16 = arith.addf %15, %14 : vector<16x136xf32>
    %cst_13 = arith.constant 1.000000e+00 : f32
    %17 = vector.broadcast %cst_13 : f32 to vector<16x136xf32>
    %18 = arith.divf %17, %16 : vector<16x136xf32>
    %19 = arith.mulf %6, %18 : vector<16x136xf32>
    %20 = arith.truncf %19 : vector<16x136xf32> to vector<16x136xbf16>
    %c0_14 = arith.constant 0 : index
    %c0_15 = arith.constant 0 : index
    %c0_16 = arith.constant 0 : index
    %21 = vector.load %arg7[%c0_14, %c0_15, %c0_16] : memref<1x16x136xbf16, #tpu.memory_space<vmem>>, vector<1x16x136xbf16>
    %22 = vector.shape_cast %21 : vector<1x16x136xbf16> to vector<16x136xbf16>
    %23 = vector.shape_cast %20 : vector<16x136xbf16> to vector<1x16x136xbf16>
    tpu.vector_store %arg7[%c0_14, %c0_15, %c0_16], %23 {strides = array<i32>} : memref<1x16x136xbf16, #tpu.memory_space<vmem>>, vector<1x16x136xbf16>,
    return
  }
  func.func @transform_0(%arg0: i32, %arg1: i32) -> (i32, i32, i32) {
    %c0_i32 = arith.constant 0 : i32
    %c0_i32_0 = arith.constant 0 : i32
    return %arg0, %c0_i32, %arg1 : i32, i32, i32
  }
  func.func @transform_1(%arg0: i32, %arg1: i32) -> (i32, i32) {
    %c0_i32 = arith.constant 0 : i32
    %c0_i32_0 = arith.constant 0 : i32
    %c0_i32_1 = arith.constant 0 : i32
    return %c0_i32, %c0_i32_0 : i32, i32
  }
  func.func @transform_2(%arg0: i32, %arg1: i32) -> (i32, i32) {
    %c0_i32 = arith.constant 0 : i32
    %c0_i32_0 = arith.constant 0 : i32
    %c0_i32_1 = arith.constant 0 : i32
    return %c0_i32, %c0_i32_0 : i32, i32
  }
  func.func @transform_3(%arg0: i32, %arg1: i32) -> (i32, i32) {
    %c0_i32 = arith.constant 0 : i32
    %c0_i32_0 = arith.constant 0 : i32
    %c0_i32_1 = arith.constant 0 : i32
    return %c0_i32, %c0_i32_0 : i32, i32
  }
  func.func @transform_4(%arg0: i32, %arg1: i32) -> (i32, i32) {
    %c0_i32 = arith.constant 0 : i32
    %c0_i32_0 = arith.constant 0 : i32
    %c0_i32_1 = arith.constant 0 : i32
    return %c0_i32, %c0_i32_0 : i32, i32
  }
  func.func @transform_5(%arg0: i32, %arg1: i32) -> (i32, i32, i32) {
    %c0_i32 = arith.constant 0 : i32
    %c0_i32_0 = arith.constant 0 : i32
    return %arg0, %c0_i32, %arg1 : i32, i32, i32
  }
}

module attributes {stable_mosaic.version = 11 : i64} {
  func.func @kernel(%arg0: i32, %arg1: i32, %arg2: memref<1x32x153xbf16, #tpu.memory_space<vmem>>, %arg3: memref<8x32xbf16, #tpu.memory_space<vmem>>, %arg4: memref<8x1xf32, #tpu.memory_space<vmem>>, %arg5: memref<1x8x153xf32, #tpu.memory_space<vmem>>) attributes {dimension_semantics = [#tpu.dimension_semantics<parallel>, #tpu.dimension_semantics<parallel>], iteration_bounds = array<i64: 2, 1>, scalar_prefetch = 0 : i64, scratch_operands = 0 : i64, tpu.core_type = #tpu.core_type<tc>, window_params = [{transform_indices = @transform_0, window_bounds = array<i64: 1, 32, 153>}, {pipeline_mode = #tpu.pipeline_mode<synchronous>, transform_indices = @transform_1, window_bounds = array<i64: 8, 32>}, {pipeline_mode = #tpu.pipeline_mode<synchronous>, transform_indices = @transform_2, window_bounds = array<i64: 8, 1>}, {transform_indices = @transform_3, window_bounds = array<i64: 1, 8, 153>}]} {
    %c0 = arith.constant 0 : index
    %c0_0 = arith.constant 0 : index
    %0 = vector.load %arg3[%c0, %c0_0] : memref<8x32xbf16, #tpu.memory_space<vmem>>, vector<8x32xbf16>
    %c0_1 = arith.constant 0 : index
    %c0_2 = arith.constant 0 : index
    %c0_3 = arith.constant 0 : index
    %1 = vector.load %arg2[%c0_1, %c0_2, %c0_3] : memref<1x32x153xbf16, #tpu.memory_space<vmem>>, vector<1x32x153xbf16>
    %2 = vector.shape_cast %1 : vector<1x32x153xbf16> to vector<32x153xbf16>
    %cst = arith.constant dense<0.000000e+00> : vector<8x153xf32>
    %3 = tpu.matmul %0, %2, %cst {dimension_numbers = #tpu.dot_dimension_numbers<[1], [0], [0], [1], [0, 0, 1, 1], [], []>} : vector<8x32xbf16>, vector<32x153xbf16>, vector<8x153xf32> -> vector<8x153xf32>
    %c0_4 = arith.constant 0 : index
    %c0_5 = arith.constant 0 : index
    %4 = vector.load %arg4[%c0_4, %c0_5] : memref<8x1xf32, #tpu.memory_space<vmem>>, vector<8x1xf32>
    %5 = vector.broadcast %4 : vector<8x1xf32> to vector<8x153xf32>
    %6 = arith.addf %3, %5 : vector<8x153xf32>
    %c0_6 = arith.constant 0 : index
    %c0_7 = arith.constant 0 : index
    %c0_8 = arith.constant 0 : index
    %7 = vector.load %arg5[%c0_6, %c0_7, %c0_8] : memref<1x8x153xf32, #tpu.memory_space<vmem>>, vector<1x8x153xf32>
    %8 = vector.shape_cast %7 : vector<1x8x153xf32> to vector<8x153xf32>
    %9 = vector.shape_cast %6 : vector<8x153xf32> to vector<1x8x153xf32>
    tpu.vector_store %arg5[%c0_6, %c0_7, %c0_8], %9 {strides = array<i32>} : memref<1x8x153xf32, #tpu.memory_space<vmem>>, vector<1x8x153xf32>,
    return
  }
  func.func @transform_0(%arg0: i32, %arg1: i32) -> (i32, i32, i32) {
    %c0_i32 = arith.constant 0 : i32
    %c0_i32_0 = arith.constant 0 : i32
    return %arg0, %c0_i32, %arg1 : i32, i32, i32
  }
  func.func @transform_1(%arg0: i32, %arg1: i32) -> (i32, i32) {
    %c0_i32 = arith.constant 0 : i32
    %c0_i32_0 = arith.constant 0 : i32
    %c0_i32_1 = arith.constant 0 : i32
    return %c0_i32, %c0_i32_0 : i32, i32
  }
  func.func @transform_2(%arg0: i32, %arg1: i32) -> (i32, i32) {
    %c0_i32 = arith.constant 0 : i32
    %c0_i32_0 = arith.constant 0 : i32
    %c0_i32_1 = arith.constant 0 : i32
    return %c0_i32, %c0_i32_0 : i32, i32
  }
  func.func @transform_3(%arg0: i32, %arg1: i32) -> (i32, i32, i32) {
    %c0_i32 = arith.constant 0 : i32
    %c0_i32_0 = arith.constant 0 : i32
    return %arg0, %c0_i32, %arg1 : i32, i32, i32
  }
}

</mosaic_0001>

<bundles_post_ra>
// kernel: _lambda_.13
= control target key start
LH: loop header
LB: loop body
LE: loop exit
PB: predicated region body
PF: predicated region fallthrough
CT: control target
= control target key end

     0   :  { %s480_s12 = smov 0   ;;  %s482_s13 = smov 0   ;;  %s523_s0 = inlined_call_operand.vmem [shape: bf16[2,2,544], index: 0, kind: input, shape index: {}]   ;;  %s524_s1 = inlined_call_operand.vmem [shape: bf16[8,2], index: 1, kind: input, shape index: {}]   ;;  %s525_s2 = inlined_call_operand.vmem [shape: f32[8,1], index: 2, kind: input, shape index: {}]   ;;  %s526_s3 = inlined_call_operand.vmem [shape: bf16[2,8,544], index: 3, kind: output, shape index: {}]  }
   0x1   :  { %s484_s14 = smov 0  }
   0x2 LB: > { %s25_s15 = sadd.s32 1, %s453_s13  ;;  %p398_p0 = scmp.ge.s32.totalorder %s457_s14, 1  ;;  %s457_s14 = sphi %s484_s14, %s13_s14   ;;  %s453_s13 = sphi %s482_s13, %s528_s13   ;;  %s449_s12 = sphi %s480_s12, %s527_s12  }
   0x3   : > { %p27_p1 = scmp.ge.s32.totalorder %s25_s15, 2  ;;  %p157_p2 = scmp.lt.s32.totalorder %s457_s14, 3 }
   0x5   : > { %s530_s15 = smov (%p27_p1, %s25_s15), 0  ;;  %p158_p3 = pnand %p398_p0, %p157_p2 }
   0x6   : > { %p189_p4 = scmp.lt.s32.totalorder (!%p158_p3), %s449_s12, 1 }
   0x7   : > { %161 = sbr.rel (%p158_p3) target bundleno = 179 (0xb3), region = 32 }
   0xc   : > { %v459_v0 = vmov 0   ;;  %v210_v1 = vld [vmem:[%s525_s2] sm:$0xff]  ;;  %s532_s12 = smov (!%p189_p4, %s449_s12), 1  ;;  %vm227_vm0 = vcmask 1040384   ;;  %vm223_vm1 = vcmask 15360   ;;  %vm308_vm2 = vcmask 257024  }
   0xd   : > { %434 = vset.pattern.permute.xlu0 %v459_v0  ;;  %s407_s18 = smul.u32 5, %s532_s12  ;;  %v208_v12 = vld [vmem:[%s524_s1] sm:$0xf] }
   0xe   : > { %213 = vperm.xlu0 %434, %v210_v1   ;;  %s408_s24 = smul.u32 20, %s532_s12 }
   0xf   : > { %s195_s21 = scalar_lea.vmem %s523_s0, %s407_s18 }
  0x10   : > { %v209_v2 = vld [vmem:[%s195_s21] sm:$0x1f]  ;;  %s205_s27 = scalar_lea.vmem %s526_s3, %s408_s24 }
  0x11   : > { %217 = vst [vmem:[#allocation1] ss:$9 sm:$0xff] %v209_v2 }
  0x18   : > { %v218_v3 = vld [vmem:[#allocation1] sm:$0xff]  ;;  %v219_v4 = vld [vmem:[#allocation1 + $0x9] sm:$0xff]  ;;  %v220_v5 = vld [vmem:[#allocation1 + $0x12] sm:$0xff] }
  0x19   : > { %v228_v6 = vsel %vm227_vm0, %v218_v3, 0  ;;  %v230_v7 = vsel %vm227_vm0, %v219_v4, 0  ;;  %v232_v8 = vsel %vm227_vm0, %v220_v5, 0  ;;  %v221_v9 = vld [vmem:[#allocation1 + $0x1b] sm:$0xff]  ;;  %v222_v10 = vld [vmem:[#allocation1 + $0x24] sm:$0xff] }
  0x1a   : > { %245 = vmatpush.bf16.msra.mxu0 %v228_v6  ;;  %258 = vmatpush.bf16.msra.mxu1 %v230_v7  ;;  %v234_v11 = vsel %vm227_vm0, %v221_v9, 0  ;;  %v236_v13 = vsel %vm227_vm0, %v222_v10, 0 }
  0x1b   : > { %271 = vmatpush.bf16.msra.mxu2 %v232_v8  ;;  %284 = vmatpush.bf16.msra.mxu3 %v234_v11 }
  0x1d   : > { %400 = vmatmul.msk.bf16.vlgmr.msra.gmra.mxu0 %vm223_vm1, %v208_v12  ;;  %401 = vmatmul.msk.bf16.vlgmr.msra.gmra.mxu1 %vm223_vm1, %v208_v12 }
  0x1e   : > { %297 = vmatpush.bf16.msrb.mxu0 %v236_v13  ;;  %402 = vmatmul.msk.bf16.vlgmr.msra.gmra.mxu2 %vm223_vm1, %v208_v12 }
  0x1f   : > { %403 = vmatmul.msk.bf16.vlgmr.msra.gmra.mxu3 %vm223_vm1, %v208_v12 }
  0x2d   : > { %404 = vmatmul.msk.bf16.vlgmr.msrb.gmra.mxu0 %vm223_vm1, %v208_v12 }
  0x80   : > { %v214_v14 = vpop.permute.xlu0 %213 }
  0x9a   : > { %v247_v15 = vpop.f32.mrf.mxu0  ;;  %v260_v16 = vpop.f32.mrf.mxu1 }
  0x9b   : > { %v248_v17 = vadd.f32 %v247_v15, %v214_v14  ;;  %v261_v18 = vadd.f32 %v260_v16, %v214_v14 }
  0x9d   : > { %v303_v19 = vpack.c.bf16 %v261_v18, %v248_v17 }
  0x9f   : > { %306 = vst [vmem:[%s205_s27] sm:$0xff] %v303_v19 }
  0xa1   : > { %v273_v20 = vpop.f32.mrf.mxu2 }
  0xa2   : > { %v286_v21 = vpop.f32.mrf.mxu3  ;;  %v249_v22 = vpop.f32.mrf.mxu0  ;;  %v274_v23 = vadd.f32 %v273_v20, %v214_v14 }
  0xa3   : > { %v287_v24 = vadd.f32 %v286_v21, %v214_v14  ;;  %v262_v25 = vpop.f32.mrf.mxu1 }
  0xa5   : > { %v304_v26 = vpack.c.bf16 %v287_v24, %v274_v23 }
  0xa7   : > { %307 = vst [vmem:[%s205_s27 + $0x8] sm:$0xff] %v304_v26 }
  0xa9   : > { %v275_v27 = vpop.f32.mrf.mxu2 }
  0xaa   : > { %v288_v28 = vpop.f32.mrf.mxu3  ;;  %v299_v29 = vpop.f32.mrf.mxu0 }
  0xab   : > { %v300_v30 = vadd.f32 %v299_v29, %v214_v14 }
  0xad   : > { %v305_v31 = vpack.c.bf16 %v300_v30, %v300_v30 }
  0xaf   : > { %309 = vst.msk [vmem:[%s205_s27 + $0x10] sm:$0xf] %vm308_vm2, %v305_v31 }
  0xb2   : > { %v301_v32 = vpop.f32.mrf.mxu0 }
  0xb3 PF: > { %s13_s14 = sadd.s32 1, %s457_s14   ;;  %s527_s12 = smov %s453_s13 }
  0xb4   : > { %p10_p5 = scmp.ge.s32.totalorder %s13_s14, 4   ;;  %s528_s13 = smov %s530_s15 }
  0xb6   :  { %12 = sbr.rel (!%p10_p5) target bundleno = 2 (0x2), region = 62 }

// kernel: _lambda_.14
= control target key start
LH: loop header
LB: loop body
LE: loop exit
PB: predicated region body
PF: predicated region fallthrough
CT: control target
= control target key end

     0   :  { %s536_s12 = smov 0   ;;  %s538_s13 = smov 0   ;;  %s579_s0 = inlined_call_operand.vmem [shape: bf16[2,64,136], index: 0, kind: input, shape index: {}]   ;;  %s580_s1 = inlined_call_operand.vmem [shape: bf16[8,64], index: 1, kind: input, shape index: {}]   ;;  %s581_s2 = inlined_call_operand.vmem [shape: f32[8,1], index: 2, kind: input, shape index: {}]   ;;  %s582_s3 = inlined_call_operand.vmem [shape: bf16[2,8,136], index: 3, kind: output, shape index: {}]  }
   0x1   :  { %s540_s14 = smov 0  }
   0x2 LB: > { %s25_s15 = sadd.s32 1, %s509_s13  ;;  %p410_p0 = scmp.ge.s32.totalorder %s513_s14, 1  ;;  %s513_s14 = sphi %s540_s14, %s13_s14   ;;  %s509_s13 = sphi %s538_s13, %s584_s13   ;;  %s505_s12 = sphi %s536_s12, %s583_s12  }
   0x3   : > { %p27_p1 = scmp.ge.s32.totalorder %s25_s15, 2  ;;  %p158_p2 = scmp.lt.s32.totalorder %s513_s14, 3 }
   0x5   : > { %s586_s15 = smov (%p27_p1, %s25_s15), 0  ;;  %p159_p3 = pnand %p410_p0, %p158_p2 }
   0x6   : > { %p191_p4 = scmp.lt.s32.totalorder (!%p159_p3), %s505_s12, 1 }
   0x7   : > { %162 = sbr.rel (%p159_p3) target bundleno = 186 (0xba), region = 32 }
   0xc   : > { %v220_v0 = vld [vmem:[%s581_s2] sm:$0xff]  ;;  %v515_v1 = vmov 0   ;;  %s588_s12 = smov (!%p191_p4, %s505_s12), 1  ;;  %vm266_vm0 = vcmask 523264   ;;  %vm315_vm1 = vcmask 1043456   ;;  %vm316_vm2 = vcmask 64516  }
   0xd   : > { %486 = vset.pattern.permute.xlu0 %v515_v1  ;;  %s451_s18 = sshll.u32 %s588_s12, 6  ;;  %v211_v26 = vld [vmem:[%s580_s1] sm:$0xf]  ;;  %s452_s24 = sshll.u32 %s588_s12, 3  ;;  %vm317_vm3 = vmor %vm316_vm2, %vm315_vm1 }
   0xe   : > { %223 = vperm.xlu0 %486, %v220_v0   ;;  %s198_s21 = scalar_lea.vmem %s579_s0, %s451_s18  ;;  %s208_s27 = scalar_lea.vmem %s582_s3, %s452_s24 }
   0xf   : > { %v441_v2 = vld [vmem:[%s198_s21 + $0x30] sm:$0xf]  ;;  %v460_v3 = vld [vmem:[%s198_s21 + $0x34] sm:$0xf0]  ;;  %v459_v4 = vld [vmem:[%s198_s21 + $0x34] sm:$0xf] }
  0x10   : > { %v442_v5 = vor.u32 %v460_v3, %v441_v2  ;;  %v443_v6 = vld [vmem:[%s198_s21 + $0x38] sm:$0xf0]  ;;  %v433_v7 = vld [vmem:[%s198_s21 + $0x20] sm:$0xf]  ;;  %v458_v8 = vld [vmem:[%s198_s21 + $0x24] sm:$0xf0] }
  0x11   : > { %v446_v9 = vor.u32 %v459_v4, %v443_v6  ;;  %v457_v10 = vld [vmem:[%s198_s21 + $0x24] sm:$0xf]  ;;  %v435_v11 = vld [vmem:[%s198_s21 + $0x28] sm:$0xf0]  ;;  %v434_v12 = vor.u32 %v458_v8, %v433_v7  ;;  %v425_v14 = vld [vmem:[%s198_s21 + $0x10] sm:$0xf] }
  0x12   : > { %274 = vmatpush.bf16.msra.mxu0 %v442_v5  ;;  %v438_v13 = vor.u32 %v457_v10, %v435_v11  ;;  %v456_v15 = vld [vmem:[%s198_s21 + $0x14] sm:$0xf0]  ;;  %v455_v16 = vld [vmem:[%s198_s21 + $0x14] sm:$0xf]  ;;  %v427_v17 = vld [vmem:[%s198_s21 + $0x18] sm:$0xf0] }
  0x13   : > { %287 = vmatpush.bf16.msra.mxu1 %v446_v9  ;;  %v426_v18 = vor.u32 %v456_v15, %v425_v14  ;;  %v430_v19 = vor.u32 %v455_v16, %v427_v17  ;;  %v417_v20 = vld [vmem:[%s198_s21] sm:$0xf]  ;;  %v454_v21 = vld [vmem:[%s198_s21 + $0x4] sm:$0xf0]  ;;  %v453_v22 = vld [vmem:[%s198_s21 + $0x4] sm:$0xf] }
  0x14   : > { %v419_v23 = vld [vmem:[%s198_s21 + $0x8] sm:$0xf0]  ;;  %v418_v24 = vor.u32 %v454_v21, %v417_v20 }
  0x15   : > { %v422_v25 = vor.u32 %v453_v22, %v419_v23 }
  0x16   : > { %275 = vmatpush.bf16.msra.mxu0 %v434_v12 }
  0x17   : > { %288 = vmatpush.bf16.msra.mxu1 %v438_v13 }
  0x1a   : > { %276 = vmatpush.bf16.msra.mxu0 %v426_v18 }
  0x1b   : > { %289 = vmatpush.bf16.msra.mxu1 %v430_v19 }
  0x1e   : > { %277 = vmatpush.bf16.msra.mxu0 %v418_v24 }
  0x1f   : > { %290 = vmatpush.bf16.msra.mxu1 %v422_v25 }
  0x21   : > { %447 = vmatmul.msk.bf16.vlgmr.msra.gmra.mxu0 %vm266_vm0, %v211_v26 }
  0x22   : > { %448 = vmatmul.msk.bf16.vlgmr.msra.gmra.mxu1 %vm266_vm0, %v211_v26 }
  0x80   : > { %v224_v27 = vpop.permute.xlu0 %223 }
  0x9e   : > { %v279_v28 = vpop.f32.mrf.mxu0 }
  0x9f   : > { %v280_v29 = vadd.f32 %v279_v28, %v224_v27  ;;  %v292_v30 = vpop.f32.mrf.mxu1 }
  0xa0   : > { %v293_v31 = vadd.f32 %v292_v30, %v224_v27 }
  0xa1   : > { %v298_v32 = vmul.f32 0.044715, %v280_v29  ;;  %v296_v46 = vmul.f32 0.5, %v280_v29 }
  0xa2   : > { %v299_v33 = vmul.f32 0.044715, %v293_v31  ;;  %v297_v48 = vmul.f32 0.5, %v293_v31 }
  0xa3   : > { %v300_v34 = vmul.f32 %v298_v32, %v280_v29 }
  0xa4   : > { %v301_v35 = vmul.f32 %v299_v33, %v293_v31 }
  0xa5   : > { %v302_v36 = vmul.f32 %v300_v34, %v280_v29 }
  0xa6   : > { %v303_v37 = vmul.f32 %v301_v35, %v293_v31  ;;  %v281_v38 = vpop.f32.mrf.mxu0 }
  0xa7   : > { %v304_v39 = vadd.f32 %v302_v36, %v280_v29  ;;  %v294_v40 = vpop.f32.mrf.mxu1 }
  0xa8   : > { %v305_v41 = vadd.f32 %v303_v37, %v293_v31 }
  0xa9   : > { %v306_v42 = vmul.f32 0.7978846, %v304_v39 }
  0xaa   : > { %v307_v43 = vmul.f32 0.7978846, %v305_v41 }
  0xab   : > { %487 = vtanh.f32 %v306_v42 }
  0xac   : > { %489 = vtanh.f32 %v307_v43 }
  0xb1   : > { %v488_v44 = vpop.eup %487 }
  0xb2   : > { %v490_v45 = vpop.eup %489  ;;  %v310_v47 = vadd.f32 1.0, %v488_v44 }
  0xb3   : > { %v311_v49 = vadd.f32 1.0, %v490_v45 }
  0xb4   : > { %v312_v50 = vmul.f32 %v310_v47, %v296_v46 }
  0xb5   : > { %v313_v51 = vmul.f32 %v311_v49, %v297_v48 }
  0xb7   : > { %v314_v52 = vpack.c.bf16 %v313_v51, %v312_v50 }
  0xb9   : > { %318 = vst.msk [vmem:[%s208_s27] sm:$0xff] %vm317_vm3, %v314_v52 }
  0xba PF: > { %s13_s14 = sadd.s32 1, %s513_s14   ;;  %s583_s12 = smov %s509_s13 }
  0xbb   : > { %p10_p5 = scmp.ge.s32.totalorder %s13_s14, 4   ;;  %s584_s13 = smov %s586_s15 }
  0xbd   :  { %12 = sbr.rel (!%p10_p5) target bundleno = 2 (0x2), region = 62 }

// kernel: _lambda_.15
= control target key start
LH: loop header
LB: loop body
LE: loop exit
PB: predicated region body
PF: predicated region fallthrough
CT: control target
= control target key end

     0   :  { %s662_s21 = smov 0   ;;  %s664_s22 = smov 0   ;;  %s723_s0 = inlined_call_operand.vmem [shape: bf16[2,8,136], index: 0, kind: input, shape index: {}]   ;;  %s724_s1 = inlined_call_operand.vmem [shape: bf16[8,8], index: 1, kind: input, shape index: {}]   ;;  %s725_s2 = inlined_call_operand.vmem [shape: bf16[8,8], index: 2, kind: input, shape index: {}]   ;;  %s726_s3 = inlined_call_operand.vmem [shape: f32[8,1], index: 3, kind: input, shape index: {}]   ;;  %s727_s4 = inlined_call_operand.vmem [shape: f32[8,1], index: 4, kind: input, shape index: {}]   ;;  %s728_s5 = inlined_call_operand.vmem [shape: f32[8,136], index: 5, kind: input, shape index: {}]   ;;  %s729_s6 = inlined_call_operand.vmem [shape: bf16[2,8,136], index: 6, kind: output, shape index: {}]  }
   0x1   :  { %s666_s23 = smov 0  }
   0x2 LB: > { %s28_s24 = sadd.s32 1, %s620_s22  ;;  %p555_p0 = scmp.ge.s32.totalorder %s624_s23, 1  ;;  %s624_s23 = sphi %s666_s23, %s16_s23   ;;  %s620_s22 = sphi %s664_s22, %s731_s22   ;;  %s616_s21 = sphi %s662_s21, %s730_s21  }
   0x3   : > { %p30_p1 = scmp.ge.s32.totalorder %s28_s24, 2  ;;  %p244_p2 = scmp.lt.s32.totalorder %s624_s23, 3 }
   0x5   : > { %s733_s24 = smov (%p30_p1, %s28_s24), 0  ;;  %p245_p3 = pnand %p555_p0, %p244_p2 }
   0x6   : > { %p288_p4 = scmp.lt.s32.totalorder (!%p245_p3), %s616_s21, 1 }
   0x7   : > { %248 = sbr.rel (%p245_p3) target bundleno = 196 (0xc4), region = 44 }
   0xc   : > { %v365_v0 = vld [vmem:[%s727_s4] sm:$0xff]  ;;  %s735_s21 = smov (!%p288_p4, %s616_s21), 1  ;;  %v626_v1 = vmov 0   ;;  %vm331_vm0 = vcmask 1043456   ;;  %vm327_vm1 = vcmask 64512   ;;  %v441_v56 = vld [vmem:[%s728_s5 + $0x8] sm:$0xff] }
   0xd   : > { %593 = vset.pattern.permute.xlu0 %v626_v1  ;;  %s566_s27 = sshll.u32 %s735_s21, 3  ;;  %v316_v5 = vld [vmem:[%s726_s3] sm:$0xff]  ;;  %vm445_vm10 = vcmask 64516  }
   0xe   : > { %368 = vperm.xlu0 %593, %v365_v0   ;;  %s295_s30 = scalar_lea.vmem %s723_s0, %s566_s27  ;;  %v364_v10 = vld [vmem:[%s725_s2] sm:$0xf]  ;;  %s311_s19 = scalar_lea.vmem %s729_s6, %s566_s27  ;;  %vm446_vm11 = vmor %vm445_vm10, %vm331_vm0 }
   0xf   : > { %v314_v2 = vld [vmem:[%s295_s30] sm:$0xff] }
  0x10   : > { %v323_v3 = vunpack.c.l.b16 %v314_v2  ;;  %v324_v4 = vunpack.c.h.b16 %v314_v2  ;;  %v315_v11 = vld [vmem:[%s724_s1] sm:$0xf] }
  0x11   : > { %v440_v52 = vld [vmem:[%s728_s5] sm:$0xff] }
  0x12   : > { %v325_v6 = vpack.c.b16 %v323_v3, %v323_v3  ;;  %v326_v7 = vpack.c.b16 %v324_v4, %v324_v4 }
  0x14   : > { %v333_v8 = vsel %vm331_vm0, %v325_v6, 0  ;;  %v336_v9 = vsel %vm331_vm0, %v326_v7, 0 }
  0x15   : > { %381 = vmatpush.bf16.msra.mxu2 %v333_v8  ;;  %394 = vmatpush.bf16.msra.mxu3 %v336_v9 }
  0x16   : > { %319 = vperm.xlu0 %593, %v316_v5   ;;  %345 = vmatpush.bf16.msra.mxu0 %v333_v8 }
  0x17   : > { %358 = vmatpush.bf16.msra.mxu1 %v336_v9 }
  0x18   : > { %562 = vmatmul.msk.bf16.vlgmr.msra.gmra.mxu2 %vm327_vm1, %v364_v10  ;;  %563 = vmatmul.msk.bf16.vlgmr.msra.gmra.mxu3 %vm327_vm1, %v364_v10 }
  0x19   : > { %560 = vmatmul.msk.bf16.vlgmr.msra.gmra.mxu0 %vm327_vm1, %v315_v11 }
  0x1a   : > { %561 = vmatmul.msk.bf16.vlgmr.msra.gmra.mxu1 %vm327_vm1, %v315_v11 }
  0x80   : > { %v369_v14 = vpop.permute.xlu0 %368 }
  0x88   : > { %v320_v41 = vpop.permute.xlu0 %319 }
  0x96   : > { %v347_v12 = vpop.f32.mrf.mxu0 }
  0x97   : > { %v360_v13 = vpop.f32.mrf.mxu1  ;;  %v348_v47 = vadd.f32 %v347_v12, %v320_v41 }
  0x98   : > { %v361_v50 = vadd.f32 %v360_v13, %v320_v41 }
  0x9b   : > { %v383_v15 = vpop.f32.mrf.mxu2  ;;  %v396_v16 = vpop.f32.mrf.mxu3 }
  0x9c   : > { %v384_v17 = vadd.f32 %v383_v15, %v369_v14  ;;  %v397_v18 = vadd.f32 %v396_v16, %v369_v14 }
  0x9e   : > { %v400_v19 = vsub.f32 0.0, %v384_v17  ;;  %v401_v20 = vsub.f32 0.0, %v397_v18  ;;  %v349_v21 = vpop.f32.mrf.mxu0 }
  0x9f   : > { %v362_v22 = vpop.f32.mrf.mxu1 }
  0xa0   : > { %v402_v23 = vmul.f32 1.442695, %v400_v19  ;;  %v404_v24 = vmul.f32 1.442695, %v401_v20 }
  0xa2   : > { %594 = vpow2.f32 %v402_v23 }
  0xa3   : > { %596 = vpow2.f32 %v404_v24  ;;  %v385_v25 = vpop.f32.mrf.mxu2  ;;  %v398_v26 = vpop.f32.mrf.mxu3 }
  0xa8   : > { %v595_v27 = vpop.eup %594 }
  0xa9   : > { %v597_v28 = vpop.eup %596  ;;  %v406_v29 = vadd.f32 1.0, %v595_v27 }
  0xaa   : > { %v407_v30 = vadd.f32 1.0, %v597_v28 }
  0xab   : > { %598 = vrcp.f32 %v406_v29  ;;  %v419_v36 = vand.u32 2147483648, %v406_v29  ;;  %v417_v39 = vand.u32 2147483647, %v406_v29  ;;  %vm413_vm4 = vweird.f32 %v406_v29 }
  0xac   : > { %600 = vrcp.f32 %v407_v30  ;;  %v434_v40 = vand.u32 2147483648, %v407_v30  ;;  %v432_v43 = vand.u32 2147483647, %v407_v30  ;;  %vm428_vm6 = vweird.f32 %v407_v30 }
  0xad   : > { %v420_v45 = vor.u32 1.1754944e-38, %v419_v36  ;;  %vm418_vm7 = vcmp.eq.f32.partialorder %v417_v39, 8.507059e+37 }
  0xae   : > { %v435_v49 = vor.u32 1.1754944e-38, %v434_v40  ;;  %vm433_vm9 = vcmp.eq.f32.partialorder %v432_v43, 8.507059e+37 }
  0xb1   : > { %v599_v31 = vpop.eup %598 }
  0xb2   : > { %v601_v32 = vpop.eup %600  ;;  %v409_v33 = vmul.f32 %v599_v31, %v406_v29  ;;  %vm414_vm2 = vweird.f32 %v599_v31 }
  0xb3   : > { %v424_v34 = vmul.f32 %v601_v32, %v407_v30  ;;  %vm429_vm3 = vweird.f32 %v601_v32  ;;  %vm415_vm5 = vmor %vm413_vm4, %vm414_vm2 }
  0xb4   : > { %v410_v35 = vsub.f32 1.0, %v409_v33  ;;  %vm430_vm8 = vmor %vm428_vm6, %vm429_vm3 }
  0xb5   : > { %v425_v37 = vsub.f32 1.0, %v424_v34 }
  0xb6   : > { %v411_v38 = vmul.f32 %v599_v31, %v410_v35 }
  0xb7   : > { %v426_v42 = vmul.f32 %v601_v32, %v425_v37 }
  0xb8   : > { %v412_v44 = vadd.f32 %v599_v31, %v411_v38 }
  0xb9   : > { %v427_v46 = vadd.f32 %v601_v32, %v426_v42 }
  0xba   : > { %v416_v48 = vsel %vm415_vm5, %v599_v31, %v412_v44 }
  0xbb   : > { %v421_v51 = vsel %vm418_vm7, %v420_v45, %v416_v48  ;;  %v431_v53 = vsel %vm430_vm8, %v601_v32, %v427_v46 }
  0xbc   : > { %v438_v54 = vmul.f32 %v421_v51, %v348_v47  ;;  %v436_v55 = vsel %vm433_vm9, %v435_v49, %v431_v53 }
  0xbd   : > { %v439_v57 = vmul.f32 %v436_v55, %v361_v50 }
  0xbe   : > { %v442_v58 = vadd.f32 %v440_v52, %v438_v54 }
  0xbf   : > { %v443_v59 = vadd.f32 %v441_v56, %v439_v57 }
  0xc1   : > { %v444_v60 = vpack.c.bf16 %v443_v59, %v442_v58 }
  0xc3   : > { %447 = vst.msk [vmem:[%s311_s19] sm:$0xff] %vm446_vm11, %v444_v60 }
  0xc4 PF: > { %s16_s23 = sadd.s32 1, %s624_s23   ;;  %s730_s21 = smov %s620_s22 }
  0xc5   : > { %p13_p5 = scmp.ge.s32.totalorder %s16_s23, 4   ;;  %s731_s22 = smov %s733_s24 }
  0xc7   :  { %15 = sbr.rel (!%p13_p5) target bundleno = 2 (0x2), region = 77 }

// kernel: _lambda_.16
= control target key start
LH: loop header
LB: loop body
LE: loop exit
PB: predicated region body
PF: predicated region fallthrough
CT: control target
= control target key end

     0   :  { %s672_s18 = smov 0   ;;  %s674_s19 = smov 0   ;;  %s729_s0 = inlined_call_operand.vmem [shape: bf16[2,64,68], index: 0, kind: input, shape index: {}]   ;;  %s730_s1 = inlined_call_operand.vmem [shape: bf16[16,64], index: 1, kind: input, shape index: {}]   ;;  %s731_s2 = inlined_call_operand.vmem [shape: f32[16,1], index: 2, kind: input, shape index: {}]   ;;  %s732_s3 = inlined_call_operand.vmem [shape: bf16[2,16,68], index: 3, kind: output, shape index: {0}]   ;;  %s733_s4 = inlined_call_operand.vmem [shape: f32[2,16,1], index: 4, kind: output, shape index: {1}]   ;;  %s734_s5 = inlined_call_operand.vmem [shape: f32[2,16,1], index: 5, kind: output, shape index: {2}]  }
   0x1   :  { %s676_s20 = smov 0  }
   0x2 LB: > { %s28_s21 = sadd.s32 1, %s635_s19  ;;  %p550_p0 = scmp.ge.s32.totalorder %s639_s20, 1  ;;  %s639_s20 = sphi %s676_s20, %s16_s20   ;;  %s635_s19 = sphi %s674_s19, %s736_s19   ;;  %s631_s18 = sphi %s672_s18, %s735_s18  }
   0x3   : > { %p30_p1 = scmp.ge.s32.totalorder %s28_s21, 2  ;;  %p211_p2 = scmp.lt.s32.totalorder %s639_s20, 3 }
   0x5   : > { %s738_s21 = smov (%p30_p1, %s28_s21), 0  ;;  %p212_p3 = pnand %p550_p0, %p211_p2 }
   0x6   : > { %p255_p4 = scmp.lt.s32.totalorder (!%p212_p3), %s631_s18, 1 }
   0x7   : > { %215 = sbr.rel (%p212_p3) target bundleno = 287 (0x11f), region = 32 }
   0xc   : > { %v292_v0 = vld [vmem:[%s731_s2] sm:$0xff]  ;;  %v641_v1 = vmov 0   ;;  %s740_s18 = smov (!%p255_p4, %s631_s18), 1  ;;  %v293_v3 = vld [vmem:[%s731_s2 + $0x8] sm:$0xff]  ;;  %vm333_vm0 = vcmask 523264   ;;  %vm356_vm1 = vcmask 556032  }
   0xd   : > { %616 = vset.pattern.permute.xlu0 %v641_v1  ;;  %s582_s24 = sshll.u32 %s740_s18, 5  ;;  %v586_v7 = vld [vmem:[%s730_s1] sm:$0xff]  ;;  %s583_s7 = sshll.u32 %s740_s18, 3  ;;  %vm353_vm2 = vcmask 551936   ;;  %vm375_vm3 = vcmask 7168  }
   0xe   : > { %296 = vperm.xlu0 %616, %v292_v0   ;;  %s262_s27 = scalar_lea.vmem %s729_s0, %s582_s24  ;;  %s270_s10 = scalar_lea.vmem %s732_s3, %s583_s7 }
   0xf   : > { %v590_v2 = vld [vmem:[%s262_s27 + $0x18] sm:$0xff]  ;;  %v589_v4 = vld [vmem:[%s262_s27 + $0x10] sm:$0xff]  ;;  %v588_v5 = vld [vmem:[%s262_s27 + $0x8] sm:$0xff]  ;;  %s584_s11 = sshll.u32 %s740_s18, 4 }
  0x10   : > { %341 = vmatpush.bf16.msra.mxu0 %v590_v2  ;;  %v587_v6 = vld [vmem:[%s262_s27] sm:$0xff]  ;;  %s275_s14 = scalar_lea.vmem %s733_s4, %s584_s11  ;;  %s280_s17 = scalar_lea.vmem %s734_s5, %s584_s11 }
  0x14   : > { %342 = vmatpush.bf16.msra.mxu0 %v589_v4 }
  0x16   : > { %301 = vperm.xlu0 %616, %v293_v3  }
  0x18   : > { %343 = vmatpush.bf16.msra.mxu0 %v588_v5 }
  0x1c   : > { %344 = vmatpush.bf16.msra.mxu0 %v587_v6 }
  0x1f   : > { %579 = vmatmul.msk.bf16.vlgmr.msra.gmra.mxu0 %vm333_vm0, %v586_v7 }
  0x80   : > { %v297_v8 = vpop.permute.xlu0 %296 }
  0x88   : > { %v302_v15 = vpop.permute.xlu0 %301 }
  0x9c   : > { %v346_v9 = vpop.f32.mrf.mxu0 }
  0x9d   : > { %v347_v10 = vadd.f32 %v346_v9, %v297_v8 }
  0x9f   : > { %v351_v11 = vpack.c.bf16 %v347_v10, %v347_v10  ;;  %v357_v12 = vsel %vm356_vm1, %v347_v10, 0.0  ;;  %v363_v13 = vmul.f32 %v347_v10, %v347_v10 }
  0xa0   : > { %358 = vadd.xlane.f32.xlu1 %v357_v12 }
  0xa1   : > { %354 = vst.msk [vmem:[%s270_s10] sm:$0xf] %vm353_vm2, %v351_v11  ;;  %v365_v14 = vsel %vm356_vm1, %v363_v13, 0.0 }
  0xa2   : > { %366 = vadd.xlane.f32.xlu2 %v365_v14 }
  0xa4   : > { %v348_v16 = vpop.f32.mrf.mxu0 }
  0xa5   : > { %v349_v17 = vadd.f32 %v348_v16, %v302_v15 }
  0xa7   : > { %v352_v18 = vpack.c.bf16 %v349_v17, %v349_v17  ;;  %v360_v19 = vsel %vm356_vm1, %v349_v17, 0.0  ;;  %v364_v20 = vmul.f32 %v349_v17, %v349_v17 }
  0xa8   : > { %361 = vadd.xlane.f32.xlu1 %v360_v19 }
  0xa9   : > { %355 = vst.msk [vmem:[%s270_s10 + $0x4] sm:$0xf] %vm353_vm2, %v352_v18  ;;  %v368_v21 = vsel %vm356_vm1, %v364_v20, 0.0 }
  0xaa   : > { %369 = vadd.xlane.f32.xlu2 %v368_v21 }
 0x113   : > { %v359_v22 = vpop.xlane.xlu1 %358 }
 0x114   : > { %376 = vst.msk [vmem:[%s275_s14] sm:$0xff] %vm375_vm3, %v359_v22 }
 0x115   : > { %v367_v23 = vpop.xlane.xlu2 %366 }
 0x116   : > { %378 = vst.msk [vmem:[%s280_s17] sm:$0xff] %vm375_vm3, %v367_v23 }
 0x11b   : > { %v362_v24 = vpop.xlane.xlu1 %361 }
 0x11c   : > { %377 = vst.msk [vmem:[%s275_s14 + $0x8] sm:$0xff] %vm375_vm3, %v362_v24 }
 0x11d   : > { %v370_v25 = vpop.xlane.xlu2 %369 }
 0x11e   : > { %379 = vst.msk [vmem:[%s280_s17 + $0x8] sm:$0xff] %vm375_vm3, %v370_v25 }
 0x11f PF: > { %s16_s20 = sadd.s32 1, %s639_s20   ;;  %s735_s18 = smov %s635_s19 }
 0x120   : > { %p13_p5 = scmp.ge.s32.totalorder %s16_s20, 4   ;;  %s736_s19 = smov %s738_s21 }
 0x122   :  { %15 = sbr.rel (!%p13_p5) target bundleno = 2 (0x2), region = 94 }

// kernel: _lambda_.17
= control target key start
LH: loop header
LB: loop body
LE: loop exit
PB: predicated region body
PF: predicated region fallthrough
CT: control target
= control target key end

     0   :  { %s503_s12 = smov 0   ;;  %s505_s13 = smov 0   ;;  %s550_s0 = inlined_call_operand.vmem [shape: bf16[2,16,68], index: 0, kind: input, shape index: {}]   ;;  %s551_s1 = inlined_call_operand.vmem [shape: f32[2,16,1], index: 1, kind: input, shape index: {}]   ;;  %s552_s2 = inlined_call_operand.vmem [shape: f32[2,16,1], index: 2, kind: input, shape index: {}]   ;;  %s553_s3 = inlined_call_operand.vmem [shape: bf16[2,16,68], index: 3, kind: output, shape index: {}]  }
   0x1   :  { %s507_s14 = smov 0  }
   0x2 LB: > { %s25_s15 = sadd.s32 1, %s476_s13  ;;  %p408_p0 = scmp.ge.s32.totalorder %s480_s14, 1  ;;  %s480_s14 = sphi %s507_s14, %s13_s14   ;;  %s476_s13 = sphi %s505_s13, %s555_s13   ;;  %s472_s12 = sphi %s503_s12, %s554_s12  }
   0x3   : > { %p27_p1 = scmp.ge.s32.totalorder %s25_s15, 2  ;;  %p176_p2 = scmp.lt.s32.totalorder %s480_s14, 3 }
   0x5   : > { %s557_s15 = smov (%p27_p1, %s25_s15), 0  ;;  %p177_p3 = pnand %p408_p0, %p176_p2 }
   0x6   : > { %p216_p4 = scmp.lt.s32.totalorder (!%p177_p3), %s472_s12, 1 }
   0x7   : > { %180 = sbr.rel (%p177_p3) target bundleno = 168 (0xa8), region = 32 }
   0xc   : > { %v482_v0 = vmov 0   ;;  %s559_s12 = smov (!%p216_p4, %s472_s12), 1  ;;  %vm294_vm0 = vcmask 551936  }
   0xd   : > { %453 = vset.pattern.permute.xlu1 %v482_v0  ;;  %452 = vset.pattern.permute.xlu0 %v482_v0  ;;  %s420_s16 = sshll.u32 %s559_s12, 4  ;;  %s419_s23 = sshll.u32 %s559_s12, 3 }
   0xe   : > { %s233_s19 = scalar_lea.vmem %s552_s2, %s420_s16  ;;  %s228_s22 = scalar_lea.vmem %s551_s1, %s420_s16 }
   0xf   : > { %v260_v1 = vld [vmem:[%s233_s19] sm:$0xff]  ;;  %v261_v3 = vld [vmem:[%s233_s19 + $0x8] sm:$0xff]  ;;  %s223_s26 = scalar_lea.vmem %s550_s0, %s419_s23  ;;  %s241_s29 = scalar_lea.vmem %s553_s3, %s419_s23 }
  0x10   : > { %v246_v2 = vld [vmem:[%s228_s22] sm:$0xff]  ;;  %264 = vperm.xlu1 %453, %v260_v1   ;;  %v247_v4 = vld [vmem:[%s228_s22 + $0x8] sm:$0xff] }
  0x11   : > { %250 = vperm.xlu0 %452, %v246_v2   ;;  %v424_v5 = vld [vmem:[%s223_s26] sm:$0xff]  }
  0x12   : > { %v425_v6 = vunpack.c.l.bf16 %v424_v5  ;;  %v426_v12 = vunpack.c.h.bf16 %v424_v5 }
  0x18   : > { %269 = vperm.xlu1 %453, %v261_v3  }
  0x19   : > { %255 = vperm.xlu0 %452, %v247_v4  }
  0x82   : > { %v265_v7 = vpop.permute.xlu1 %264 }
  0x83   : > { %v251_v8 = vpop.permute.xlu0 %250 }
  0x84   : > { %v258_v9 = vmul.f32 %v425_v6, %v251_v8 }
  0x86   : > { %v272_v10 = vadd.f32 %v265_v7, %v258_v9 }
  0x88   : > { %v276_v11 = vmul.f32 0.044715, %v272_v10  ;;  %v274_v27 = vmul.f32 0.5, %v272_v10 }
  0x8a   : > { %v278_v13 = vmul.f32 %v276_v11, %v272_v10  ;;  %v270_v17 = vpop.permute.xlu1 %269 }
  0x8b   : > { %v256_v14 = vpop.permute.xlu0 %255 }
  0x8c   : > { %v280_v15 = vmul.f32 %v278_v13, %v272_v10  ;;  %v259_v16 = vmul.f32 %v426_v12, %v256_v14 }
  0x8e   : > { %v282_v18 = vadd.f32 %v280_v15, %v272_v10  ;;  %v273_v19 = vadd.f32 %v270_v17, %v259_v16 }
  0x90   : > { %v284_v20 = vmul.f32 0.7978846, %v282_v18  ;;  %v277_v21 = vmul.f32 0.044715, %v273_v19  ;;  %v275_v32 = vmul.f32 0.5, %v273_v19 }
  0x92   : > { %454 = vtanh.f32 %v284_v20  ;;  %v279_v22 = vmul.f32 %v277_v21, %v273_v19 }
  0x94   : > { %v281_v23 = vmul.f32 %v279_v22, %v273_v19 }
  0x96   : > { %v283_v24 = vadd.f32 %v281_v23, %v273_v19 }
  0x98   : > { %v455_v25 = vpop.eup %454  ;;  %v285_v26 = vmul.f32 0.7978846, %v283_v24 }
  0x99   : > { %v288_v28 = vadd.f32 1.0, %v455_v25 }
  0x9a   : > { %456 = vtanh.f32 %v285_v26 }
  0x9b   : > { %v290_v29 = vmul.f32 %v288_v28, %v274_v27 }
  0x9d   : > { %v292_v30 = vpack.c.bf16 %v290_v29, %v290_v29 }
  0x9f   : > { %295 = vst.msk [vmem:[%s241_s29] sm:$0xf] %vm294_vm0, %v292_v30 }
  0xa0   : > { %v457_v31 = vpop.eup %456 }
  0xa1   : > { %v289_v33 = vadd.f32 1.0, %v457_v31 }
  0xa3   : > { %v291_v34 = vmul.f32 %v289_v33, %v275_v32 }
  0xa5   : > { %v293_v35 = vpack.c.bf16 %v291_v34, %v291_v34 }
  0xa7   : > { %296 = vst.msk [vmem:[%s241_s29 + $0x4] sm:$0xf] %vm294_vm0, %v293_v35 }
  0xa8 PF: > { %s13_s14 = sadd.s32 1, %s480_s14   ;;  %s554_s12 = smov %s476_s13 }
  0xa9   : > { %p10_p5 = scmp.ge.s32.totalorder %s13_s14, 4   ;;  %s555_s13 = smov %s557_s15 }
  0xab   :  { %12 = sbr.rel (!%p10_p5) target bundleno = 2 (0x2), region = 68 }

// kernel: _lambda_.18
= control target key start
LH: loop header
LB: loop body
LE: loop exit
PB: predicated region body
PF: predicated region fallthrough
CT: control target
= control target key end

     0   :  { %s702_s18 = smov 0   ;;  %s704_s19 = smov 0   ;;  %s784_s0 = inlined_call_operand.vmem [shape: bf16[2,16,68], index: 0, kind: input, shape index: {}]   ;;  %s785_s1 = inlined_call_operand.vmem [shape: bf16[32,16], index: 1, kind: input, shape index: {}]   ;;  %s786_s2 = inlined_call_operand.vmem [shape: f32[32,1], index: 2, kind: input, shape index: {}]   ;;  %s787_s3 = inlined_call_operand.vmem [shape: bf16[2,32,68], index: 3, kind: output, shape index: {0}]   ;;  %s788_s4 = inlined_call_operand.vmem [shape: f32[2,32,1], index: 4, kind: output, shape index: {1}]   ;;  %s789_s5 = inlined_call_operand.vmem [shape: f32[2,32,1], index: 5, kind: output, shape index: {2}]  }
   0x1   :  { %s706_s20 = smov 0  }
   0x2 LB: > { %s28_s21 = sadd.s32 1, %s665_s19  ;;  %p587_p0 = scmp.ge.s32.totalorder %s669_s20, 1  ;;  %s669_s20 = sphi %s706_s20, %s16_s20   ;;  %s665_s19 = sphi %s704_s19, %s791_s19   ;;  %s661_s18 = sphi %s702_s18, %s790_s18  }
   0x3   : > { %p30_p1 = scmp.ge.s32.totalorder %s28_s21, 2  ;;  %p211_p2 = scmp.lt.s32.totalorder %s669_s20, 3 }
   0x5   : > { %s793_s21 = smov (%p30_p1, %s28_s21), 0  ;;  %p212_p3 = pnand %p587_p0, %p211_p2 }
   0x6   : > { %p255_p4 = scmp.lt.s32.totalorder (!%p212_p3), %s661_s18, 1 }
   0x7   : > { %215 = sbr.rel (%p212_p3) target bundleno = 305 (0x131), region = 32 }
   0xc   : > { %v288_v0 = vld [vmem:[%s786_s2] sm:$0xff]  ;;  %v671_v1 = vmov 0   ;;  %v290_v2 = vld [vmem:[%s786_s2 + $0x10] sm:$0xff]  ;;  %s795_s18 = smov (!%p255_p4, %s661_s18), 1  ;;  %v289_v5 = vld [vmem:[%s786_s2 + $0x8] sm:$0xff]  ;;  %vm328_vm0 = vcmask 130048  }
   0xd   : > { %645 = vset.pattern.permute.xlu0 %v671_v1  ;;  %646 = vset.pattern.permute.xlu1 %v671_v1  ;;  %s612_s26 = sshll.u32 %s795_s18, 3  ;;  %v616_v4 = vld [vmem:[%s785_s1] sm:$0xff]  ;;  %v617_v6 = vld [vmem:[%s785_s1 + $0x8] sm:$0xff]  ;;  %v291_v7 = vld [vmem:[%s786_s2 + $0x18] sm:$0xff]  ;;  %s613_s13 = sshll.u32 %s795_s18, 4  ;;  %vm363_vm1 = vcmask 556032  }
   0xe   : > { %294 = vperm.xlu0 %645, %v288_v0   ;;  %304 = vperm.xlu1 %646, %v290_v2   ;;  %s262_s29 = scalar_lea.vmem %s784_s0, %s612_s26  ;;  %s270_s16 = scalar_lea.vmem %s787_s3, %s613_s13  ;;  %vm358_vm2 = vcmask 551936   ;;  %vm396_vm3 = vcmask 7168  }
   0xf   : > { %v618_v3 = vld [vmem:[%s262_s29] sm:$0xff]  ;;  %s614_s17 = sshll.u32 %s795_s18, 5 }
  0x10   : > { %342 = vmatpush.bf16.msra.mxu0 %v618_v3  ;;  %619 = vmatpush.bf16.msra.mxu1 %v618_v3  ;;  %s275_s24 = scalar_lea.vmem %s788_s4, %s614_s17  ;;  %s280_s18 = scalar_lea.vmem %s789_s5, %s614_s17 }
  0x13   : > { %608 = vmatmul.msk.bf16.vlgmr.msra.gmra.mxu0 %vm328_vm0, %v616_v4  ;;  %609 = vmatmul.msk.bf16.vlgmr.msra.gmra.mxu1 %vm328_vm0, %v617_v6 }
  0x16   : > { %299 = vperm.xlu0 %645, %v289_v5   ;;  %309 = vperm.xlu1 %646, %v291_v7  }
  0x80   : > { %v305_v8 = vpop.permute.xlu1 %304  ;;  %v295_v9 = vpop.permute.xlu0 %294 }
  0x88   : > { %v310_v18 = vpop.permute.xlu1 %309  ;;  %v300_v19 = vpop.permute.xlu0 %299 }
  0x90   : > { %v344_v10 = vpop.f32.mrf.mxu0  ;;  %v349_v11 = vpop.f32.mrf.mxu1 }
  0x91   : > { %v345_v12 = vadd.f32 %v344_v10, %v295_v9  ;;  %v350_v13 = vadd.f32 %v349_v11, %v305_v8 }
  0x93   : > { %v354_v14 = vpack.c.bf16 %v345_v12, %v345_v12  ;;  %v364_v15 = vsel %vm363_vm1, %v345_v12, 0.0  ;;  %v356_v16 = vpack.c.bf16 %v350_v13, %v350_v13  ;;  %v370_v17 = vsel %vm363_vm1, %v350_v13, 0.0 }
  0x94   : > { %365 = vadd.xlane.f32.xlu2 %v364_v15  ;;  %371 = vadd.xlane.f32.xlu0 %v370_v17  ;;  %v376_v28 = vmul.f32 %v345_v12, %v345_v12  ;;  %v378_v30 = vmul.f32 %v350_v13, %v350_v13 }
  0x95   : > { %359 = vst.msk [vmem:[%s270_s16] sm:$0xf] %vm358_vm2, %v354_v14 }
  0x96   : > { %361 = vst.msk [vmem:[%s270_s16 + $0x8] sm:$0xf] %vm358_vm2, %v356_v16  ;;  %v380_v29 = vsel %vm363_vm1, %v376_v28, 0.0  ;;  %v386_v31 = vsel %vm363_vm1, %v378_v30, 0.0 }
  0x98   : > { %v346_v20 = vpop.f32.mrf.mxu0  ;;  %v351_v21 = vpop.f32.mrf.mxu1 }
  0x99   : > { %v347_v22 = vadd.f32 %v346_v20, %v300_v19  ;;  %v352_v23 = vadd.f32 %v351_v21, %v310_v18 }
  0x9b   : > { %v355_v24 = vpack.c.bf16 %v347_v22, %v347_v22  ;;  %v367_v25 = vsel %vm363_vm1, %v347_v22, 0.0  ;;  %v357_v26 = vpack.c.bf16 %v352_v23, %v352_v23  ;;  %v373_v27 = vsel %vm363_vm1, %v352_v23, 0.0 }
  0x9c   : > { %368 = vadd.xlane.f32.xlu2 %v367_v25  ;;  %374 = vadd.xlane.f32.xlu1 %v373_v27  ;;  %v377_v32 = vmul.f32 %v347_v22, %v347_v22  ;;  %v379_v34 = vmul.f32 %v352_v23, %v352_v23 }
  0x9d   : > { %360 = vst.msk [vmem:[%s270_s16 + $0x4] sm:$0xf] %vm358_vm2, %v355_v24 }
  0x9e   : > { %362 = vst.msk [vmem:[%s270_s16 + $0xc] sm:$0xf] %vm358_vm2, %v357_v26  ;;  %v383_v33 = vsel %vm363_vm1, %v377_v32, 0.0  ;;  %v389_v35 = vsel %vm363_vm1, %v379_v34, 0.0 }
  0xa4   : > { %381 = vadd.xlane.f32.xlu2 %v380_v29 }
  0xac   : > { %387 = vadd.xlane.f32.xlu2 %v386_v31 }
  0xb4   : > { %384 = vadd.xlane.f32.xlu2 %v383_v33 }
  0xbc   : > { %390 = vadd.xlane.f32.xlu2 %v389_v35 }
 0x107   : > { %v366_v36 = vpop.xlane.xlu2 %365  ;;  %v372_v37 = vpop.xlane.xlu0 %371 }
 0x108   : > { %397 = vst.msk [vmem:[%s275_s24] sm:$0xff] %vm396_vm3, %v366_v36 }
 0x109   : > { %399 = vst.msk [vmem:[%s275_s24 + $0x10] sm:$0xff] %vm396_vm3, %v372_v37 }
 0x10f   : > { %v369_v38 = vpop.xlane.xlu2 %368  ;;  %v375_v39 = vpop.xlane.xlu1 %374 }
 0x110   : > { %398 = vst.msk [vmem:[%s275_s24 + $0x8] sm:$0xff] %vm396_vm3, %v369_v38 }
 0x111   : > { %400 = vst.msk [vmem:[%s275_s24 + $0x18] sm:$0xff] %vm396_vm3, %v375_v39 }
 0x117   : > { %v382_v40 = vpop.xlane.xlu2 %381 }
 0x118   : > { %401 = vst.msk [vmem:[%s280_s18] sm:$0xff] %vm396_vm3, %v382_v40 }
 0x11f   : > { %v388_v41 = vpop.xlane.xlu2 %387 }
 0x120   : > { %403 = vst.msk [vmem:[%s280_s18 + $0x10] sm:$0xff] %vm396_vm3, %v388_v41 }
 0x127   : > { %v385_v42 = vpop.xlane.xlu2 %384 }
 0x128   : > { %402 = vst.msk [vmem:[%s280_s18 + $0x8] sm:$0xff] %vm396_vm3, %v385_v42 }
 0x12f   : > { %v391_v43 = vpop.xlane.xlu2 %390 }
 0x130   : > { %404 = vst.msk [vmem:[%s280_s18 + $0x18] sm:$0xff] %vm396_vm3, %v391_v43 }
 0x131 PF: > { %s16_s20 = sadd.s32 1, %s669_s20   ;;  %s790_s18 = smov %s665_s19 }
 0x132   : > { %p13_p5 = scmp.ge.s32.totalorder %s16_s20, 4   ;;  %s791_s19 = smov %s793_s21 }
 0x134   :  { %15 = sbr.rel (!%p13_p5) target bundleno = 2 (0x2), region = 94 }

// kernel: _lambda_.19
= control target key start
LH: loop header
LB: loop body
LE: loop exit
PB: predicated region body
PF: predicated region fallthrough
CT: control target
= control target key end

     0   :  { %s567_s12 = smov 0   ;;  %s569_s13 = smov 0   ;;  %s613_s0 = inlined_call_operand.vmem [shape: bf16[2,32,68], index: 0, kind: input, shape index: {}]   ;;  %s614_s1 = inlined_call_operand.vmem [shape: f32[2,32,1], index: 1, kind: input, shape index: {}]   ;;  %s615_s2 = inlined_call_operand.vmem [shape: f32[2,32,1], index: 2, kind: input, shape index: {}]   ;;  %s616_s3 = inlined_call_operand.vmem [shape: bf16[2,16,68], index: 3, kind: output, shape index: {}]  }
   0x1   :  { %s571_s14 = smov 0  }
   0x2 LB: > { %s25_s15 = sadd.s32 1, %s540_s13  ;;  %p462_p0 = scmp.ge.s32.totalorder %s544_s14, 1  ;;  %s544_s14 = sphi %s571_s14, %s13_s14   ;;  %s540_s13 = sphi %s569_s13, %s618_s13   ;;  %s536_s12 = sphi %s567_s12, %s617_s12  }
   0x3   : > { %p27_p1 = scmp.ge.s32.totalorder %s25_s15, 2  ;;  %p176_p2 = scmp.lt.s32.totalorder %s544_s14, 3 }
   0x5   : > { %s620_s15 = smov (%p27_p1, %s25_s15), 0  ;;  %p177_p3 = pnand %p462_p0, %p176_p2 }
   0x6   : > { %p216_p4 = scmp.lt.s32.totalorder (!%p177_p3), %s536_s12, 1 }
   0x7   : > { %180 = sbr.rel (%p177_p3) target bundleno = 179 (0xb3), region = 32 }
   0xc   : > { %v546_v0 = vmov 0   ;;  %s622_s12 = smov (!%p216_p4, %s536_s12), 1  ;;  %vm348_vm4 = vcmask 551936  }
   0xd   : > { %512 = vset.pattern.permute.xlu1 %v546_v0  ;;  %511 = vset.pattern.permute.xlu0 %v546_v0  ;;  %s474_s16 = sshll.u32 %s622_s12, 5  ;;  %s473_s23 = sshll.u32 %s622_s12, 4 }
   0xe   : > { %513 = vset.pattern.permute.xlu2 %v546_v0  ;;  %s233_s19 = scalar_lea.vmem %s615_s2, %s474_s16  ;;  %s228_s22 = scalar_lea.vmem %s614_s1, %s474_s16 }
   0xf   : > { %v280_v1 = vld [vmem:[%s233_s19 + $0x10] sm:$0xff]  ;;  %v250_v3 = vld [vmem:[%s228_s22] sm:$0xff]  ;;  %v281_v4 = vld [vmem:[%s233_s19 + $0x18] sm:$0xff]  ;;  %s223_s26 = scalar_lea.vmem %s613_s0, %s473_s23  ;;  %s476_s27 = sshll.u32 %s622_s12, 3 }
  0x10   : > { %v252_v2 = vld [vmem:[%s228_s22 + $0x10] sm:$0xff]  ;;  %294 = vperm.xlu1 %512, %v280_v1   ;;  %256 = vperm.xlu2 %513, %v250_v3   ;;  %v253_v5 = vld [vmem:[%s228_s22 + $0x18] sm:$0xff]  ;;  %v251_v6 = vld [vmem:[%s228_s22 + $0x8] sm:$0xff]  ;;  %s241_s30 = scalar_lea.vmem %s616_s3, %s476_s27 }
  0x11   : > { %266 = vperm.xlu0 %511, %v252_v2   ;;  %v279_v7 = vld [vmem:[%s233_s19 + $0x8] sm:$0xff]  ;;  %v278_v8 = vld [vmem:[%s233_s19] sm:$0xff] }
  0x12   : > { %v485_v9 = vld [vmem:[%s223_s26 + $0x8] sm:$0xff]   ;;  %v478_v26 = vld [vmem:[%s223_s26] sm:$0xff]  }
  0x13   : > { %v483_v10 = vunpack.c.l.bf16 %v485_v9  ;;  %v484_v16 = vunpack.c.h.bf16 %v485_v9  ;;  %v479_v31 = vunpack.c.l.bf16 %v478_v26  ;;  %v480_v41 = vunpack.c.h.bf16 %v478_v26 }
  0x18   : > { %299 = vperm.xlu1 %512, %v281_v4   ;;  %261 = vperm.xlu2 %513, %v251_v6  }
  0x19   : > { %271 = vperm.xlu0 %511, %v253_v5  }
  0x20   : > { %289 = vperm.xlu1 %512, %v279_v7  }
  0x21   : > { %284 = vperm.xlu0 %511, %v278_v8  }
  0x6a   : > { %v257_v28 = vpop.permute.xlu2 %256 }
  0x6b   : > { %v274_v35 = vmul.f32 %v479_v31, %v257_v28 }
  0x72   : > { %v262_v43 = vpop.permute.xlu2 %261 }
  0x73   : > { %v275_v50 = vmul.f32 %v480_v41, %v262_v43 }
  0x82   : > { %v295_v11 = vpop.permute.xlu1 %294 }
  0x83   : > { %v267_v12 = vpop.permute.xlu0 %266 }
  0x84   : > { %v276_v13 = vmul.f32 %v483_v10, %v267_v12 }
  0x86   : > { %v304_v14 = vadd.f32 %v295_v11, %v276_v13 }
  0x88   : > { %v306_v15 = vsub.f32 0.0, %v304_v14 }
  0x8a   : > { %v308_v17 = vmul.f32 1.442695, %v306_v15  ;;  %v300_v20 = vpop.permute.xlu1 %299 }
  0x8b   : > { %v272_v18 = vpop.permute.xlu0 %271 }
  0x8c   : > { %514 = vpow2.f32 %v308_v17  ;;  %v277_v19 = vmul.f32 %v484_v16, %v272_v18 }
  0x8e   : > { %v305_v21 = vadd.f32 %v300_v20, %v277_v19 }
  0x90   : > { %v307_v22 = vsub.f32 0.0, %v305_v21 }
  0x92   : > { %v515_v23 = vpop.eup %514  ;;  %v310_v24 = vmul.f32 1.442695, %v307_v22  ;;  %v290_v55 = vpop.permute.xlu1 %289 }
  0x93   : > { %v312_v25 = vadd.f32 1.0, %v515_v23  ;;  %v285_v38 = vpop.permute.xlu0 %284  ;;  %v303_v58 = vadd.f32 %v290_v55, %v275_v50 }
  0x94   : > { %516 = vpow2.f32 %v310_v24  ;;  %v302_v45 = vadd.f32 %v285_v38, %v274_v35 }
  0x95   : > { %518 = vrcp.f32 %v312_v25  ;;  %v325_v34 = vand.u32 2147483648, %v312_v25  ;;  %v323_v37 = vand.u32 2147483647, %v312_v25  ;;  %vm319_vm1 = vweird.f32 %v312_v25 }
  0x97   : > { %v326_v42 = vor.u32 1.1754944e-38, %v325_v34  ;;  %vm324_vm3 = vcmp.eq.f32.partialorder %v323_v37, 8.507059e+37 }
  0x9a   : > { %v517_v27 = vpop.eup %516 }
  0x9b   : > { %v519_v29 = vpop.eup %518  ;;  %v313_v30 = vadd.f32 1.0, %v517_v27 }
  0x9c   : > { %v315_v32 = vmul.f32 %v519_v29, %v312_v25  ;;  %vm320_vm0 = vweird.f32 %v519_v29 }
  0x9d   : > { %520 = vrcp.f32 %v313_v30  ;;  %vm321_vm2 = vmor %vm319_vm1, %vm320_vm0  ;;  %v340_v51 = vand.u32 2147483648, %v313_v30  ;;  %v338_v53 = vand.u32 2147483647, %v313_v30  ;;  %vm334_vm6 = vweird.f32 %v313_v30 }
  0x9e   : > { %v316_v33 = vsub.f32 1.0, %v315_v32 }
  0x9f   : > { %v341_v57 = vor.u32 1.1754944e-38, %v340_v51  ;;  %vm339_vm8 = vcmp.eq.f32.partialorder %v338_v53, 8.507059e+37 }
  0xa0   : > { %v317_v36 = vmul.f32 %v519_v29, %v316_v33 }
  0xa2   : > { %v318_v39 = vadd.f32 %v519_v29, %v317_v36 }
  0xa3   : > { %v521_v40 = vpop.eup %520 }
  0xa4   : > { %v330_v44 = vmul.f32 %v521_v40, %v313_v30  ;;  %v322_v46 = vsel %vm321_vm2, %v519_v29, %v318_v39  ;;  %vm335_vm5 = vweird.f32 %v521_v40 }
  0xa5   : > { %v327_v47 = vsel %vm324_vm3, %v326_v42, %v322_v46  ;;  %vm336_vm7 = vmor %vm334_vm6, %vm335_vm5 }
  0xa6   : > { %v331_v48 = vsub.f32 1.0, %v330_v44  ;;  %v344_v49 = vmul.f32 %v327_v47, %v302_v45 }
  0xa8   : > { %v332_v52 = vmul.f32 %v521_v40, %v331_v48  ;;  %v346_v54 = vpack.c.bf16 %v344_v49, %v344_v49 }
  0xaa   : > { %v333_v56 = vadd.f32 %v521_v40, %v332_v52  ;;  %349 = vst.msk [vmem:[%s241_s30] sm:$0xf] %vm348_vm4, %v346_v54 }
  0xac   : > { %v337_v59 = vsel %vm336_vm7, %v521_v40, %v333_v56 }
  0xad   : > { %v342_v60 = vsel %vm339_vm8, %v341_v57, %v337_v59 }
  0xae   : > { %v345_v61 = vmul.f32 %v342_v60, %v303_v58 }
  0xb0   : > { %v347_v62 = vpack.c.bf16 %v345_v61, %v345_v61 }
  0xb2   : > { %350 = vst.msk [vmem:[%s241_s30 + $0x4] sm:$0xf] %vm348_vm4, %v347_v62 }
  0xb3 PF: > { %s13_s14 = sadd.s32 1, %s544_s14   ;;  %s617_s12 = smov %s540_s13 }
  0xb4   : > { %p10_p5 = scmp.ge.s32.totalorder %s13_s14, 4   ;;  %s618_s13 = smov %s620_s15 }
  0xb6   :  { %12 = sbr.rel (!%p10_p5) target bundleno = 2 (0x2), region = 68 }

// kernel: _lambda_.20
= control target key start
LH: loop header
LB: loop body
LE: loop exit
PB: predicated region body
PF: predicated region fallthrough
CT: control target
= control target key end

     0   :  { %s1218_s18 = smov 0   ;;  %s1220_s19 = smov 0   ;;  %s1465_s0 = inlined_call_operand.vmem [shape: bf16[2,288,68], index: 0, kind: input, shape index: {}]   ;;  %s1466_s1 = inlined_call_operand.vmem [shape: bf16[64,288], index: 1, kind: input, shape index: {}]   ;;  %s1467_s2 = inlined_call_operand.vmem [shape: f32[64,1], index: 2, kind: input, shape index: {}]   ;;  %s1468_s3 = inlined_call_operand.vmem [shape: bf16[2,64,68], index: 3, kind: output, shape index: {0}]   ;;  %s1469_s4 = inlined_call_operand.vmem [shape: f32[2,64,1], index: 4, kind: output, shape index: {1}]   ;;  %s1470_s5 = inlined_call_operand.vmem [shape: f32[2,64,1], index: 5, kind: output, shape index: {2}]  }
   0x1   :  { %s1222_s20 = smov 0  }
   0x2 LB: > { %s28_s21 = sadd.s32 1, %s1181_s19  ;;  %p951_p0 = scmp.ge.s32.totalorder %s1185_s20, 1  ;;  %s1185_s20 = sphi %s1222_s20, %s16_s20   ;;  %s1181_s19 = sphi %s1220_s19, %s1472_s19   ;;  %s1177_s18 = sphi %s1218_s18, %s1471_s18  }
   0x3   : > { %p30_p1 = scmp.ge.s32.totalorder %s28_s21, 2  ;;  %p211_p2 = scmp.lt.s32.totalorder %s1185_s20, 3 }
   0x5   : > { %s1474_s21 = smov (%p30_p1, %s28_s21), 0  ;;  %p212_p3 = pnand %p951_p0, %p211_p2 }
   0x6   : > { %p255_p4 = scmp.lt.s32.totalorder (!%p212_p3), %s1177_s18, 1 }
   0x7   : > { %215 = sbr.rel (%p212_p3) target bundleno = 363 (0x16b), region = 32 }
   0xc   : > { %s1476_s18 = smov (!%p255_p4, %s1177_s18), 1  ;;  %v969_v6 = vld [vmem:[%s1466_s1 + $0x8] sm:$0xf]  ;;  %v1090_v7 = vld [vmem:[%s1466_s1 + $0x10] sm:$0xf0]  ;;  %vm550_vm0 = vcmask 261120  }
   0xd   : > { %s1134_s22 = smul.u32 144, %s1476_s18  ;;  %v970_v10 = vor.u32 %v1090_v7, %v969_v6  ;;  %v336_v13 = vld [vmem:[%s1467_s2 + $0x10] sm:$0xff]  ;;  %v1187_v14 = vmov 0   ;;  %v334_v17 = vld [vmem:[%s1467_s2] sm:$0xff]  ;;  %v337_v20 = vld [vmem:[%s1467_s2 + $0x18] sm:$0xff]  ;;  %s1085_s28 = sshll.u32 %s1476_s18, 5 }
   0xe   : > { %1161 = vset.pattern.permute.xlu1 %v1187_v14  ;;  %1160 = vset.pattern.permute.xlu0 %v1187_v14  ;;  %v981_v21 = vld [vmem:[%s1466_s1 + $0x20] sm:$0xf]  ;;  %v1093_v22 = vld [vmem:[%s1466_s1 + $0x28] sm:$0xf0]  ;;  %v973_v27 = vld [vmem:[%s1466_s1 + $0x18] sm:$0xf]  ;;  %s1388_s6 = scalar_lea.vmem %s1468_s3, %s1085_s28 }
   0xf   : > { %s1242_s25 = scalar_lea.vmem %s1465_s0, %s1134_s22  ;;  %354 = vperm.xlu1 %1161, %v336_v13   ;;  %1162 = vset.pattern.permute.xlu2 %v1187_v14  ;;  %v982_v25 = vor.u32 %v1093_v22, %v981_v21  ;;  %v335_v26 = vld [vmem:[%s1467_s2 + $0x8] sm:$0xff]  ;;  %v1092_v28 = vld [vmem:[%s1466_s1 + $0x20] sm:$0xf0]  ;;  %v961_v30 = vld [vmem:[%s1466_s1] sm:$0xf]  ;;  %vm667_vm1 = vcmask 556032  }
  0x10   : > { %v1107_v0 = vld [vmem:[%s1242_s25 + $0x38] sm:$0xff]  ;;  %v1117_v2 = vld [vmem:[%s1242_s25 + $0x88] sm:$0xff]  ;;  %v1106_v3 = vld [vmem:[%s1242_s25 + $0x30] sm:$0xff]  ;;  %344 = vperm.xlu0 %1160, %v334_v17   ;;  %v974_v35 = vor.u32 %v1092_v28, %v973_v27  ;;  %vm658_vm2 = vcmask 551936   ;;  %s1086_s7 = sshll.u32 %s1476_s18, 6  ;;  %vm728_vm3 = vcmask 7168  }
  0x11   : > { %v1246_v1 = vld [vmem:[%s1242_s25 + $0x78] sm:$0xff]  ;;  %563 = vmatpush.bf16.msra.mxu0 %v1107_v0  ;;  %1118 = vmatpush.bf16.msra.mxu3 %v1107_v0  ;;  %v1252_v4 = vld [vmem:[%s1242_s25 + $0x70] sm:$0xff]  ;;  %v1116_v5 = vld [vmem:[%s1242_s25 + $0x80] sm:$0xff]  ;;  %s275_s10 = scalar_lea.vmem %s1469_s4, %s1086_s7  ;;  %s1430_s12 = scalar_lea.vmem %s1470_s5, %s1086_s7 }
  0x12   : > { %1126 = vmatpush.bf16.msra.mxu1 %v1246_v1  ;;  %627 = vmatpush.bf16.msra.mxu2 %v1117_v2  ;;  %v1105_v8 = vld [vmem:[%s1242_s25 + $0x28] sm:$0xff]  ;;  %v1104_v11 = vld [vmem:[%s1242_s25 + $0x20] sm:$0xff]  ;;  %v1103_v15 = vld [vmem:[%s1242_s25 + $0x18] sm:$0xff] }
  0x13   : > { %v1264_v9 = vld [vmem:[%s1242_s25 + $0x68] sm:$0xff]  ;;  %v1270_v12 = vld [vmem:[%s1242_s25 + $0x60] sm:$0xff]  ;;  %v1278_v16 = vld [vmem:[%s1242_s25 + $0x58] sm:$0xff] }
  0x14   : > { %v1102_v18 = vld [vmem:[%s1242_s25 + $0x10] sm:$0xff]  ;;  %v1101_v23 = vld [vmem:[%s1242_s25 + $0x8] sm:$0xff]  ;;  %v1100_v29 = vld [vmem:[%s1242_s25] sm:$0xff] }
  0x15   : > { %564 = vmatpush.bf16.msra.mxu0 %v1106_v3  ;;  %1119 = vmatpush.bf16.msra.mxu3 %v1106_v3  ;;  %v1110_v19 = vld [vmem:[%s1242_s25 + $0x50] sm:$0xff]  ;;  %v1109_v24 = vld [vmem:[%s1242_s25 + $0x48] sm:$0xff]  ;;  %v1108_v32 = vld [vmem:[%s1242_s25 + $0x40] sm:$0xff] }
  0x16   : > { %1127 = vmatpush.bf16.msra.mxu1 %v1252_v4  ;;  %628 = vmatpush.bf16.msra.mxu2 %v1116_v5  ;;  %v1089_v31 = vld [vmem:[%s1466_s1 + $0x8] sm:$0xf0]  ;;  %v1091_v33 = vld [vmem:[%s1466_s1 + $0x1c] sm:$0xf]  ;;  %v975_v34 = vld [vmem:[%s1466_s1 + $0x24] sm:$0xf0] }
  0x17   : > { %359 = vperm.xlu1 %1161, %v337_v20   ;;  %v962_v36 = vor.u32 %v1089_v31, %v961_v30  ;;  %v978_v37 = vor.u32 %v1091_v33, %v975_v34  ;;  %v341_v38 = vld [vmem:[%s1467_s2 + $0x38] sm:$0xff]  ;;  %v340_v39 = vld [vmem:[%s1467_s2 + $0x30] sm:$0xff]  ;;  %v338_v40 = vld [vmem:[%s1467_s2 + $0x20] sm:$0xff] }
  0x18   : > { %349 = vperm.xlu0 %1160, %v335_v26   ;;  %364 = vperm.xlu2 %1162, %v338_v40   ;;  %v993_v41 = vld [vmem:[%s1466_s1 + $0x38] sm:$0xf]  ;;  %v1096_v42 = vld [vmem:[%s1466_s1 + $0x40] sm:$0xf0]  ;;  %v339_v44 = vld [vmem:[%s1467_s2 + $0x28] sm:$0xff] }
  0x19   : > { %565 = vmatpush.bf16.msra.mxu0 %v1105_v8  ;;  %1120 = vmatpush.bf16.msra.mxu3 %v1105_v8  ;;  %v994_v43 = vor.u32 %v1096_v42, %v993_v41  ;;  %v985_v45 = vld [vmem:[%s1466_s1 + $0x30] sm:$0xf]  ;;  %v1095_v46 = vld [vmem:[%s1466_s1 + $0x38] sm:$0xf0]  ;;  %v1094_v47 = vld [vmem:[%s1466_s1 + $0x34] sm:$0xf] }
  0x1a   : > { %1128 = vmatpush.bf16.msra.mxu1 %v1264_v9  ;;  %1079 = vmatmul.msk.bf16.vlgmr.msra.gmra.mxu2 %vm550_vm0, %v970_v10  ;;  %v987_v48 = vld [vmem:[%s1466_s1 + $0x3c] sm:$0xf0]  ;;  %v986_v49 = vor.u32 %v1095_v46, %v985_v45  ;;  %v1005_v51 = vld [vmem:[%s1466_s1 + $0x50] sm:$0xf]  ;;  %v1099_v52 = vld [vmem:[%s1466_s1 + $0x58] sm:$0xf0] }
  0x1b   : > { %v990_v50 = vor.u32 %v1094_v47, %v987_v48  ;;  %v1088_v53 = vld [vmem:[%s1466_s1 + $0x4] sm:$0xf]  ;;  %v963_v54 = vld [vmem:[%s1466_s1 + $0xc] sm:$0xf0]  ;;  %v1006_v55 = vor.u32 %v1099_v52, %v1005_v51  ;;  %v997_v57 = vld [vmem:[%s1466_s1 + $0x48] sm:$0xf] }
  0x1c   : > { %v966_v56 = vor.u32 %v1088_v53, %v963_v54  ;;  %v1098_v58 = vld [vmem:[%s1466_s1 + $0x50] sm:$0xf0]  ;;  %v1097_v59 = vld [vmem:[%s1466_s1 + $0x4c] sm:$0xf]  ;;  %v999_v60 = vld [vmem:[%s1466_s1 + $0x54] sm:$0xf0] }
  0x1d   : > { %566 = vmatpush.bf16.msra.mxu0 %v1104_v11  ;;  %1121 = vmatpush.bf16.msra.mxu3 %v1104_v11  ;;  %v998_v61 = vor.u32 %v1098_v58, %v997_v57  ;;  %v1002_v62 = vor.u32 %v1097_v59, %v999_v60 }
  0x1e   : > { %1129 = vmatpush.bf16.msra.mxu1 %v1270_v12 }
  0x1f   : > { %379 = vperm.xlu1 %1161, %v341_v38  }
  0x20   : > { %374 = vperm.xlu0 %1160, %v340_v39   ;;  %369 = vperm.xlu2 %1162, %v339_v44  }
  0x21   : > { %567 = vmatpush.bf16.msra.mxu0 %v1103_v15  ;;  %1122 = vmatpush.bf16.msra.mxu3 %v1103_v15 }
  0x22   : > { %1130 = vmatpush.bf16.msra.mxu1 %v1278_v16 }
  0x25   : > { %568 = vmatpush.bf16.msra.mxu0 %v1102_v18  ;;  %1123 = vmatpush.bf16.msra.mxu3 %v1102_v18 }
  0x26   : > { %1131 = vmatpush.bf16.msra.mxu1 %v1110_v19 }
  0x29   : > { %569 = vmatpush.bf16.msra.mxu0 %v1101_v23  ;;  %1124 = vmatpush.bf16.msra.mxu3 %v1101_v23 }
  0x2a   : > { %1132 = vmatpush.bf16.msra.mxu1 %v1109_v24  ;;  %1080 = vmatmul.msk.bf16.gmra.mxu2 %vm550_vm0, %v982_v25 }
  0x2d   : > { %570 = vmatpush.bf16.msra.mxu0 %v1100_v29  ;;  %1125 = vmatpush.bf16.msra.mxu3 %v1100_v29 }
  0x2e   : > { %1133 = vmatpush.bf16.msra.mxu1 %v1108_v32 }
  0x30   : > { %576 = vmatmul.bf16.vlgmr.msra.gmra.mxu3 %v974_v35  ;;  %571 = vmatmul.bf16.vlgmr.msra.gmra.mxu0 %v962_v36 }
  0x31   : > { %592 = vmatpush.bf16.msrb.mxu0 %v1246_v1  ;;  %605 = vmatmul.bf16.vlgmr.msra.gmra.mxu1 %v978_v37 }
  0x35   : > { %593 = vmatpush.bf16.msrb.mxu0 %v1252_v4 }
  0x39   : > { %594 = vmatpush.bf16.msrb.mxu0 %v1264_v9 }
  0x3a   : > { %1081 = vmatmul.msk.bf16.gmra.mxu2 %vm550_vm0, %v994_v43 }
  0x3d   : > { %595 = vmatpush.bf16.msrb.mxu0 %v1270_v12 }
  0x40   : > { %581 = vmatmul.bf16.gmra.mxu3 %v986_v49 }
  0x41   : > { %596 = vmatpush.bf16.msrb.mxu0 %v1278_v16  ;;  %610 = vmatmul.bf16.gmra.mxu1 %v990_v50 }
  0x45   : > { %597 = vmatpush.bf16.msrb.mxu0 %v1110_v19 }
  0x49   : > { %598 = vmatpush.bf16.msrb.mxu0 %v1109_v24 }
  0x4a   : > { %1082 = vmatmul.msk.bf16.gmra.mxu2 %vm550_vm0, %v1006_v55 }
  0x4d   : > { %599 = vmatpush.bf16.msrb.mxu0 %v1108_v32 }
  0x50   : > { %600 = vmatmul.bf16.vlgmr.msrb.gmra.mxu0 %v966_v56  ;;  %586 = vmatmul.bf16.gmra.mxu3 %v998_v61 }
  0x51   : > { %615 = vmatmul.bf16.gmra.mxu1 %v1002_v62 }
  0x72   : > { %v365_v20 = vpop.permute.xlu2 %364 }
  0x7a   : > { %v370_v32 = vpop.permute.xlu2 %369 }
  0x81   : > { %v355_v3 = vpop.permute.xlu1 %354 }
  0x82   : > { %v345_v22 = vpop.permute.xlu0 %344 }
  0x89   : > { %v360_v14 = vpop.permute.xlu1 %359 }
  0x8a   : > { %v350_v34 = vpop.permute.xlu0 %349 }
  0x92   : > { %v375_v49 = vpop.permute.xlu0 %374 }
  0x9d   : > { %v630_v63 = vpop.f32.mrf.mxu2 }
  0xa5   : > { %v1382_v0 = vpop.f32.mrf.mxu2 }
  0xad   : > { %v635_v1 = vpop.f32.mrf.mxu2  ;;  %v572_v9 = vpop.f32.mrf.mxu0 }
  0xae   : > { %v606_v2 = vpop.f32.mrf.mxu1  ;;  %v573_v31 = vadd.f32 %v572_v9, %v345_v22 }
  0xb3   : > { %v577_v4 = vpop.f32.mrf.mxu3 }
  0xb4   : > { %v578_v5 = vadd.f32 %v577_v4, %v355_v3 }
  0xb5   : > { %v637_v6 = vpop.f32.mrf.mxu2  ;;  %v574_v24 = vpop.f32.mrf.mxu0 }
  0xb6   : > { %v607_v7 = vadd.f32 %v606_v2, %v578_v5  ;;  %v608_v8 = vpop.f32.mrf.mxu1  ;;  %v575_v46 = vadd.f32 %v574_v24, %v350_v34  ;;  %v380_v2 = vpop.permute.xlu1 %379 }
  0xb8   : > { %v636_v10 = vadd.f32 %v635_v1, %v607_v7 }
  0xba   : > { %v652_v11 = vpack.c.bf16 %v636_v10, %v636_v10  ;;  %v674_v12 = vsel %vm667_vm1, %v636_v10, 0.0  ;;  %v694_v13 = vmul.f32 %v636_v10, %v636_v10 }
  0xbb   : > { %v579_v15 = vpop.f32.mrf.mxu3  ;;  %675 = vadd.xlane.f32.xlu1 %v674_v12 }
  0xbc   : > { %661 = vst.msk [vmem:[%s1388_s6 + $0x8] sm:$0xf] %vm658_vm2, %v652_v11  ;;  %v580_v16 = vadd.f32 %v579_v15, %v360_v14  ;;  %v706_v17 = vsel %vm667_vm1, %v694_v13, 0.0 }
  0xbd   : > { %707 = vadd.xlane.f32.xlu2 %v706_v17  ;;  %v640_v21 = vpop.f32.mrf.mxu2 }
  0xbe   : > { %v609_v18 = vadd.f32 %v608_v8, %v580_v16  ;;  %v611_v19 = vpop.f32.mrf.mxu1 }
  0xc0   : > { %v638_v23 = vadd.f32 %v637_v6, %v609_v18 }
  0xc2   : > { %v653_v25 = vpack.c.bf16 %v638_v23, %v638_v23  ;;  %v695_v57 = vmul.f32 %v638_v23, %v638_v23  ;;  %v677_v60 = vsel %vm667_vm1, %v638_v23, 0.0 }
  0xc3   : > { %v582_v26 = vpop.f32.mrf.mxu3 }
  0xc4   : > { %662 = vst.msk [vmem:[%s1388_s6 + $0xc] sm:$0xf] %vm658_vm2, %v653_v25  ;;  %v583_v27 = vadd.f32 %v582_v26, %v365_v20  ;;  %v709_v1 = vsel %vm667_vm1, %v695_v57, 0.0 }
  0xc5   : > { %v642_v33 = vpop.f32.mrf.mxu2 }
  0xc6   : > { %v612_v28 = vadd.f32 %v611_v19, %v583_v27  ;;  %v613_v29 = vpop.f32.mrf.mxu1 }
  0xc8   : > { %v641_v30 = vadd.f32 %v640_v21, %v612_v28 }
  0xca   : > { %v654_v35 = vpack.c.bf16 %v641_v30, %v641_v30  ;;  %v696_v7 = vmul.f32 %v641_v30, %v641_v30  ;;  %v680_v9 = vsel %vm667_vm1, %v641_v30, 0.0 }
  0xcb   : > { %v584_v38 = vpop.f32.mrf.mxu3 }
  0xcc   : > { %663 = vst.msk [vmem:[%s1388_s6 + $0x10] sm:$0xf] %vm658_vm2, %v654_v35  ;;  %v585_v39 = vadd.f32 %v584_v38, %v370_v32  ;;  %v712_v11 = vsel %vm667_vm1, %v696_v7, 0.0 }
  0xcd   : > { %v601_v36 = vpop.f32.mrf.mxu0  ;;  %v645_v54 = vpop.f32.mrf.mxu2 }
  0xce   : > { %v602_v37 = vadd.f32 %v601_v36, %v573_v31  ;;  %v614_v41 = vadd.f32 %v613_v29, %v585_v39  ;;  %v616_v48 = vpop.f32.mrf.mxu1 }
  0xd0   : > { %v631_v40 = vadd.f32 %v630_v63, %v602_v37  ;;  %v643_v45 = vadd.f32 %v642_v33, %v614_v41 }
  0xd2   : > { %v650_v42 = vpack.c.bf16 %v631_v40, %v631_v40  ;;  %v668_v43 = vsel %vm667_vm1, %v631_v40, 0.0  ;;  %v692_v44 = vmul.f32 %v631_v40, %v631_v40  ;;  %v655_v50 = vpack.c.bf16 %v643_v45, %v643_v45 }
  0xd3   : > { %669 = vadd.xlane.f32.xlu2 %v668_v43  ;;  %v587_v53 = vpop.f32.mrf.mxu3  ;;  %v683_v16 = vsel %vm667_vm1, %v643_v45, 0.0  ;;  %v697_v17 = vmul.f32 %v643_v45, %v643_v45 }
  0xd4   : > { %659 = vst.msk [vmem:[%s1388_s6] sm:$0xf] %vm658_vm2, %v650_v42  ;;  %v700_v47 = vsel %vm667_vm1, %v692_v44, 0.0  ;;  %v588_v55 = vadd.f32 %v587_v53, %v375_v49 }
  0xd5   : > { %v603_v51 = vpop.f32.mrf.mxu0  ;;  %701 = vadd.xlane.f32.xlu0 %v700_v47  ;;  %664 = vst.msk [vmem:[%s1388_s6 + $0x14] sm:$0xf] %vm658_vm2, %v655_v50  ;;  %v647_v6 = vpop.f32.mrf.mxu2  ;;  %v715_v20 = vsel %vm667_vm1, %v697_v17, 0.0 }
  0xd6   : > { %v604_v52 = vadd.f32 %v603_v51, %v575_v46  ;;  %v617_v58 = vadd.f32 %v616_v48, %v588_v55  ;;  %v618_v4 = vpop.f32.mrf.mxu1 }
  0xd8   : > { %v633_v56 = vadd.f32 %v1382_v0, %v604_v52  ;;  %v646_v62 = vadd.f32 %v645_v54, %v617_v58 }
  0xda   : > { %v651_v59 = vpack.c.bf16 %v633_v56, %v633_v56  ;;  %v693_v61 = vmul.f32 %v633_v56, %v633_v56  ;;  %v656_v3 = vpack.c.bf16 %v646_v62, %v646_v62  ;;  %v671_v12 = vsel %vm667_vm1, %v633_v56, 0.0 }
  0xdb   : > { %678 = vadd.xlane.f32.xlu2 %v677_v60  ;;  %v589_v0 = vpop.f32.mrf.mxu3  ;;  %v686_v15 = vsel %vm667_vm1, %v646_v62, 0.0  ;;  %v698_v19 = vmul.f32 %v646_v62, %v646_v62 }
  0xdc   : > { %660 = vst.msk [vmem:[%s1388_s6 + $0x4] sm:$0xf] %vm658_vm2, %v651_v59  ;;  %v703_v63 = vsel %vm667_vm1, %v693_v61, 0.0  ;;  %v590_v5 = vadd.f32 %v589_v0, %v380_v2 }
  0xdd   : > { %704 = vadd.xlane.f32.xlu1 %v703_v63  ;;  %710 = vadd.xlane.f32.xlu0 %v709_v1  ;;  %665 = vst.msk [vmem:[%s1388_s6 + $0x18] sm:$0xf] %vm658_vm2, %v656_v3  ;;  %v718_v22 = vsel %vm667_vm1, %v698_v19, 0.0 }
  0xde   : > { %v619_v8 = vadd.f32 %v618_v4, %v590_v5 }
  0xe0   : > { %v648_v10 = vadd.f32 %v647_v6, %v619_v8 }
  0xe2   : > { %v657_v13 = vpack.c.bf16 %v648_v10, %v648_v10  ;;  %v689_v14 = vsel %vm667_vm1, %v648_v10, 0.0  ;;  %v699_v18 = vmul.f32 %v648_v10, %v648_v10 }
  0xe3   : > { %681 = vadd.xlane.f32.xlu2 %v680_v9 }
  0xe4   : > { %666 = vst.msk [vmem:[%s1388_s6 + $0x1c] sm:$0xf] %vm658_vm2, %v657_v13  ;;  %v721_v21 = vsel %vm667_vm1, %v699_v18, 0.0 }
  0xe5   : > { %713 = vadd.xlane.f32.xlu1 %v712_v11  ;;  %672 = vadd.xlane.f32.xlu0 %v671_v12 }
  0xeb   : > { %690 = vadd.xlane.f32.xlu2 %v689_v14 }
  0xed   : > { %687 = vadd.xlane.f32.xlu1 %v686_v15  ;;  %684 = vadd.xlane.f32.xlu0 %v683_v16 }
  0xf3   : > { %716 = vadd.xlane.f32.xlu2 %v715_v20 }
  0xf5   : > { %722 = vadd.xlane.f32.xlu1 %v721_v21  ;;  %719 = vadd.xlane.f32.xlu0 %v718_v22 }
 0x12e   : > { %v676_v23 = vpop.xlane.xlu1 %675 }
 0x12f   : > { %731 = vst.msk [vmem:[%s275_s10 + $0x10] sm:$0xff] %vm728_vm3, %v676_v23 }
 0x130   : > { %v708_v24 = vpop.xlane.xlu2 %707 }
 0x131   : > { %739 = vst.msk [vmem:[%s1430_s12 + $0x10] sm:$0xff] %vm728_vm3, %v708_v24 }
 0x146   : > { %v670_v25 = vpop.xlane.xlu2 %669 }
 0x147   : > { %729 = vst.msk [vmem:[%s275_s10] sm:$0xff] %vm728_vm3, %v670_v25 }
 0x148   : > { %v702_v26 = vpop.xlane.xlu0 %701 }
 0x149   : > { %737 = vst.msk [vmem:[%s1430_s12] sm:$0xff] %vm728_vm3, %v702_v26 }
 0x14e   : > { %v679_v27 = vpop.xlane.xlu2 %678 }
 0x14f   : > { %732 = vst.msk [vmem:[%s275_s10 + $0x18] sm:$0xff] %vm728_vm3, %v679_v27 }
 0x150   : > { %v705_v28 = vpop.xlane.xlu1 %704  ;;  %v711_v29 = vpop.xlane.xlu0 %710 }
 0x151   : > { %738 = vst.msk [vmem:[%s1430_s12 + $0x8] sm:$0xff] %vm728_vm3, %v705_v28 }
 0x152   : > { %740 = vst.msk [vmem:[%s1430_s12 + $0x18] sm:$0xff] %vm728_vm3, %v711_v29 }
 0x156   : > { %v682_v30 = vpop.xlane.xlu2 %681 }
 0x157   : > { %733 = vst.msk [vmem:[%s275_s10 + $0x20] sm:$0xff] %vm728_vm3, %v682_v30 }
 0x158   : > { %v714_v31 = vpop.xlane.xlu1 %713  ;;  %v673_v32 = vpop.xlane.xlu0 %672 }
 0x159   : > { %741 = vst.msk [vmem:[%s1430_s12 + $0x20] sm:$0xff] %vm728_vm3, %v714_v31 }
 0x15a   : > { %730 = vst.msk [vmem:[%s275_s10 + $0x8] sm:$0xff] %vm728_vm3, %v673_v32 }
 0x15e   : > { %v691_v33 = vpop.xlane.xlu2 %690 }
 0x15f   : > { %736 = vst.msk [vmem:[%s275_s10 + $0x38] sm:$0xff] %vm728_vm3, %v691_v33 }
 0x160   : > { %v688_v34 = vpop.xlane.xlu1 %687  ;;  %v685_v35 = vpop.xlane.xlu0 %684 }
 0x161   : > { %735 = vst.msk [vmem:[%s275_s10 + $0x30] sm:$0xff] %vm728_vm3, %v688_v34 }
 0x162   : > { %734 = vst.msk [vmem:[%s275_s10 + $0x28] sm:$0xff] %vm728_vm3, %v685_v35 }
 0x166   : > { %v717_v36 = vpop.xlane.xlu2 %716 }
 0x167   : > { %742 = vst.msk [vmem:[%s1430_s12 + $0x28] sm:$0xff] %vm728_vm3, %v717_v36 }
 0x168   : > { %v723_v37 = vpop.xlane.xlu1 %722  ;;  %v720_v38 = vpop.xlane.xlu0 %719 }
 0x169   : > { %744 = vst.msk [vmem:[%s1430_s12 + $0x38] sm:$0xff] %vm728_vm3, %v723_v37 }
 0x16a   : > { %743 = vst.msk [vmem:[%s1430_s12 + $0x30] sm:$0xff] %vm728_vm3, %v720_v38 }
 0x16b PF: > { %s16_s20 = sadd.s32 1, %s1185_s20   ;;  %s1471_s18 = smov %s1181_s19 }
 0x16c   : > { %p13_p5 = scmp.ge.s32.totalorder %s16_s20, 4   ;;  %s1472_s19 = smov %s1474_s21 }
 0x16e   :  { %15 = sbr.rel (!%p13_p5) target bundleno = 2 (0x2), region = 94 }

// kernel: _lambda_.21
= control target key start
LH: loop header
LB: loop body
LE: loop exit
PB: predicated region body
PF: predicated region fallthrough
CT: control target
= control target key end

     0   :  { %s693_s12 = smov 0   ;;  %s695_s13 = smov 0   ;;  %s767_s0 = inlined_call_operand.vmem [shape: bf16[2,64,68], index: 0, kind: input, shape index: {}]   ;;  %s768_s1 = inlined_call_operand.vmem [shape: f32[2,64,1], index: 1, kind: input, shape index: {}]   ;;  %s769_s2 = inlined_call_operand.vmem [shape: f32[2,64,1], index: 2, kind: input, shape index: {}]   ;;  %s770_s3 = inlined_call_operand.vmem [shape: bf16[2,32,68], index: 3, kind: output, shape index: {}]  }
   0x1   :  { %s697_s14 = smov 0  }
   0x2 LB: > { %s25_s15 = sadd.s32 1, %s666_s13  ;;  %p570_p0 = scmp.ge.s32.totalorder %s670_s14, 1  ;;  %s670_s14 = sphi %s697_s14, %s13_s14   ;;  %s666_s13 = sphi %s695_s13, %s772_s13   ;;  %s662_s12 = sphi %s693_s12, %s771_s12  }
   0x3   : > { %p27_p1 = scmp.ge.s32.totalorder %s25_s15, 2  ;;  %p176_p2 = scmp.lt.s32.totalorder %s670_s14, 3 }
   0x5   : > { %s774_s15 = smov (%p27_p1, %s25_s15), 0  ;;  %p177_p3 = pnand %p570_p0, %p176_p2 }
   0x6   : > { %p216_p4 = scmp.lt.s32.totalorder (!%p177_p3), %s662_s12, 1 }
   0x7   : > { %180 = sbr.rel (%p177_p3) target bundleno = 193 (0xc1), region = 32 }
   0xc   : > { %v672_v0 = vmov 0   ;;  %s776_s12 = smov (!%p216_p4, %s662_s12), 1  ;;  %vm454_vm4 = vcmask 551936  }
   0xd   : > { %631 = vset.pattern.permute.xlu2 %v672_v0  ;;  %630 = vset.pattern.permute.xlu1 %v672_v0  ;;  %s582_s16 = sshll.u32 %s776_s12, 6  ;;  %s581_s23 = sshll.u32 %s776_s12, 5 }
   0xe   : > { %629 = vset.pattern.permute.xlu0 %v672_v0  ;;  %s228_s19 = scalar_lea.vmem %s768_s1, %s582_s16  ;;  %s233_s22 = scalar_lea.vmem %s769_s2, %s582_s16 }
   0xf   : > { %v262_v1 = vld [vmem:[%s228_s19 + $0x20] sm:$0xff]  ;;  %v260_v2 = vld [vmem:[%s228_s19 + $0x10] sm:$0xff]  ;;  %v263_v4 = vld [vmem:[%s228_s19 + $0x28] sm:$0xff]  ;;  %s724_s26 = scalar_lea.vmem %s767_s0, %s581_s23  ;;  %s584_s27 = sshll.u32 %s776_s12, 4 }
  0x10   : > { %v258_v3 = vld [vmem:[%s228_s19] sm:$0xff]  ;;  %288 = vperm.xlu2 %631, %v262_v1   ;;  %278 = vperm.xlu1 %630, %v260_v2   ;;  %v261_v5 = vld [vmem:[%s228_s19 + $0x18] sm:$0xff]  ;;  %v259_v6 = vld [vmem:[%s228_s19 + $0x8] sm:$0xff]  ;;  %s742_s30 = scalar_lea.vmem %s770_s3, %s584_s27 }
  0x11   : > { %268 = vperm.xlu0 %629, %v258_v3   ;;  %v318_v7 = vld [vmem:[%s233_s22 + $0x20] sm:$0xff]  ;;  %v265_v8 = vld [vmem:[%s228_s19 + $0x38] sm:$0xff]  ;;  %v264_v9 = vld [vmem:[%s228_s19 + $0x30] sm:$0xff] }
  0x12   : > { %v321_v10 = vld [vmem:[%s233_s22 + $0x38] sm:$0xff]  ;;  %v320_v11 = vld [vmem:[%s233_s22 + $0x30] sm:$0xff]  ;;  %v319_v12 = vld [vmem:[%s233_s22 + $0x28] sm:$0xff] }
  0x13   : > { %v316_v13 = vld [vmem:[%s233_s22 + $0x10] sm:$0xff]  ;;  %v315_v14 = vld [vmem:[%s233_s22 + $0x8] sm:$0xff]  ;;  %v314_v15 = vld [vmem:[%s233_s22] sm:$0xff] }
  0x14   : > { %v317_v16 = vld [vmem:[%s233_s22 + $0x18] sm:$0xff]  ;;  %v602_v18 = vld [vmem:[%s724_s26 + $0x10] sm:$0xff]   ;;  %v735_v48 = vld [vmem:[%s724_s26] sm:$0xff]  }
  0x15   : > { %v595_v20 = vunpack.c.l.bf16 %v602_v18  ;;  %v603_v32 = vld [vmem:[%s724_s26 + $0x18] sm:$0xff]   ;;  %v596_v42 = vunpack.c.h.bf16 %v602_v18  ;;  %v587_v54 = vunpack.c.l.bf16 %v735_v48 }
  0x16   : > { %v600_v33 = vunpack.c.h.bf16 %v603_v32  ;;  %v599_v41 = vunpack.c.l.bf16 %v603_v32 }
  0x18   : > { %293 = vperm.xlu2 %631, %v263_v4   ;;  %283 = vperm.xlu1 %630, %v261_v5  }
  0x19   : > { %273 = vperm.xlu0 %629, %v259_v6  }
  0x20   : > { %344 = vperm.xlu2 %631, %v318_v7   ;;  %303 = vperm.xlu1 %630, %v265_v8  }
  0x21   : > { %298 = vperm.xlu0 %629, %v264_v9  }
  0x28   : > { %359 = vperm.xlu2 %631, %v321_v10   ;;  %354 = vperm.xlu1 %630, %v320_v11  }
  0x29   : > { %349 = vperm.xlu0 %629, %v319_v12  }
  0x30   : > { %334 = vperm.xlu2 %631, %v316_v13   ;;  %329 = vperm.xlu1 %630, %v315_v14   ;;  %v601_v14 = vld [vmem:[%s724_s26 + $0x8] sm:$0xff]  }
  0x31   : > { %324 = vperm.xlu0 %629, %v314_v15   ;;  %v592_v15 = vunpack.c.h.bf16 %v601_v14 }
  0x39   : > { %339 = vperm.xlu0 %629, %v317_v16  }
  0x6a   : > { %v289_v17 = vpop.permute.xlu2 %288 }
  0x6b   : > { %v310_v21 = vmul.f32 %v595_v20, %v289_v17 }
  0x72   : > { %v294_v19 = vpop.permute.xlu2 %293 }
  0x73   : > { %v311_v47 = vmul.f32 %v596_v42, %v294_v19 }
  0x7a   : > { %v345_v22 = vpop.permute.xlu2 %344 }
  0x7b   : > { %v366_v23 = vadd.f32 %v345_v22, %v310_v21  ;;  %v591_v22 = vunpack.c.l.bf16 %v601_v14 }
  0x7d   : > { %v370_v24 = vsub.f32 0.0, %v366_v23  ;;  %v588_v23 = vunpack.c.h.bf16 %v735_v48 }
  0x7f   : > { %v374_v25 = vmul.f32 1.442695, %v370_v24 }
  0x81   : > { %632 = vpow2.f32 %v374_v25 }
  0x82   : > { %v727_v26 = vpop.permute.xlu1 %278  ;;  %v360_v39 = vpop.permute.xlu2 %359 }
  0x83   : > { %v269_v27 = vpop.permute.xlu0 %268 }
  0x84   : > { %v306_v63 = vmul.f32 %v587_v54, %v269_v27 }
  0x87   : > { %v633_v28 = vpop.eup %632 }
  0x88   : > { %v382_v29 = vadd.f32 1.0, %v633_v28 }
  0x8a   : > { %634 = vrcp.f32 %v382_v29  ;;  %v729_v30 = vpop.permute.xlu1 %283  ;;  %vm391_vm0 = vweird.f32 %v382_v29  ;;  %v397_v59 = vand.u32 2147483648, %v382_v29  ;;  %v395_v61 = vand.u32 2147483647, %v382_v29  ;;  %v335_v42 = vpop.permute.xlu2 %334 }
  0x8b   : > { %v731_v31 = vpop.permute.xlu0 %273  ;;  %v309_v27 = vmul.f32 %v592_v15, %v729_v30 }
  0x8c   : > { %v398_v3 = vor.u32 1.1754944e-38, %v397_v59  ;;  %vm396_vm3 = vcmp.eq.f32.partialorder %v395_v61, 8.507059e+37 }
  0x90   : > { %v635_v34 = vpop.eup %634 }
  0x91   : > { %v387_v36 = vmul.f32 %v635_v34, %v382_v29  ;;  %vm392_vm1 = vweird.f32 %v635_v34 }
  0x92   : > { %v304_v35 = vpop.permute.xlu1 %303  ;;  %vm393_vm2 = vmor %vm391_vm0, %vm392_vm1 }
  0x93   : > { %v313_v37 = vmul.f32 %v600_v33, %v304_v35  ;;  %v299_v38 = vpop.permute.xlu0 %298  ;;  %v388_v43 = vsub.f32 1.0, %v387_v36 }
  0x94   : > { %v312_v46 = vmul.f32 %v599_v41, %v299_v38 }
  0x95   : > { %v369_v40 = vadd.f32 %v360_v39, %v313_v37  ;;  %v389_v50 = vmul.f32 %v635_v34, %v388_v43 }
  0x97   : > { %v373_v44 = vsub.f32 0.0, %v369_v40  ;;  %v390_v57 = vadd.f32 %v635_v34, %v389_v50 }
  0x99   : > { %v380_v45 = vmul.f32 1.442695, %v373_v44  ;;  %v394_v1 = vsel %vm393_vm2, %v635_v34, %v390_v57 }
  0x9a   : > { %v355_v49 = vpop.permute.xlu1 %354  ;;  %v399_v5 = vsel %vm396_vm3, %v398_v3, %v394_v1 }
  0x9b   : > { %636 = vpow2.f32 %v380_v45  ;;  %v368_v51 = vadd.f32 %v355_v49, %v312_v46  ;;  %v350_v52 = vpop.permute.xlu0 %349  ;;  %v308_v45 = vmul.f32 %v591_v22, %v727_v26  ;;  %v307_v46 = vmul.f32 %v588_v23, %v731_v31 }
  0x9c   : > { %v367_v53 = vadd.f32 %v350_v52, %v311_v47 }
  0x9d   : > { %v372_v55 = vsub.f32 0.0, %v368_v51  ;;  %v364_v52 = vadd.f32 %v335_v42, %v308_v45 }
  0x9e   : > { %v371_v56 = vsub.f32 0.0, %v367_v53 }
  0x9f   : > { %v378_v58 = vmul.f32 1.442695, %v372_v55 }
  0xa0   : > { %v376_v60 = vmul.f32 1.442695, %v371_v56 }
  0xa1   : > { %v637_v62 = vpop.eup %636  ;;  %638 = vpow2.f32 %v378_v58 }
  0xa2   : > { %v385_v0 = vadd.f32 1.0, %v637_v62  ;;  %640 = vpow2.f32 %v376_v60  ;;  %v330_v48 = vpop.permute.xlu1 %329 }
  0xa3   : > { %v325_v2 = vpop.permute.xlu0 %324  ;;  %v363_v55 = vadd.f32 %v330_v48, %v307_v46 }
  0xa4   : > { %642 = vrcp.f32 %v385_v0  ;;  %v362_v4 = vadd.f32 %v325_v2, %v306_v63  ;;  %v440_v17 = vand.u32 2147483647, %v385_v0  ;;  %v442_v18 = vand.u32 2147483648, %v385_v0 }
  0xa5   : > { %vm436_vm6 = vweird.f32 %v385_v0 }
  0xa6   : > { %v446_v6 = vmul.f32 %v399_v5, %v362_v4  ;;  %vm441_vm8 = vcmp.eq.f32.partialorder %v440_v17, 8.507059e+37  ;;  %v443_v34 = vor.u32 1.1754944e-38, %v442_v18 }
  0xa7   : > { %v639_v7 = vpop.eup %638 }
  0xa8   : > { %v641_v8 = vpop.eup %640  ;;  %v384_v9 = vadd.f32 1.0, %v639_v7  ;;  %v450_v10 = vpack.c.bf16 %v446_v6, %v446_v6 }
  0xa9   : > { %v383_v11 = vadd.f32 1.0, %v641_v8 }
  0xaa   : > { %v643_v12 = vpop.eup %642  ;;  %644 = vrcp.f32 %v384_v9  ;;  %455 = vst.msk [vmem:[%s742_s30] sm:$0xf] %vm454_vm4, %v450_v10  ;;  %v425_v33 = vand.u32 2147483647, %v384_v9  ;;  %v427_v35 = vand.u32 2147483648, %v384_v9  ;;  %vm421_vm11 = vweird.f32 %v384_v9 }
  0xab   : > { %646 = vrcp.f32 %v383_v11  ;;  %v432_v13 = vmul.f32 %v643_v12, %v385_v0  ;;  %vm437_vm5 = vweird.f32 %v643_v12  ;;  %v340_v25 = vpop.permute.xlu0 %339  ;;  %v412_v40 = vand.u32 2147483648, %v383_v11 }
  0xac   : > { %vm438_vm7 = vmor %vm436_vm6, %vm437_vm5  ;;  %v365_v37 = vadd.f32 %v340_v25, %v309_v27  ;;  %v410_v30 = vand.u32 2147483647, %v383_v11  ;;  %v428_v49 = vor.u32 1.1754944e-38, %v427_v35  ;;  %vm406_vm13 = vweird.f32 %v383_v11 }
  0xad   : > { %v433_v16 = vsub.f32 1.0, %v432_v13  ;;  %vm426_vm14 = vcmp.eq.f32.partialorder %v425_v33, 8.507059e+37  ;;  %v413_v54 = vor.u32 1.1754944e-38, %v412_v40 }
  0xae   : > { %vm411_vm0 = vcmp.eq.f32.partialorder %v410_v30, 8.507059e+37 }
  0xaf   : > { %v434_v20 = vmul.f32 %v643_v12, %v433_v16 }
  0xb0   : > { %v645_v19 = vpop.eup %644 }
  0xb1   : > { %v647_v21 = vpop.eup %646  ;;  %v417_v24 = vmul.f32 %v645_v19, %v384_v9  ;;  %v435_v29 = vadd.f32 %v643_v12, %v434_v20  ;;  %vm422_vm9 = vweird.f32 %v645_v19 }
  0xb2   : > { %v402_v28 = vmul.f32 %v647_v21, %v383_v11  ;;  %vm407_vm10 = vweird.f32 %v647_v21  ;;  %vm423_vm12 = vmor %vm421_vm11, %vm422_vm9 }
  0xb3   : > { %v418_v32 = vsub.f32 1.0, %v417_v24  ;;  %v439_v38 = vsel %vm438_vm7, %v643_v12, %v435_v29  ;;  %vm408_vm15 = vmor %vm406_vm13, %vm407_vm10 }
  0xb4   : > { %v403_v36 = vsub.f32 1.0, %v402_v28  ;;  %v444_v41 = vsel %vm441_vm8, %v443_v34, %v439_v38 }
  0xb5   : > { %v419_v39 = vmul.f32 %v645_v19, %v418_v32  ;;  %v449_v44 = vmul.f32 %v444_v41, %v365_v37 }
  0xb6   : > { %v404_v43 = vmul.f32 %v647_v21, %v403_v36 }
  0xb7   : > { %v420_v47 = vadd.f32 %v645_v19, %v419_v39  ;;  %v453_v51 = vpack.c.bf16 %v449_v44, %v449_v44 }
  0xb8   : > { %v405_v50 = vadd.f32 %v647_v21, %v404_v43 }
  0xb9   : > { %v424_v53 = vsel %vm423_vm12, %v645_v19, %v420_v47  ;;  %458 = vst.msk [vmem:[%s742_s30 + $0xc] sm:$0xf] %vm454_vm4, %v453_v51 }
  0xba   : > { %v429_v26 = vsel %vm426_vm14, %v428_v49, %v424_v53  ;;  %v409_v31 = vsel %vm408_vm15, %v647_v21, %v405_v50 }
  0xbb   : > { %v448_v56 = vmul.f32 %v429_v26, %v364_v52  ;;  %v414_v57 = vsel %vm411_vm0, %v413_v54, %v409_v31 }
  0xbc   : > { %v447_v58 = vmul.f32 %v414_v57, %v363_v55 }
  0xbd   : > { %v452_v59 = vpack.c.bf16 %v448_v56, %v448_v56 }
  0xbe   : > { %v451_v60 = vpack.c.bf16 %v447_v58, %v447_v58 }
  0xbf   : > { %457 = vst.msk [vmem:[%s742_s30 + $0x8] sm:$0xf] %vm454_vm4, %v452_v59 }
  0xc0   : > { %456 = vst.msk [vmem:[%s742_s30 + $0x4] sm:$0xf] %vm454_vm4, %v451_v60 }
  0xc1 PF: > { %s13_s14 = sadd.s32 1, %s670_s14   ;;  %s771_s12 = smov %s666_s13 }
  0xc2   : > { %p10_p5 = scmp.ge.s32.totalorder %s13_s14, 4   ;;  %s772_s13 = smov %s774_s15 }
  0xc4   :  { %12 = sbr.rel (!%p10_p5) target bundleno = 2 (0x2), region = 68 }

// kernel: _lambda_.22
= control target key start
LH: loop header
LB: loop body
LE: loop exit
PB: predicated region body
PF: predicated region fallthrough
CT: control target
= control target key end

     0   :  { %s719_s18 = smov 0   ;;  %s721_s19 = smov 0   ;;  %s776_s0 = inlined_call_operand.vmem [shape: bf16[2,128,119], index: 0, kind: input, shape index: {}]   ;;  %s777_s1 = inlined_call_operand.vmem [shape: bf16[16,128], index: 1, kind: input, shape index: {}]   ;;  %s778_s2 = inlined_call_operand.vmem [shape: f32[16,1], index: 2, kind: input, shape index: {}]   ;;  %s779_s3 = inlined_call_operand.vmem [shape: bf16[2,16,119], index: 3, kind: output, shape index: {0}]   ;;  %s780_s4 = inlined_call_operand.vmem [shape: f32[2,16,1], index: 4, kind: output, shape index: {1}]   ;;  %s781_s5 = inlined_call_operand.vmem [shape: f32[2,16,1], index: 5, kind: output, shape index: {2}]  }
   0x1   :  { %s723_s20 = smov 0  }
   0x2 LB: > { %s28_s21 = sadd.s32 1, %s682_s19  ;;  %p578_p0 = scmp.ge.s32.totalorder %s686_s20, 1  ;;  %s686_s20 = sphi %s723_s20, %s16_s20   ;;  %s682_s19 = sphi %s721_s19, %s783_s19   ;;  %s678_s18 = sphi %s719_s18, %s782_s18  }
   0x3   : > { %p30_p1 = scmp.ge.s32.totalorder %s28_s21, 2  ;;  %p211_p2 = scmp.lt.s32.totalorder %s686_s20, 3 }
   0x5   : > { %s785_s21 = smov (%p30_p1, %s28_s21), 0  ;;  %p212_p3 = pnand %p578_p0, %p211_p2 }
   0x6   : > { %p255_p4 = scmp.lt.s32.totalorder (!%p212_p3), %s678_s18, 1 }
   0x7   : > { %215 = sbr.rel (%p212_p3) target bundleno = 303 (0x12f), region = 32 }
   0xc   : > { %s787_s18 = smov (!%p255_p4, %s678_s18), 1  ;;  %v688_v2 = vmov 0   ;;  %v299_v3 = vld [vmem:[%s778_s2] sm:$0xff]  ;;  %v300_v5 = vld [vmem:[%s778_s2 + $0x8] sm:$0xff]  ;;  %vm384_vm0 = vcmask 973824   ;;  %vm381_vm1 = vcmask 969728  }
   0xd   : > { %s625_s22 = sshll.u32 %s787_s18, 6  ;;  %663 = vset.pattern.permute.xlu0 %v688_v2  ;;  %v629_v11 = vld [vmem:[%s777_s1] sm:$0xff]  ;;  %s626_s7 = sshll.u32 %s787_s18, 3  ;;  %vm403_vm2 = vcmask 7168  }
   0xe   : > { %s262_s25 = scalar_lea.vmem %s776_s0, %s625_s22  ;;  %303 = vperm.xlu0 %663, %v299_v3   ;;  %s270_s10 = scalar_lea.vmem %s779_s3, %s626_s7 }
   0xf   : > { %v637_v0 = vld [vmem:[%s262_s25 + $0x38] sm:$0xff]  ;;  %v636_v1 = vld [vmem:[%s262_s25 + $0x30] sm:$0xff]  ;;  %v635_v4 = vld [vmem:[%s262_s25 + $0x28] sm:$0xff]  ;;  %s627_s11 = sshll.u32 %s787_s18, 4 }
  0x10   : > { %365 = vmatpush.bf16.msra.mxu0 %v637_v0  ;;  %v634_v6 = vld [vmem:[%s262_s25 + $0x20] sm:$0xff]  ;;  %v633_v7 = vld [vmem:[%s262_s25 + $0x18] sm:$0xff]  ;;  %v632_v8 = vld [vmem:[%s262_s25 + $0x10] sm:$0xff]  ;;  %s275_s14 = scalar_lea.vmem %s780_s4, %s627_s11  ;;  %s280_s17 = scalar_lea.vmem %s781_s5, %s627_s11 }
  0x11   : > { %v631_v9 = vld [vmem:[%s262_s25 + $0x8] sm:$0xff]  ;;  %v630_v10 = vld [vmem:[%s262_s25] sm:$0xff] }
  0x14   : > { %366 = vmatpush.bf16.msra.mxu0 %v636_v1 }
  0x16   : > { %308 = vperm.xlu0 %663, %v300_v5  }
  0x18   : > { %367 = vmatpush.bf16.msra.mxu0 %v635_v4 }
  0x1c   : > { %368 = vmatpush.bf16.msra.mxu0 %v634_v6 }
  0x20   : > { %369 = vmatpush.bf16.msra.mxu0 %v633_v7 }
  0x24   : > { %370 = vmatpush.bf16.msra.mxu0 %v632_v8 }
  0x28   : > { %371 = vmatpush.bf16.msra.mxu0 %v631_v9 }
  0x2c   : > { %372 = vmatpush.bf16.msra.mxu0 %v630_v10 }
  0x2f   : > { %373 = vmatmul.bf16.vlgmr.msra.gmra.mxu0 %v629_v11 }
  0x80   : > { %v304_v12 = vpop.permute.xlu0 %303 }
  0x88   : > { %v309_v19 = vpop.permute.xlu0 %308 }
  0xac   : > { %v374_v13 = vpop.f32.mrf.mxu0 }
  0xad   : > { %v375_v14 = vadd.f32 %v374_v13, %v304_v12 }
  0xaf   : > { %v379_v15 = vpack.c.bf16 %v375_v14, %v375_v14  ;;  %v385_v16 = vsel %vm384_vm0, %v375_v14, 0.0  ;;  %v391_v17 = vmul.f32 %v375_v14, %v375_v14 }
  0xb0   : > { %386 = vadd.xlane.f32.xlu1 %v385_v16 }
  0xb1   : > { %382 = vst.msk [vmem:[%s270_s10] sm:$0xf] %vm381_vm1, %v379_v15  ;;  %v393_v18 = vsel %vm384_vm0, %v391_v17, 0.0 }
  0xb2   : > { %394 = vadd.xlane.f32.xlu2 %v393_v18 }
  0xb4   : > { %v376_v20 = vpop.f32.mrf.mxu0 }
  0xb5   : > { %v377_v21 = vadd.f32 %v376_v20, %v309_v19 }
  0xb7   : > { %v380_v22 = vpack.c.bf16 %v377_v21, %v377_v21  ;;  %v388_v23 = vsel %vm384_vm0, %v377_v21, 0.0  ;;  %v392_v24 = vmul.f32 %v377_v21, %v377_v21 }
  0xb8   : > { %389 = vadd.xlane.f32.xlu1 %v388_v23 }
  0xb9   : > { %383 = vst.msk [vmem:[%s270_s10 + $0x4] sm:$0xf] %vm381_vm1, %v380_v22  ;;  %v396_v25 = vsel %vm384_vm0, %v392_v24, 0.0 }
  0xba   : > { %397 = vadd.xlane.f32.xlu2 %v396_v25 }
 0x123   : > { %v387_v26 = vpop.xlane.xlu1 %386 }
 0x124   : > { %404 = vst.msk [vmem:[%s275_s14] sm:$0xff] %vm403_vm2, %v387_v26 }
 0x125   : > { %v395_v27 = vpop.xlane.xlu2 %394 }
 0x126   : > { %406 = vst.msk [vmem:[%s280_s17] sm:$0xff] %vm403_vm2, %v395_v27 }
 0x12b   : > { %v390_v28 = vpop.xlane.xlu1 %389 }
 0x12c   : > { %405 = vst.msk [vmem:[%s275_s14 + $0x8] sm:$0xff] %vm403_vm2, %v390_v28 }
 0x12d   : > { %v398_v29 = vpop.xlane.xlu2 %397 }
 0x12e   : > { %407 = vst.msk [vmem:[%s280_s17 + $0x8] sm:$0xff] %vm403_vm2, %v398_v29 }
 0x12f PF: > { %s16_s20 = sadd.s32 1, %s686_s20   ;;  %s782_s18 = smov %s682_s19 }
 0x130   : > { %p13_p5 = scmp.ge.s32.totalorder %s16_s20, 4   ;;  %s783_s19 = smov %s785_s21 }
 0x132   :  { %15 = sbr.rel (!%p13_p5) target bundleno = 2 (0x2), region = 94 }

// kernel: _lambda_.23
= control target key start
LH: loop header
LB: loop body
LE: loop exit
PB: predicated region body
PF: predicated region fallthrough
CT: control target
= control target key end

     0   :  { %s503_s12 = smov 0   ;;  %s505_s13 = smov 0   ;;  %s550_s0 = inlined_call_operand.vmem [shape: bf16[2,16,119], index: 0, kind: input, shape index: {}]   ;;  %s551_s1 = inlined_call_operand.vmem [shape: f32[2,16,1], index: 1, kind: input, shape index: {}]   ;;  %s552_s2 = inlined_call_operand.vmem [shape: f32[2,16,1], index: 2, kind: input, shape index: {}]   ;;  %s553_s3 = inlined_call_operand.vmem [shape: bf16[2,16,119], index: 3, kind: output, shape index: {}]  }
   0x1   :  { %s507_s14 = smov 0  }
   0x2 LB: > { %s25_s15 = sadd.s32 1, %s476_s13  ;;  %p408_p0 = scmp.ge.s32.totalorder %s480_s14, 1  ;;  %s480_s14 = sphi %s507_s14, %s13_s14   ;;  %s476_s13 = sphi %s505_s13, %s555_s13   ;;  %s472_s12 = sphi %s503_s12, %s554_s12  }
   0x3   : > { %p27_p1 = scmp.ge.s32.totalorder %s25_s15, 2  ;;  %p176_p2 = scmp.lt.s32.totalorder %s480_s14, 3 }
   0x5   : > { %s557_s15 = smov (%p27_p1, %s25_s15), 0  ;;  %p177_p3 = pnand %p408_p0, %p176_p2 }
   0x6   : > { %p216_p4 = scmp.lt.s32.totalorder (!%p177_p3), %s472_s12, 1 }
   0x7   : > { %180 = sbr.rel (%p177_p3) target bundleno = 168 (0xa8), region = 32 }
   0xc   : > { %v482_v0 = vmov 0   ;;  %s559_s12 = smov (!%p216_p4, %s472_s12), 1  ;;  %vm294_vm0 = vcmask 969728  }
   0xd   : > { %453 = vset.pattern.permute.xlu1 %v482_v0  ;;  %452 = vset.pattern.permute.xlu0 %v482_v0  ;;  %s420_s16 = sshll.u32 %s559_s12, 4  ;;  %s419_s23 = sshll.u32 %s559_s12, 3 }
   0xe   : > { %s233_s19 = scalar_lea.vmem %s552_s2, %s420_s16  ;;  %s228_s22 = scalar_lea.vmem %s551_s1, %s420_s16 }
   0xf   : > { %v260_v1 = vld [vmem:[%s233_s19] sm:$0xff]  ;;  %v261_v3 = vld [vmem:[%s233_s19 + $0x8] sm:$0xff]  ;;  %s223_s26 = scalar_lea.vmem %s550_s0, %s419_s23  ;;  %s241_s29 = scalar_lea.vmem %s553_s3, %s419_s23 }
  0x10   : > { %v246_v2 = vld [vmem:[%s228_s22] sm:$0xff]  ;;  %264 = vperm.xlu1 %453, %v260_v1   ;;  %v247_v4 = vld [vmem:[%s228_s22 + $0x8] sm:$0xff] }
  0x11   : > { %250 = vperm.xlu0 %452, %v246_v2   ;;  %v424_v5 = vld [vmem:[%s223_s26] sm:$0xff]  }
  0x12   : > { %v425_v6 = vunpack.c.l.bf16 %v424_v5  ;;  %v426_v12 = vunpack.c.h.bf16 %v424_v5 }
  0x18   : > { %269 = vperm.xlu1 %453, %v261_v3  }
  0x19   : > { %255 = vperm.xlu0 %452, %v247_v4  }
  0x82   : > { %v265_v7 = vpop.permute.xlu1 %264 }
  0x83   : > { %v251_v8 = vpop.permute.xlu0 %250 }
  0x84   : > { %v258_v9 = vmul.f32 %v425_v6, %v251_v8 }
  0x86   : > { %v272_v10 = vadd.f32 %v265_v7, %v258_v9 }
  0x88   : > { %v276_v11 = vmul.f32 0.044715, %v272_v10  ;;  %v274_v27 = vmul.f32 0.5, %v272_v10 }
  0x8a   : > { %v278_v13 = vmul.f32 %v276_v11, %v272_v10  ;;  %v270_v17 = vpop.permute.xlu1 %269 }
  0x8b   : > { %v256_v14 = vpop.permute.xlu0 %255 }
  0x8c   : > { %v280_v15 = vmul.f32 %v278_v13, %v272_v10  ;;  %v259_v16 = vmul.f32 %v426_v12, %v256_v14 }
  0x8e   : > { %v282_v18 = vadd.f32 %v280_v15, %v272_v10  ;;  %v273_v19 = vadd.f32 %v270_v17, %v259_v16 }
  0x90   : > { %v284_v20 = vmul.f32 0.7978846, %v282_v18  ;;  %v277_v21 = vmul.f32 0.044715, %v273_v19  ;;  %v275_v32 = vmul.f32 0.5, %v273_v19 }
  0x92   : > { %454 = vtanh.f32 %v284_v20  ;;  %v279_v22 = vmul.f32 %v277_v21, %v273_v19 }
  0x94   : > { %v281_v23 = vmul.f32 %v279_v22, %v273_v19 }
  0x96   : > { %v283_v24 = vadd.f32 %v281_v23, %v273_v19 }
  0x98   : > { %v455_v25 = vpop.eup %454  ;;  %v285_v26 = vmul.f32 0.7978846, %v283_v24 }
  0x99   : > { %v288_v28 = vadd.f32 1.0, %v455_v25 }
  0x9a   : > { %456 = vtanh.f32 %v285_v26 }
  0x9b   : > { %v290_v29 = vmul.f32 %v288_v28, %v274_v27 }
  0x9d   : > { %v292_v30 = vpack.c.bf16 %v290_v29, %v290_v29 }
  0x9f   : > { %295 = vst.msk [vmem:[%s241_s29] sm:$0xf] %vm294_vm0, %v292_v30 }
  0xa0   : > { %v457_v31 = vpop.eup %456 }
  0xa1   : > { %v289_v33 = vadd.f32 1.0, %v457_v31 }
  0xa3   : > { %v291_v34 = vmul.f32 %v289_v33, %v275_v32 }
  0xa5   : > { %v293_v35 = vpack.c.bf16 %v291_v34, %v291_v34 }
  0xa7   : > { %296 = vst.msk [vmem:[%s241_s29 + $0x4] sm:$0xf] %vm294_vm0, %v293_v35 }
  0xa8 PF: > { %s13_s14 = sadd.s32 1, %s480_s14   ;;  %s554_s12 = smov %s476_s13 }
  0xa9   : > { %p10_p5 = scmp.ge.s32.totalorder %s13_s14, 4   ;;  %s555_s13 = smov %s557_s15 }
  0xab   :  { %12 = sbr.rel (!%p10_p5) target bundleno = 2 (0x2), region = 68 }

// kernel: _lambda_.24
= control target key start
LH: loop header
LB: loop body
LE: loop exit
PB: predicated region body
PF: predicated region fallthrough
CT: control target
= control target key end

     0   :  { %s936_s18 = smov 0   ;;  %s938_s19 = smov 0   ;;  %s1105_s0 = inlined_call_operand.vmem [shape: bf16[2,144,136], index: 0, kind: input, shape index: {}]   ;;  %s1106_s1 = inlined_call_operand.vmem [shape: bf16[16,144], index: 1, kind: input, shape index: {}]   ;;  %s1107_s2 = inlined_call_operand.vmem [shape: bf16[16,144], index: 2, kind: input, shape index: {}]   ;;  %s1108_s3 = inlined_call_operand.vmem [shape: f32[16,1], index: 3, kind: input, shape index: {}]   ;;  %s1109_s4 = inlined_call_operand.vmem [shape: f32[16,1], index: 4, kind: input, shape index: {}]   ;;  %s1110_s5 = inlined_call_operand.vmem [shape: bf16[2,16,136], index: 5, kind: output, shape index: {}]  }
   0x1   :  { %s940_s20 = smov 0  }
   0x2 LB: > { %s27_s21 = sadd.s32 1, %s899_s19  ;;  %p716_p0 = scmp.ge.s32.totalorder %s903_s20, 1  ;;  %s903_s20 = sphi %s940_s20, %s15_s20   ;;  %s899_s19 = sphi %s938_s19, %s1116_s19   ;;  %s895_s18 = sphi %s936_s18, %s1115_s18  }
   0x3   : > { %p29_p1 = scmp.ge.s32.totalorder %s27_s21, 2  ;;  %p208_p2 = scmp.lt.s32.totalorder %s903_s20, 3 }
   0x5   : > { %s1118_s21 = smov (%p29_p1, %s27_s21), 0  ;;  %p209_p3 = pnand %p716_p0, %p208_p2 }
   0x6   : > { %p245_p4 = scmp.lt.s32.totalorder (!%p209_p3), %s895_s18, 1 }
   0x7   : > { %212 = sbr.rel (%p209_p3) target bundleno = 238 (0xee), region = 40 }
   0xc   : > { %s1120_s18 = smov (!%p245_p4, %s895_s18), 1  ;;  %v835_v0 = vld [vmem:[%s1107_s2 + $0x4] sm:$0xf]  ;;  %v806_v1 = vld [vmem:[%s1107_s2 + $0x8] sm:$0xf0]  ;;  %vm396_vm0 = vcmask 130048  }
   0xd   : > { %s837_s22 = smul.u32 144, %s1120_s18  ;;  %v833_v2 = vld [vmem:[%s1106_s1 + $0x4] sm:$0xf]  ;;  %v724_v3 = vld [vmem:[%s1106_s1 + $0x8] sm:$0xf0]  ;;  %v984_v18 = vor.u32 %v835_v0, %v806_v1  ;;  %v905_v39 = vmov 0  }
   0xe   : > { %v988_v21 = vor.u32 %v833_v2, %v724_v3  ;;  %v285_v35 = vld [vmem:[%s1108_s3] sm:$0xff]  ;;  %864 = vset.pattern.permute.xlu1 %v905_v39  ;;  %863 = vset.pattern.permute.xlu0 %v905_v39  ;;  %v286_v50 = vld [vmem:[%s1108_s3 + $0x8] sm:$0xff]  ;;  %vm620_vm5 = vcmask 1043456   ;;  %vm621_vm8 = vcmask 64516   ;;  %s814_s29 = sshll.u32 %s1120_s18, 4 }
   0xf   : > { %s963_s27 = scalar_lea.vmem %s1105_s0, %s837_s22  ;;  %v458_v36 = vld [vmem:[%s1109_s4] sm:$0xff]  ;;  %289 = vperm.xlu1 %864, %v285_v35   ;;  %v459_v51 = vld [vmem:[%s1109_s4 + $0x8] sm:$0xff]  ;;  %vm1078_vm13 = vmor %vm621_vm8, %vm620_vm5  ;;  %s262_s6 = scalar_lea.vmem %s1110_s5, %s814_s29 }
  0x10   : > { %v786_v4 = vld [vmem:[%s963_s27 + $0x70] sm:$0xf]  ;;  %v830_v5 = vld [vmem:[%s963_s27 + $0x74] sm:$0xf0]  ;;  %v794_v6 = vld [vmem:[%s963_s27 + $0x80] sm:$0xf]  ;;  %462 = vperm.xlu0 %863, %v458_v36  }
  0x11   : > { %v787_v7 = vor.u32 %v830_v5, %v786_v4  ;;  %v832_v8 = vld [vmem:[%s963_s27 + $0x84] sm:$0xf0]  ;;  %v829_v9 = vld [vmem:[%s963_s27 + $0x74] sm:$0xf]  ;;  %v788_v10 = vld [vmem:[%s963_s27 + $0x78] sm:$0xf0] }
  0x12   : > { %v795_v11 = vor.u32 %v832_v8, %v794_v6  ;;  %v791_v12 = vor.u32 %v829_v9, %v788_v10  ;;  %v778_v13 = vld [vmem:[%s963_s27 + $0x60] sm:$0xf]  ;;  %v828_v14 = vld [vmem:[%s963_s27 + $0x64] sm:$0xf0]  ;;  %v827_v15 = vld [vmem:[%s963_s27 + $0x64] sm:$0xf] }
  0x13   : > { %400 = vmatpush.bf16.msra.mxu0 %v787_v7  ;;  %v779_v16 = vor.u32 %v828_v14, %v778_v13  ;;  %v780_v17 = vld [vmem:[%s963_s27 + $0x68] sm:$0xf0]  ;;  %v770_v19 = vld [vmem:[%s963_s27 + $0x50] sm:$0xf]  ;;  %v826_v20 = vld [vmem:[%s963_s27 + $0x54] sm:$0xf0] }
  0x14   : > { %421 = vmatpush.bf16.msra.mxu1 %v795_v11  ;;  %503 = vmatpush.bf16.msra.mxu3 %v795_v11  ;;  %v783_v22 = vor.u32 %v827_v15, %v780_v17  ;;  %v825_v23 = vld [vmem:[%s963_s27 + $0x54] sm:$0xf]  ;;  %v772_v24 = vld [vmem:[%s963_s27 + $0x58] sm:$0xf0]  ;;  %v771_v25 = vor.u32 %v826_v20, %v770_v19  ;;  %v762_v26 = vld [vmem:[%s963_s27 + $0x40] sm:$0xf] }
  0x15   : > { %428 = vmatpush.bf16.msra.mxu2 %v791_v12  ;;  %v824_v27 = vld [vmem:[%s963_s27 + $0x44] sm:$0xf0]  ;;  %v775_v28 = vor.u32 %v825_v23, %v772_v24  ;;  %v823_v29 = vld [vmem:[%s963_s27 + $0x44] sm:$0xf]  ;;  %v764_v30 = vld [vmem:[%s963_s27 + $0x48] sm:$0xf0] }
  0x16   : > { %v763_v31 = vor.u32 %v824_v27, %v762_v26  ;;  %v754_v32 = vld [vmem:[%s963_s27 + $0x30] sm:$0xf]  ;;  %v822_v33 = vld [vmem:[%s963_s27 + $0x34] sm:$0xf0]  ;;  %v767_v34 = vor.u32 %v823_v29, %v764_v30  ;;  %v821_v37 = vld [vmem:[%s963_s27 + $0x34] sm:$0xf] }
  0x17   : > { %401 = vmatpush.bf16.msra.mxu0 %v779_v16  ;;  %810 = vmatmul.msk.bf16.vlgmr.msra.gmra.mxu3 %vm396_vm0, %v984_v18  ;;  %v756_v38 = vld [vmem:[%s963_s27 + $0x38] sm:$0xf0]  ;;  %v755_v40 = vor.u32 %v822_v33, %v754_v32  ;;  %v746_v41 = vld [vmem:[%s963_s27 + $0x20] sm:$0xf]  ;;  %v820_v42 = vld [vmem:[%s963_s27 + $0x24] sm:$0xf0] }
  0x18   : > { %482 = vmatpush.bf16.msrb.mxu1 %v787_v7  ;;  %510 = vmatpush.bf16.msrb.mxu3 %v791_v12  ;;  %v759_v43 = vor.u32 %v821_v37, %v756_v38  ;;  %v819_v44 = vld [vmem:[%s963_s27 + $0x24] sm:$0xf]  ;;  %v748_v45 = vld [vmem:[%s963_s27 + $0x28] sm:$0xf0]  ;;  %v747_v46 = vor.u32 %v820_v42, %v746_v41  ;;  %v738_v47 = vld [vmem:[%s963_s27 + $0x10] sm:$0xf] }
  0x19   : > { %800 = vmatmul.msk.bf16.vlgmr.msra.gmra.mxu1 %vm396_vm0, %v988_v21  ;;  %429 = vmatpush.bf16.msra.mxu2 %v783_v22  ;;  %v818_v48 = vld [vmem:[%s963_s27 + $0x14] sm:$0xf0]  ;;  %v751_v49 = vor.u32 %v819_v44, %v748_v45  ;;  %v817_v52 = vld [vmem:[%s963_s27 + $0x14] sm:$0xf]  ;;  %v740_v53 = vld [vmem:[%s963_s27 + $0x18] sm:$0xf0] }
  0x1a   : > { %v739_v54 = vor.u32 %v818_v48, %v738_v47  ;;  %v730_v55 = vld [vmem:[%s963_s27] sm:$0xf]  ;;  %v816_v56 = vld [vmem:[%s963_s27 + $0x4] sm:$0xf0]  ;;  %294 = vperm.xlu1 %864, %v286_v50   ;;  %467 = vperm.xlu0 %863, %v459_v51   ;;  %v743_v57 = vor.u32 %v817_v52, %v740_v53  ;;  %v831_v58 = vld [vmem:[%s963_s27 + $0x84] sm:$0xf] }
  0x1b   : > { %402 = vmatpush.bf16.msra.mxu0 %v771_v25  ;;  %v796_v59 = vld [vmem:[%s963_s27 + $0x88] sm:$0xf0]  ;;  %v815_v60 = vld [vmem:[%s963_s27 + $0x4] sm:$0xf]  ;;  %v731_v62 = vor.u32 %v816_v56, %v730_v55  ;;  %v722_v63 = vld [vmem:[%s1106_s1] sm:$0xf] }
  0x1c   : > { %483 = vmatpush.bf16.msrb.mxu1 %v779_v16  ;;  %511 = vmatpush.bf16.msrb.mxu3 %v783_v22  ;;  %v732_v61 = vld [vmem:[%s963_s27 + $0x8] sm:$0xf0]  ;;  %v834_v0 = vld [vmem:[%s1106_s1 + $0x4] sm:$0xf0]  ;;  %v799_v1 = vor.u32 %v831_v58, %v796_v59  ;;  %v804_v3 = vld [vmem:[%s1107_s2] sm:$0xf] }
  0x1d   : > { %430 = vmatpush.bf16.msra.mxu2 %v775_v28  ;;  %v735_v2 = vor.u32 %v815_v60, %v732_v61  ;;  %v836_v4 = vld [vmem:[%s1107_s2 + $0x4] sm:$0xf0]  ;;  %v723_v5 = vor.u32 %v834_v0, %v722_v63 }
  0x1e   : > { %v805_v6 = vor.u32 %v836_v4, %v804_v3 }
  0x1f   : > { %403 = vmatpush.bf16.msra.mxu0 %v763_v31 }
  0x20   : > { %484 = vmatpush.bf16.msrb.mxu1 %v771_v25  ;;  %512 = vmatpush.bf16.msrb.mxu3 %v775_v28 }
  0x21   : > { %431 = vmatpush.bf16.msra.mxu2 %v767_v34 }
  0x23   : > { %404 = vmatpush.bf16.msra.mxu0 %v755_v40 }
  0x24   : > { %485 = vmatpush.bf16.msrb.mxu1 %v763_v31  ;;  %513 = vmatpush.bf16.msrb.mxu3 %v767_v34 }
  0x25   : > { %432 = vmatpush.bf16.msra.mxu2 %v759_v43 }
  0x27   : > { %405 = vmatpush.bf16.msra.mxu0 %v747_v46 }
  0x28   : > { %486 = vmatpush.bf16.msrb.mxu1 %v755_v40  ;;  %514 = vmatpush.bf16.msrb.mxu3 %v759_v43 }
  0x29   : > { %433 = vmatpush.bf16.msra.mxu2 %v751_v49 }
  0x2b   : > { %406 = vmatpush.bf16.msra.mxu0 %v739_v54 }
  0x2c   : > { %487 = vmatpush.bf16.msrb.mxu1 %v747_v46  ;;  %515 = vmatpush.bf16.msrb.mxu3 %v751_v49 }
  0x2d   : > { %434 = vmatpush.bf16.msra.mxu2 %v743_v57 }
  0x2f   : > { %407 = vmatpush.bf16.msra.mxu0 %v731_v62 }
  0x30   : > { %488 = vmatpush.bf16.msrb.mxu1 %v739_v54  ;;  %516 = vmatpush.bf16.msrb.mxu3 %v743_v57 }
  0x31   : > { %435 = vmatpush.bf16.msra.mxu2 %v735_v2 }
  0x32   : > { %408 = vmatmul.bf16.vlgmr.msra.gmra.mxu0 %v723_v5 }
  0x33   : > { %531 = vmatpush.bf16.msrb.mxu0 %v799_v1 }
  0x34   : > { %489 = vmatpush.bf16.msrb.mxu1 %v731_v62  ;;  %517 = vmatpush.bf16.msrb.mxu3 %v735_v2 }
  0x35   : > { %449 = vmatpush.bf16.msrb.mxu2 %v799_v1 }
  0x36   : > { %436 = vmatmul.bf16.vlgmr.msra.gmra.mxu2 %v723_v5 }
  0x37   : > { %490 = vmatmul.bf16.vlgmr.msrb.gmra.mxu1 %v805_v6  ;;  %518 = vmatmul.bf16.vlgmr.msrb.gmra.mxu3 %v805_v6 }
  0x42   : > { %811 = vmatmul.msk.bf16.vlgmr.msrb.gmra.mxu0 %vm396_vm0, %v984_v18 }
  0x46   : > { %801 = vmatmul.msk.bf16.vlgmr.msrb.gmra.mxu2 %vm396_vm0, %v988_v21 }
  0x81   : > { %v290_v52 = vpop.permute.xlu1 %289 }
  0x82   : > { %v463_v10 = vpop.permute.xlu0 %462 }
  0x8c   : > { %v468_v19 = vpop.permute.xlu0 %467 }
  0x96   : > { %v1046_v7 = vpop.f32.mrf.mxu1 }
  0x9a   : > { %v505_v8 = vpop.f32.mrf.mxu3 }
  0x9e   : > { %v1048_v9 = vpop.f32.mrf.mxu1 }
  0xa2   : > { %v507_v11 = vpop.f32.mrf.mxu3 }
  0xaf   : > { %v409_v12 = vpop.f32.mrf.mxu0 }
  0xb0   : > { %v410_v58 = vadd.f32 %v409_v12, %v290_v52 }
  0xb2   : > { %v424_v6 = vadd.f32 %v1046_v7, %v410_v58 }
  0xb4   : > { %v491_v13 = vpop.f32.mrf.mxu1 }
  0xb5   : > { %v492_v14 = vadd.f32 %v491_v13, %v463_v10 }
  0xb7   : > { %v506_v15 = vadd.f32 %v505_v8, %v492_v14  ;;  %v1050_v17 = vpop.f32.mrf.mxu0 }
  0xb9   : > { %v538_v16 = vsub.f32 0.0, %v506_v15  ;;  %v437_v34 = vpop.f32.mrf.mxu2  ;;  %v295_v15 = vpop.permute.xlu1 %294 }
  0xba   : > { %v519_v18 = vpop.f32.mrf.mxu3  ;;  %v438_v62 = vadd.f32 %v437_v34, %v290_v52 }
  0xbb   : > { %v542_v20 = vmul.f32 1.442695, %v538_v16  ;;  %v520_v23 = vadd.f32 %v519_v18, %v463_v10 }
  0xbc   : > { %v493_v22 = vpop.f32.mrf.mxu1 }
  0xbd   : > { %865 = vpow2.f32 %v542_v20  ;;  %v494_v21 = vadd.f32 %v493_v22, %v468_v19 }
  0xbf   : > { %v508_v24 = vadd.f32 %v507_v11, %v494_v21  ;;  %v533_v26 = vpop.f32.mrf.mxu0 }
  0xc0   : > { %v534_v29 = vadd.f32 %v533_v26, %v520_v23  ;;  %v412_v26 = vadd.f32 %v1050_v17, %v295_v15 }
  0xc1   : > { %v540_v25 = vsub.f32 0.0, %v508_v24  ;;  %v439_v47 = vpop.f32.mrf.mxu2 }
  0xc2   : > { %v539_v31 = vsub.f32 0.0, %v534_v29  ;;  %v521_v32 = vpop.f32.mrf.mxu3 }
  0xc3   : > { %v866_v27 = vpop.eup %865  ;;  %v546_v28 = vmul.f32 1.442695, %v540_v25  ;;  %v522_v35 = vadd.f32 %v521_v32, %v468_v19 }
  0xc4   : > { %v550_v30 = vadd.f32 1.0, %v866_v27  ;;  %v544_v33 = vmul.f32 1.442695, %v539_v31  ;;  %v440_v27 = vadd.f32 %v439_v47, %v295_v15 }
  0xc5   : > { %867 = vpow2.f32 %v546_v28 }
  0xc6   : > { %869 = vrcp.f32 %v550_v30  ;;  %v565_v59 = vand.u32 2147483648, %v550_v30  ;;  %vm559_vm2 = vweird.f32 %v550_v30  ;;  %v563_v60 = vand.u32 2147483647, %v550_v30 }
  0xc7   : > { %871 = vpow2.f32 %v544_v33  ;;  %v535_v36 = vpop.f32.mrf.mxu0 }
  0xc8   : > { %v536_v38 = vadd.f32 %v535_v36, %v522_v35  ;;  %v566_v8 = vor.u32 1.1754944e-38, %v565_v59  ;;  %vm564_vm6 = vcmp.eq.f32.partialorder %v563_v60, 8.507059e+37 }
  0xc9   : > { %v451_v63 = vpop.f32.mrf.mxu2 }
  0xca   : > { %v541_v42 = vsub.f32 0.0, %v536_v38  ;;  %v452_v12 = vadd.f32 %v451_v63, %v438_v62 }
  0xcb   : > { %v868_v37 = vpop.eup %867 }
  0xcc   : > { %v870_v39 = vpop.eup %869  ;;  %v1052_v40 = vadd.f32 1.0, %v868_v37  ;;  %v548_v44 = vmul.f32 1.442695, %v541_v42  ;;  %v426_v37 = vadd.f32 %v1048_v9, %v412_v26 }
  0xcd   : > { %v555_v41 = vmul.f32 %v870_v39, %v550_v30  ;;  %v872_v43 = vpop.eup %871  ;;  %vm560_vm1 = vweird.f32 %v870_v39 }
  0xce   : > { %873 = vrcp.f32 %v1052_v40  ;;  %v551_v45 = vadd.f32 1.0, %v872_v43  ;;  %vm1062_vm3 = vmor %vm559_vm2, %vm560_vm1  ;;  %vm589_vm12 = vweird.f32 %v1052_v40  ;;  %v595_v18 = vand.u32 2147483648, %v1052_v40 }
  0xcf   : > { %v556_v46 = vsub.f32 1.0, %v555_v41  ;;  %875 = vpow2.f32 %v548_v44  ;;  %v593_v24 = vand.u32 2147483647, %v1052_v40 }
  0xd0   : > { %877 = vrcp.f32 %v551_v45  ;;  %v578_v1 = vand.u32 2147483647, %v551_v45  ;;  %v580_v2 = vand.u32 2147483648, %v551_v45  ;;  %vm574_vm7 = vweird.f32 %v551_v45 }
  0xd1   : > { %v557_v50 = vmul.f32 %v870_v39, %v556_v46  ;;  %v453_v33 = vpop.f32.mrf.mxu2  ;;  %v596_v34 = vor.u32 1.1754944e-38, %v595_v18  ;;  %vm594_vm0 = vcmp.eq.f32.partialorder %v593_v24, 8.507059e+37 }
  0xd2   : > { %vm579_vm10 = vcmp.eq.f32.partialorder %v578_v1, 8.507059e+37  ;;  %v581_v14 = vor.u32 1.1754944e-38, %v580_v2  ;;  %v454_v38 = vadd.f32 %v453_v33, %v440_v27 }
  0xd3   : > { %v558_v55 = vadd.f32 %v870_v39, %v557_v50 }
  0xd4   : > { %v1055_v48 = vpop.eup %873 }
  0xd5   : > { %v585_v49 = vmul.f32 %v1055_v48, %v1052_v40  ;;  %v876_v51 = vpop.eup %875  ;;  %v562_v3 = vsel %vm1062_vm3, %v870_v39, %v558_v55  ;;  %vm590_vm11 = vweird.f32 %v1055_v48 }
  0xd6   : > { %v878_v53 = vpop.eup %877  ;;  %v1059_v54 = vadd.f32 1.0, %v876_v51  ;;  %v567_v13 = vsel %vm564_vm6, %v566_v8, %v562_v3  ;;  %vm591_vm14 = vmor %vm589_vm12, %vm590_vm11 }
  0xd7   : > { %v570_v56 = vmul.f32 %v878_v53, %v551_v45  ;;  %v586_v57 = vsub.f32 1.0, %v585_v49  ;;  %vm575_vm4 = vweird.f32 %v878_v53  ;;  %v614_v22 = vmul.f32 %v567_v13, %v424_v6 }
  0xd8   : > { %879 = vrcp.f32 %v1059_v54  ;;  %vm576_vm9 = vmor %vm574_vm7, %vm575_vm4  ;;  %v608_v28 = vand.u32 2147483647, %v1059_v54  ;;  %v610_v29 = vand.u32 2147483648, %v1059_v54  ;;  %vm604_vm1 = vweird.f32 %v1059_v54 }
  0xd9   : > { %v571_v61 = vsub.f32 1.0, %v570_v56  ;;  %v587_v5 = vmul.f32 %v1055_v48, %v586_v57 }
  0xda   : > { %v611_v36 = vor.u32 1.1754944e-38, %v610_v29  ;;  %vm609_vm3 = vcmp.eq.f32.partialorder %v608_v28, 8.507059e+37 }
  0xdb   : > { %v572_v4 = vmul.f32 %v878_v53, %v571_v61  ;;  %v588_v19 = vadd.f32 %v1055_v48, %v587_v5 }
  0xdd   : > { %v573_v10 = vadd.f32 %v878_v53, %v572_v4  ;;  %v592_v31 = vsel %vm591_vm14, %v1055_v48, %v588_v19 }
  0xde   : > { %v880_v11 = vpop.eup %879  ;;  %v597_v35 = vsel %vm594_vm0, %v596_v34, %v592_v31 }
  0xdf   : > { %v577_v16 = vsel %vm576_vm9, %v878_v53, %v573_v10  ;;  %v600_v7 = vmul.f32 %v880_v11, %v1059_v54  ;;  %vm605_vm15 = vweird.f32 %v880_v11  ;;  %v616_v41 = vmul.f32 %v597_v35, %v426_v37 }
  0xe0   : > { %v582_v20 = vsel %vm579_vm10, %v581_v14, %v577_v16  ;;  %vm606_vm2 = vmor %vm604_vm1, %vm605_vm15 }
  0xe1   : > { %v615_v21 = vmul.f32 %v582_v20, %v452_v12  ;;  %v601_v25 = vsub.f32 1.0, %v600_v7 }
  0xe3   : > { %v618_v30 = vpack.c.bf16 %v615_v21, %v614_v22  ;;  %v602_v32 = vmul.f32 %v880_v11, %v601_v25 }
  0xe5   : > { %623 = vst.msk [vmem:[%s262_s6] sm:$0xff] %vm1078_vm13, %v618_v30  ;;  %v603_v17 = vadd.f32 %v880_v11, %v602_v32 }
  0xe7   : > { %v607_v39 = vsel %vm606_vm2, %v880_v11, %v603_v17 }
  0xe8   : > { %v612_v40 = vsel %vm609_vm3, %v611_v36, %v607_v39 }
  0xe9   : > { %v617_v42 = vmul.f32 %v612_v40, %v454_v38 }
  0xeb   : > { %v619_v43 = vpack.c.bf16 %v617_v42, %v616_v41 }
  0xed   : > { %624 = vst.msk [vmem:[%s262_s6 + $0x8] sm:$0xff] %vm1078_vm13, %v619_v43 }
  0xee PF: > { %s15_s20 = sadd.s32 1, %s903_s20   ;;  %s1115_s18 = smov %s899_s19 }
  0xef   : > { %p12_p5 = scmp.ge.s32.totalorder %s15_s20, 4   ;;  %s1116_s19 = smov %s1118_s21 }
  0xf1   :  { %14 = sbr.rel (!%p12_p5) target bundleno = 2 (0x2), region = 70 }

// kernel: _lambda_.25
= control target key start
LH: loop header
LB: loop body
LE: loop exit
PB: predicated region body
PF: predicated region fallthrough
CT: control target
= control target key end

     0   :  { %s468_s12 = smov 0   ;;  %s470_s13 = smov 0   ;;  %s507_s0 = inlined_call_operand.vmem [shape: bf16[2,32,153], index: 0, kind: input, shape index: {}]   ;;  %s508_s1 = inlined_call_operand.vmem [shape: bf16[8,32], index: 1, kind: input, shape index: {}]   ;;  %s509_s2 = inlined_call_operand.vmem [shape: f32[8,1], index: 2, kind: input, shape index: {}]   ;;  %s510_s3 = inlined_call_operand.vmem [shape: f32[2,8,153], index: 3, kind: output, shape index: {}]  }
   0x1   :  { %s472_s14 = smov 0  }
   0x2 LB: > { %s25_s15 = sadd.s32 1, %s441_s13  ;;  %p366_p0 = scmp.ge.s32.totalorder %s445_s14, 1  ;;  %s445_s14 = sphi %s472_s14, %s13_s14   ;;  %s441_s13 = sphi %s470_s13, %s512_s13   ;;  %s437_s12 = sphi %s468_s12, %s511_s12  }
   0x3   : > { %p27_p1 = scmp.ge.s32.totalorder %s25_s15, 2  ;;  %p158_p2 = scmp.lt.s32.totalorder %s445_s14, 3 }
   0x5   : > { %s514_s15 = smov (%p27_p1, %s25_s15), 0  ;;  %p159_p3 = pnand %p366_p0, %p158_p2 }
   0x6   : > { %p191_p4 = scmp.lt.s32.totalorder (!%p159_p3), %s437_s12, 1 }
   0x7   : > { %162 = sbr.rel (%p159_p3) target bundleno = 160 (0xa0), region = 32 }
   0xc   : > { %v216_v0 = vld [vmem:[%s509_s2] sm:$0xff]  ;;  %v447_v1 = vmov 0   ;;  %s516_s12 = smov (!%p191_p4, %s437_s12), 1  ;;  %vm242_vm0 = vcmask 261120   ;;  %vm273_vm1 = vcmask 203776  }
   0xd   : > { %422 = vset.pattern.permute.xlu0 %v447_v1  ;;  %s391_s18 = sshll.u32 %s516_s12, 5  ;;  %v211_v14 = vld [vmem:[%s508_s1] sm:$0xf]  ;;  %s392_s24 = sshll.u32 %s516_s12, 4 }
   0xe   : > { %219 = vperm.xlu0 %422, %v216_v0   ;;  %s198_s21 = scalar_lea.vmem %s507_s0, %s391_s18  ;;  %s208_s27 = scalar_lea.vmem %s510_s3, %s392_s24 }
   0xf   : > { %v381_v2 = vld [vmem:[%s198_s21 + $0x10] sm:$0xf]  ;;  %v396_v3 = vld [vmem:[%s198_s21 + $0x14] sm:$0xf0]  ;;  %v395_v4 = vld [vmem:[%s198_s21 + $0x14] sm:$0xf] }
  0x10   : > { %v382_v5 = vor.u32 %v396_v3, %v381_v2  ;;  %v383_v6 = vld [vmem:[%s198_s21 + $0x18] sm:$0xf0]  ;;  %v373_v7 = vld [vmem:[%s198_s21] sm:$0xf]  ;;  %v394_v8 = vld [vmem:[%s198_s21 + $0x4] sm:$0xf0] }
  0x11   : > { %v386_v9 = vor.u32 %v395_v4, %v383_v6  ;;  %v393_v10 = vld [vmem:[%s198_s21 + $0x4] sm:$0xf]  ;;  %v375_v11 = vld [vmem:[%s198_s21 + $0x8] sm:$0xf0]  ;;  %v374_v12 = vor.u32 %v394_v8, %v373_v7 }
  0x12   : > { %252 = vmatpush.bf16.msra.mxu0 %v382_v5  ;;  %v378_v13 = vor.u32 %v393_v10, %v375_v11 }
  0x13   : > { %265 = vmatpush.bf16.msra.mxu1 %v386_v9 }
  0x16   : > { %253 = vmatpush.bf16.msra.mxu0 %v374_v12 }
  0x17   : > { %266 = vmatpush.bf16.msra.mxu1 %v378_v13 }
  0x19   : > { %387 = vmatmul.msk.bf16.vlgmr.msra.gmra.mxu0 %vm242_vm0, %v211_v14 }
  0x1a   : > { %388 = vmatmul.msk.bf16.vlgmr.msra.gmra.mxu1 %vm242_vm0, %v211_v14 }
  0x80   : > { %v220_v15 = vpop.permute.xlu0 %219 }
  0x96   : > { %v255_v16 = vpop.f32.mrf.mxu0 }
  0x97   : > { %v256_v17 = vadd.f32 %v255_v16, %v220_v15  ;;  %v268_v18 = vpop.f32.mrf.mxu1 }
  0x98   : > { %v269_v19 = vadd.f32 %v268_v18, %v220_v15 }
  0x99   : > { %272 = vst [vmem:[%s208_s27] sm:$0xff] %v256_v17 }
  0x9a   : > { %274 = vst.msk [vmem:[%s208_s27 + $0x8] sm:$0xff] %vm273_vm1, %v269_v19 }
  0x9e   : > { %v257_v20 = vpop.f32.mrf.mxu0 }
  0x9f   : > { %v270_v21 = vpop.f32.mrf.mxu1 }
  0xa0 PF: > { %s13_s14 = sadd.s32 1, %s445_s14   ;;  %s511_s12 = smov %s441_s13 }
  0xa1   : > { %p10_p5 = scmp.ge.s32.totalorder %s13_s14, 4   ;;  %s512_s13 = smov %s514_s15 }
  0xa3   :  { %12 = sbr.rel (!%p10_p5) target bundleno = 2 (0x2), region = 62 }

// kernel: reverse.0
= control target key start
LH: loop header
LB: loop body
LE: loop exit
PB: predicated region body
PF: predicated region fallthrough
CT: control target
= control target key end

     0   :  { %v2_v0 = vlaneseq  ;;  %s205_s0 = inlined_call_operand.vmem [shape: f32[2,17,31], index: 0, kind: input, shape index: {}]   ;;  %s206_s1 = inlined_call_operand.vmem [shape: f32[2,17,31], index: 1, kind: output, shape index: {}]  }
   0x1   :  { %v47_v2 = vld [vmem:[%s205_s0 + $0x10] sm:$0xff]  ;;  %v43_v3 = vld [vmem:[%s205_s0] sm:$0xff]  ;;  %v49_v5 = vld [vmem:[%s205_s0 + $0x18] sm:$0xff] }
   0x2   :  { %v3_v1 = vsub.s32 30, %v2_v0  ;;  %v51_v4 = vld [vmem:[%s205_s0 + $0x20] sm:$0xff]  ;;  %v45_v6 = vld [vmem:[%s205_s0 + $0x8] sm:$0xff] }
   0x3   :  { %v53_v7 = vld [vmem:[%s205_s0 + $0x28] sm:$0xff] }
   0x4   :  { %4 = vset.pattern.permute.xlu0 %v3_v1  ;;  %157 = vset.pattern.permute.xlu1 %v3_v1 }
   0x5   :  { %158 = vset.pattern.permute.xlu2 %v3_v1  ;;  %71 = vperm.xlu1 %157, %v47_v2  }
   0x6   :  { %59 = vperm.xlu0 %4, %v43_v3   ;;  %83 = vperm.xlu2 %158, %v51_v4  }
   0xd   :  { %77 = vperm.xlu1 %157, %v49_v5  }
   0xe   :  { %65 = vperm.xlu0 %4, %v45_v6   ;;  %89 = vperm.xlu2 %158, %v53_v7  }
  0x60   :  { %v84_v8 = vpop.permute.xlu2 %83 }
  0x61   :  { %139 = vst [vmem:[%s206_s1 + $0x20] sm:$0xff] %v84_v8 }
  0x68   :  { %v90_v9 = vpop.permute.xlu2 %89 }
  0x69   :  { %141 = vst [vmem:[%s206_s1 + $0x28] sm:$0xff] %v90_v9 }
  0x77   :  { %v72_v10 = vpop.permute.xlu1 %71 }
  0x78   :  { %v60_v11 = vpop.permute.xlu0 %59  ;;  %135 = vst [vmem:[%s206_s1 + $0x10] sm:$0xff] %v72_v10 }
  0x79   :  { %131 = vst [vmem:[%s206_s1] sm:$0xff] %v60_v11 }
  0x7f   :  { %v78_v12 = vpop.permute.xlu1 %77 }
  0x80   :  { %v66_v13 = vpop.permute.xlu0 %65  ;;  %137 = vst [vmem:[%s206_s1 + $0x18] sm:$0xff] %v78_v12 }
  0x81   :  { %133 = vst [vmem:[%s206_s1 + $0x8] sm:$0xff] %v66_v13 }

</bundles_post_ra>
